<compile_context>
chip_gen: v5e
topology: v5e:2x2
jax: 0.10.0
libtpu: 0.0.40
codegen_flags: <defaults>
</compile_context>

<pallas_src>
import functools

import jax
import jax.numpy as jnp
from jax.experimental import pallas as pl
from jax.experimental.pallas import tpu as pltpu


def _round_up(x, m):
    return (x + m - 1) // m * m


# -----------------------------------------------------------------------------
# Pallas kernel: one M-tile of   out = act( X @ W + b )
#   X tile : [TILE_M, K]   bf16   (im2col patches)
#   W      : [K, Np]       bf16   (constant index_map -> stays VMEM-resident)
#   b      : [1, Np]       f32
#   out    : [TILE_M, Np]  f32
# -----------------------------------------------------------------------------
def _mm_bias_act_kernel(x_ref, w_ref, b_ref, o_ref, *, act):
    acc = jnp.dot(x_ref[...], w_ref[...], preferred_element_type=jnp.float32)
    acc = acc + b_ref[...]                       # (1, Np) broadcasts over rows
    if act == "leaky":                           # nn.LeakyReLU(0.1)
        acc = jnp.where(acc >= 0.0, acc, 0.1 * acc)
    elif act == "relu":                          # nn.ReLU
        acc = jnp.maximum(acc, 0.0)
    o_ref[...] = acc.astype(o_ref.dtype)


def matmul_bias_act(x, w, b2, act="none", tile_m_cap=256):
    """x: [M, K] bf16, w: [K, Np] bf16, b2: [1, Np] f32 -> [M, Np] f32."""
    M, K = x.shape
    K2, Np = w.shape
    assert K == K2 and b2.shape == (1, Np)

    # M-tiling: TILE_M is a multiple of 8 (sublane rule) and caps VMEM usage.
    M8 = _round_up(max(M, 8), 8)
    tile_m = min(tile_m_cap, M8)
    Mp = _round_up(M8, tile_m)
    if Mp != M:
        x = jnp.pad(x, ((0, Mp - M), (0, 0)))

    out = pl.pallas_call(
        functools.partial(_mm_bias_act_kernel, act=act),
        out_shape=jax.ShapeDtypeStruct((Mp, Np), jnp.float32),
        grid=(Mp // tile_m,),
        in_specs=[
            pl.BlockSpec((tile_m, K), lambda i: (i, 0)),   # patches: tiled over M
            pl.BlockSpec((K, Np), lambda i: (0, 0)),       # weights: resident
            pl.BlockSpec((1, Np), lambda i: (0, 0)),       # bias:    resident
        ],
        out_specs=pl.BlockSpec((tile_m, Np), lambda i: (i, 0)),
        compiler_params=pltpu.CompilerParams(
            dimension_semantics=("parallel",)),
        cost_estimate=pl.CostEstimate(
            flops=2 * Mp * K * Np,
            transcendentals=0,
            bytes_accessed=Mp * K * 2 + K * Np * 2 + Mp * Np * 4),
    )(x, w, b2)
    return out[:M] if Mp != M else out


# -----------------------------------------------------------------------------
# Conv helpers: bf16 im2col (glue) + Pallas matmul (hot path)
# -----------------------------------------------------------------------------
def conv2d_pallas(x, wmat, b2, kh, kw, pad, act, co):
    """Stride-1 cross-correlation. x: [N,H,W,Ci] f32 -> [N,Ho,Wo,co] f32."""
    N, H, W, Ci = x.shape
    K, Np = wmat.shape
    assert K == kh * kw * Ci
    # TODO(synk): move the tap gathering into the Pallas kernel (shifted-window
    # reads of the padded NHWC input accumulated over a tap grid axis) so the
    # kh*kw-times-blown-up patch matrix never round-trips through HBM.
    xp = jnp.pad(x.astype(jnp.bfloat16),
                 ((0, 0), (pad, pad), (pad, pad), (0, 0)))
    Ho = H + 2 * pad - kh + 1
    Wo = W + 2 * pad - kw + 1
    cols = [xp[:, i:i + Ho, j:j + Wo, :] for i in range(kh) for j in range(kw)]
    patches = jnp.concatenate(cols, axis=-1).reshape(N * Ho * Wo, K)
    out = matmul_bias_act(patches, wmat, b2, act=act)
    return out[:, :co].reshape(N, Ho, Wo, co)


def apply_layer(x, p, m):
    y = conv2d_pallas(x, p["w"], p["b"],
                      m["kh"], m["kw"], m["pad"], m["act"], m["co"])
    if m["deconv"]:
        # depth-to-space: fused channel (2r+s)*C + c -> output pixel (2i+r, 2j+s)
        N, H, W, _ = y.shape
        c = m["co_phase"]
        y = (y.reshape(N, H, W, 2, 2, c)
               .transpose(0, 1, 3, 2, 4, 5)
               .reshape(N, 2 * H, 2 * W, c))
    return y


def maxpool2(x):
    N, H, W, C = x.shape
    return jnp.max(x.reshape(N, H // 2, 2, W // 2, 2, C), axis=(2, 4))


# -----------------------------------------------------------------------------
# Parameters. Conv weights ~ N(0, 0.01), bias 0 (matches initialize() for
# nn.Conv2d; ConvTranspose2d weights are also synthesized this way and stored
# directly in the equivalent direct-conv HWIO layout, so no flip is needed).
# Weights are packed to matmul form + padded to lane-dense N + cast to bf16
# ONCE here (not per forward call).
# -----------------------------------------------------------------------------
def _pack_conv(w_hwio, b, pad, act):
    kh, kw, ci, co = w_hwio.shape
    npad = max(128, _round_up(co, 128))           # lane-dense output stores
    wmat = w_hwio.reshape(kh * kw * ci, co)
    wmat = jnp.pad(wmat, ((0, 0), (0, npad - co))).astype(jnp.bfloat16)
    b2 = jnp.pad(b.astype(jnp.float32), (0, npad - co)).reshape(1, npad)
    params = {"w": wmat, "b": b2}
    meta = {"kh": kh, "kw": kw, "pad": pad, "act": act, "co": co,
            "deconv": False}
    return params, meta


def _pack_deconv(w44, b, act):
    """ConvTranspose2d(k=4, s=2, p=1) de-zeroed into one 3x3 conv producing
    the 4 sub-pixel phases (4*Cout channels), consumed via depth-to-space."""
    kh, kw, ci, co = w44.shape
    assert kh == 4 and kw == 4
    wf = jnp.zeros((3, 3, ci, 2, 2, co), jnp.float32)
    for r in range(2):
        for s in range(2):
            for a in range(2):
                for c in range(2):
                    # phase (r,s) output pixel (2i+r, 2j+s) uses
                    # w44[2a+r, 2c+s] * x[i+r+a-1, j+s+c-1]
                    wf = wf.at[r + a, s + c, :, r, s, :].set(w44[2 * a + r, 2 * c + s])
    wf = wf.reshape(3, 3, ci, 4 * co)
    bf = jnp.tile(b.astype(jnp.float32), 4)       # bias per phase-channel
    params, meta = _pack_conv(wf, bf, pad=1, act=act)
    meta.update({"deconv": True, "co_phase": co})
    return params, meta


def init_params(key, i_cn, o_cn, att_cn=0):
    dim = i_cn + att_cn
    ks = jax.random.split(key, 5)
    std = 0.01
    cw = lambda k, kh, kw, ci, co: std * jax.random.normal(k, (kh, kw, ci, co),
                                                           jnp.float32)
    z = lambda n: jnp.zeros((n,), jnp.float32)
    params, meta = {}, {}
    params["conv1"], meta["conv1"] = _pack_conv(cw(ks[0], 5, 5, dim, 64), z(64),
                                                pad=2, act="leaky")
    params["conv2"], meta["conv2"] = _pack_conv(cw(ks[1], 5, 5, 64, 128), z(128),
                                                pad=2, act="leaky")
    params["deconv1"], meta["deconv1"] = _pack_deconv(cw(ks[2], 4, 4, 128, 64),
                                                      z(64), act="leaky")
    params["deconv2"], meta["deconv2"] = _pack_deconv(cw(ks[3], 4, 4, 64, dim),
                                                      z(dim), act="leaky")
    params["reg"], meta["reg"] = _pack_conv(cw(ks[4], 5, 5, dim, o_cn), z(o_cn),
                                            pad=2, act="none")
    return params, meta


# -----------------------------------------------------------------------------
# Forward pass (HOUR_GLASS_PROP.forward)
# -----------------------------------------------------------------------------
def hour_glass_prop_forward(params, fea_nchw, att_nchw=None, *, meta,
                            n_iter=1, att_cn=0, prop=False):
    fea = jnp.transpose(fea_nchw, (0, 2, 3, 1)).astype(jnp.float32)   # NHWC
    att = None
    if att_cn > 0:
        att = jnp.transpose(att_nchw, (0, 2, 3, 1)).astype(jnp.float32)
        fea = jnp.concatenate([fea, att], axis=-1)
    if prop:
        w_mask = jnp.where(att >= 0.001, 1.0, 0.2)

    for _ in range(n_iter):
        x_in = fea * w_mask if prop else fea
        conv1_fea = maxpool2(apply_layer(x_in, params["conv1"], meta["conv1"]))
        conv2_fea = maxpool2(apply_layer(conv1_fea, params["conv2"], meta["conv2"]))
        deconv1_fea = apply_layer(conv2_fea, params["deconv1"], meta["deconv1"]) + conv1_fea
        fea = apply_layer(deconv1_fea, params["deconv2"], meta["deconv2"]) + fea

    refined_smap = apply_layer(fea, params["reg"], meta["reg"])        # [N,H,W,o_cn]
    return jnp.transpose(refined_smap, (0, 3, 1, 2))                   # NCHW


# -----------------------------------------------------------------------------
if __name__ == "__main__":
    key = jax.random.PRNGKey(0)
    k_in, k_par = jax.random.split(key)

    batch, i_cn, o_cn, H, W = 2, 4, 3, 16, 16            # H, W divisible by 4
    fea = jax.random.normal(k_in, (batch, i_cn, H, W), jnp.float32)   # NCHW
    params, meta = init_params(k_par, i_cn=i_cn, o_cn=o_cn)

    fwd = jax.jit(functools.partial(hour_glass_prop_forward, meta=meta, n_iter=1))
    out = jax.block_until_ready(fwd(params, fea))
    assert out.shape == (batch, o_cn, H, W), out.shape
    assert out.dtype == jnp.float32
    print("KERNEL_OK")
</pallas_src>

<mosaic_0001>
module attributes {stable_mosaic.version = 11 : i64} {
  func.func @_mm_bias_act_kernel(%arg0: i32, %arg1: memref<256x100xbf16, #tpu.memory_space<vmem>>, %arg2: memref<100x128xbf16, #tpu.memory_space<vmem>>, %arg3: memref<1x128xf32, #tpu.memory_space<vmem>>, %arg4: memref<256x128xf32, #tpu.memory_space<vmem>>) attributes {dimension_semantics = [#tpu.dimension_semantics<parallel>], iteration_bounds = array<i64: 2>, scalar_prefetch = 0 : i64, scratch_operands = 0 : i64, tpu.core_type = #tpu.core_type<tc>, window_params = [{transform_indices = @transform_0, window_bounds = array<i64: 256, 100>}, {pipeline_mode = #tpu.pipeline_mode<synchronous>, transform_indices = @transform_1, window_bounds = array<i64: 100, 128>}, {pipeline_mode = #tpu.pipeline_mode<synchronous>, transform_indices = @transform_2, window_bounds = array<i64: 1, 128>}, {transform_indices = @transform_3, window_bounds = array<i64: 256, 128>}]} {
    %c0 = arith.constant 0 : index
    %c0_0 = arith.constant 0 : index
    %0 = vector.load %arg1[%c0, %c0_0] : memref<256x100xbf16, #tpu.memory_space<vmem>>, vector<256x100xbf16>
    %c0_1 = arith.constant 0 : index
    %c0_2 = arith.constant 0 : index
    %1 = vector.load %arg2[%c0_1, %c0_2] : memref<100x128xbf16, #tpu.memory_space<vmem>>, vector<100x128xbf16>
    %cst = arith.constant dense<0.000000e+00> : vector<256x128xf32>
    %2 = tpu.matmul %0, %1, %cst {dimension_numbers = #tpu.dot_dimension_numbers<[1], [0], [0], [1], [0, 0, 1, 1], [], []>} : vector<256x100xbf16>, vector<100x128xbf16>, vector<256x128xf32> -> vector<256x128xf32>
    %c0_3 = arith.constant 0 : index
    %c0_4 = arith.constant 0 : index
    %3 = vector.load %arg3[%c0_3, %c0_4] : memref<1x128xf32, #tpu.memory_space<vmem>>, vector<1x128xf32>
    %4 = vector.broadcast %3 : vector<1x128xf32> to vector<256x128xf32>
    %5 = arith.addf %2, %4 : vector<256x128xf32>
    %cst_5 = arith.constant 0.000000e+00 : f32
    %6 = vector.broadcast %cst_5 : f32 to vector<256x128xf32>
    %7 = arith.cmpf oge, %5, %6 : vector<256x128xf32>
    %cst_6 = arith.constant 1.000000e-01 : f32
    %8 = vector.broadcast %cst_6 : f32 to vector<256x128xf32>
    %9 = arith.mulf %8, %5 : vector<256x128xf32>
    %10 = arith.select %7, %5, %9 : vector<256x128xi1>, vector<256x128xf32>
    %c0_7 = arith.constant 0 : index
    %c0_8 = arith.constant 0 : index
    %11 = vector.load %arg4[%c0_7, %c0_8] : memref<256x128xf32, #tpu.memory_space<vmem>>, vector<256x128xf32>
    tpu.vector_store %arg4[%c0_7, %c0_8], %10 {strides = array<i32>} : memref<256x128xf32, #tpu.memory_space<vmem>>, vector<256x128xf32>,
    return
  }
  func.func @transform_0(%arg0: i32) -> (i32, i32) {
    %c0_i32 = arith.constant 0 : i32
    %c0_i32_0 = arith.constant 0 : i32
    return %arg0, %c0_i32 : i32, i32
  }
  func.func @transform_1(%arg0: i32) -> (i32, i32) {
    %c0_i32 = arith.constant 0 : i32
    %c0_i32_0 = arith.constant 0 : i32
    %c0_i32_1 = arith.constant 0 : i32
    return %c0_i32, %c0_i32_0 : i32, i32
  }
  func.func @transform_2(%arg0: i32) -> (i32, i32) {
    %c0_i32 = arith.constant 0 : i32
    %c0_i32_0 = arith.constant 0 : i32
    %c0_i32_1 = arith.constant 0 : i32
    return %c0_i32, %c0_i32_0 : i32, i32
  }
  func.func @transform_3(%arg0: i32) -> (i32, i32) {
    %c0_i32 = arith.constant 0 : i32
    %c0_i32_0 = arith.constant 0 : i32
    return %arg0, %c0_i32 : i32, i32
  }
}

module attributes {stable_mosaic.version = 11 : i64} {
  func.func @_mm_bias_act_kernel(%arg0: i32, %arg1: memref<128x1600xbf16, #tpu.memory_space<vmem>>, %arg2: memref<1600x128xbf16, #tpu.memory_space<vmem>>, %arg3: memref<1x128xf32, #tpu.memory_space<vmem>>, %arg4: memref<128x128xf32, #tpu.memory_space<vmem>>) attributes {dimension_semantics = [#tpu.dimension_semantics<parallel>], iteration_bounds = array<i64: 1>, scalar_prefetch = 0 : i64, scratch_operands = 0 : i64, tpu.core_type = #tpu.core_type<tc>, window_params = [{transform_indices = @transform_0, window_bounds = array<i64: 128, 1600>}, {pipeline_mode = #tpu.pipeline_mode<synchronous>, transform_indices = @transform_1, window_bounds = array<i64: 1600, 128>}, {pipeline_mode = #tpu.pipeline_mode<synchronous>, transform_indices = @transform_2, window_bounds = array<i64: 1, 128>}, {transform_indices = @transform_3, window_bounds = array<i64: 128, 128>}]} {
    %c0 = arith.constant 0 : index
    %c0_0 = arith.constant 0 : index
    %0 = vector.load %arg1[%c0, %c0_0] : memref<128x1600xbf16, #tpu.memory_space<vmem>>, vector<128x1600xbf16>
    %c0_1 = arith.constant 0 : index
    %c0_2 = arith.constant 0 : index
    %1 = vector.load %arg2[%c0_1, %c0_2] : memref<1600x128xbf16, #tpu.memory_space<vmem>>, vector<1600x128xbf16>
    %cst = arith.constant dense<0.000000e+00> : vector<128x128xf32>
    %2 = tpu.matmul %0, %1, %cst {dimension_numbers = #tpu.dot_dimension_numbers<[1], [0], [0], [1], [0, 0, 1, 1], [], []>} : vector<128x1600xbf16>, vector<1600x128xbf16>, vector<128x128xf32> -> vector<128x128xf32>
    %c0_3 = arith.constant 0 : index
    %c0_4 = arith.constant 0 : index
    %3 = vector.load %arg3[%c0_3, %c0_4] : memref<1x128xf32, #tpu.memory_space<vmem>>, vector<1x128xf32>
    %4 = vector.broadcast %3 : vector<1x128xf32> to vector<128x128xf32>
    %5 = arith.addf %2, %4 : vector<128x128xf32>
    %cst_5 = arith.constant 0.000000e+00 : f32
    %6 = vector.broadcast %cst_5 : f32 to vector<128x128xf32>
    %7 = arith.cmpf oge, %5, %6 : vector<128x128xf32>
    %cst_6 = arith.constant 1.000000e-01 : f32
    %8 = vector.broadcast %cst_6 : f32 to vector<128x128xf32>
    %9 = arith.mulf %8, %5 : vector<128x128xf32>
    %10 = arith.select %7, %5, %9 : vector<128x128xi1>, vector<128x128xf32>
    %c0_7 = arith.constant 0 : index
    %c0_8 = arith.constant 0 : index
    %11 = vector.load %arg4[%c0_7, %c0_8] : memref<128x128xf32, #tpu.memory_space<vmem>>, vector<128x128xf32>
    tpu.vector_store %arg4[%c0_7, %c0_8], %10 {strides = array<i32>} : memref<128x128xf32, #tpu.memory_space<vmem>>, vector<128x128xf32>,
    return
  }
  func.func @transform_0(%arg0: i32) -> (i32, i32) {
    %c0_i32 = arith.constant 0 : i32
    %c0_i32_0 = arith.constant 0 : i32
    return %arg0, %c0_i32 : i32, i32
  }
  func.func @transform_1(%arg0: i32) -> (i32, i32) {
    %c0_i32 = arith.constant 0 : i32
    %c0_i32_0 = arith.constant 0 : i32
    %c0_i32_1 = arith.constant 0 : i32
    return %c0_i32, %c0_i32_0 : i32, i32
  }
  func.func @transform_2(%arg0: i32) -> (i32, i32) {
    %c0_i32 = arith.constant 0 : i32
    %c0_i32_0 = arith.constant 0 : i32
    %c0_i32_1 = arith.constant 0 : i32
    return %c0_i32, %c0_i32_0 : i32, i32
  }
  func.func @transform_3(%arg0: i32) -> (i32, i32) {
    %c0_i32 = arith.constant 0 : i32
    %c0_i32_0 = arith.constant 0 : i32
    return %arg0, %c0_i32 : i32, i32
  }
}

module attributes {stable_mosaic.version = 11 : i64} {
  func.func @_mm_bias_act_kernel(%arg0: i32, %arg1: memref<32x1152xbf16, #tpu.memory_space<vmem>>, %arg2: memref<1152x256xbf16, #tpu.memory_space<vmem>>, %arg3: memref<1x256xf32, #tpu.memory_space<vmem>>, %arg4: memref<32x256xf32, #tpu.memory_space<vmem>>) attributes {dimension_semantics = [#tpu.dimension_semantics<parallel>], iteration_bounds = array<i64: 1>, scalar_prefetch = 0 : i64, scratch_operands = 0 : i64, tpu.core_type = #tpu.core_type<tc>, window_params = [{transform_indices = @transform_0, window_bounds = array<i64: 32, 1152>}, {pipeline_mode = #tpu.pipeline_mode<synchronous>, transform_indices = @transform_1, window_bounds = array<i64: 1152, 256>}, {pipeline_mode = #tpu.pipeline_mode<synchronous>, transform_indices = @transform_2, window_bounds = array<i64: 1, 256>}, {transform_indices = @transform_3, window_bounds = array<i64: 32, 256>}]} {
    %c0 = arith.constant 0 : index
    %c0_0 = arith.constant 0 : index
    %0 = vector.load %arg1[%c0, %c0_0] : memref<32x1152xbf16, #tpu.memory_space<vmem>>, vector<32x1152xbf16>
    %c0_1 = arith.constant 0 : index
    %c0_2 = arith.constant 0 : index
    %1 = vector.load %arg2[%c0_1, %c0_2] : memref<1152x256xbf16, #tpu.memory_space<vmem>>, vector<1152x256xbf16>
    %cst = arith.constant dense<0.000000e+00> : vector<32x256xf32>
    %2 = tpu.matmul %0, %1, %cst {dimension_numbers = #tpu.dot_dimension_numbers<[1], [0], [0], [1], [0, 0, 1, 1], [], []>} : vector<32x1152xbf16>, vector<1152x256xbf16>, vector<32x256xf32> -> vector<32x256xf32>
    %c0_3 = arith.constant 0 : index
    %c0_4 = arith.constant 0 : index
    %3 = vector.load %arg3[%c0_3, %c0_4] : memref<1x256xf32, #tpu.memory_space<vmem>>, vector<1x256xf32>
    %4 = vector.broadcast %3 : vector<1x256xf32> to vector<32x256xf32>
    %5 = arith.addf %2, %4 : vector<32x256xf32>
    %cst_5 = arith.constant 0.000000e+00 : f32
    %6 = vector.broadcast %cst_5 : f32 to vector<32x256xf32>
    %7 = arith.cmpf oge, %5, %6 : vector<32x256xf32>
    %cst_6 = arith.constant 1.000000e-01 : f32
    %8 = vector.broadcast %cst_6 : f32 to vector<32x256xf32>
    %9 = arith.mulf %8, %5 : vector<32x256xf32>
    %10 = arith.select %7, %5, %9 : vector<32x256xi1>, vector<32x256xf32>
    %c0_7 = arith.constant 0 : index
    %c0_8 = arith.constant 0 : index
    %11 = vector.load %arg4[%c0_7, %c0_8] : memref<32x256xf32, #tpu.memory_space<vmem>>, vector<32x256xf32>
    tpu.vector_store %arg4[%c0_7, %c0_8], %10 {strides = array<i32>} : memref<32x256xf32, #tpu.memory_space<vmem>>, vector<32x256xf32>,
    return
  }
  func.func @transform_0(%arg0: i32) -> (i32, i32) {
    %c0_i32 = arith.constant 0 : i32
    %c0_i32_0 = arith.constant 0 : i32
    return %arg0, %c0_i32 : i32, i32
  }
  func.func @transform_1(%arg0: i32) -> (i32, i32) {
    %c0_i32 = arith.constant 0 : i32
    %c0_i32_0 = arith.constant 0 : i32
    %c0_i32_1 = arith.constant 0 : i32
    return %c0_i32, %c0_i32_0 : i32, i32
  }
  func.func @transform_2(%arg0: i32) -> (i32, i32) {
    %c0_i32 = arith.constant 0 : i32
    %c0_i32_0 = arith.constant 0 : i32
    %c0_i32_1 = arith.constant 0 : i32
    return %c0_i32, %c0_i32_0 : i32, i32
  }
  func.func @transform_3(%arg0: i32) -> (i32, i32) {
    %c0_i32 = arith.constant 0 : i32
    %c0_i32_0 = arith.constant 0 : i32
    return %arg0, %c0_i32 : i32, i32
  }
}

module attributes {stable_mosaic.version = 11 : i64} {
  func.func @_mm_bias_act_kernel(%arg0: i32, %arg1: memref<128x576xbf16, #tpu.memory_space<vmem>>, %arg2: memref<576x128xbf16, #tpu.memory_space<vmem>>, %arg3: memref<1x128xf32, #tpu.memory_space<vmem>>, %arg4: memref<128x128xf32, #tpu.memory_space<vmem>>) attributes {dimension_semantics = [#tpu.dimension_semantics<parallel>], iteration_bounds = array<i64: 1>, scalar_prefetch = 0 : i64, scratch_operands = 0 : i64, tpu.core_type = #tpu.core_type<tc>, window_params = [{transform_indices = @transform_0, window_bounds = array<i64: 128, 576>}, {pipeline_mode = #tpu.pipeline_mode<synchronous>, transform_indices = @transform_1, window_bounds = array<i64: 576, 128>}, {pipeline_mode = #tpu.pipeline_mode<synchronous>, transform_indices = @transform_2, window_bounds = array<i64: 1, 128>}, {transform_indices = @transform_3, window_bounds = array<i64: 128, 128>}]} {
    %c0 = arith.constant 0 : index
    %c0_0 = arith.constant 0 : index
    %0 = vector.load %arg1[%c0, %c0_0] : memref<128x576xbf16, #tpu.memory_space<vmem>>, vector<128x576xbf16>
    %c0_1 = arith.constant 0 : index
    %c0_2 = arith.constant 0 : index
    %1 = vector.load %arg2[%c0_1, %c0_2] : memref<576x128xbf16, #tpu.memory_space<vmem>>, vector<576x128xbf16>
    %cst = arith.constant dense<0.000000e+00> : vector<128x128xf32>
    %2 = tpu.matmul %0, %1, %cst {dimension_numbers = #tpu.dot_dimension_numbers<[1], [0], [0], [1], [0, 0, 1, 1], [], []>} : vector<128x576xbf16>, vector<576x128xbf16>, vector<128x128xf32> -> vector<128x128xf32>
    %c0_3 = arith.constant 0 : index
    %c0_4 = arith.constant 0 : index
    %3 = vector.load %arg3[%c0_3, %c0_4] : memref<1x128xf32, #tpu.memory_space<vmem>>, vector<1x128xf32>
    %4 = vector.broadcast %3 : vector<1x128xf32> to vector<128x128xf32>
    %5 = arith.addf %2, %4 : vector<128x128xf32>
    %cst_5 = arith.constant 0.000000e+00 : f32
    %6 = vector.broadcast %cst_5 : f32 to vector<128x128xf32>
    %7 = arith.cmpf oge, %5, %6 : vector<128x128xf32>
    %cst_6 = arith.constant 1.000000e-01 : f32
    %8 = vector.broadcast %cst_6 : f32 to vector<128x128xf32>
    %9 = arith.mulf %8, %5 : vector<128x128xf32>
    %10 = arith.select %7, %5, %9 : vector<128x128xi1>, vector<128x128xf32>
    %c0_7 = arith.constant 0 : index
    %c0_8 = arith.constant 0 : index
    %11 = vector.load %arg4[%c0_7, %c0_8] : memref<128x128xf32, #tpu.memory_space<vmem>>, vector<128x128xf32>
    tpu.vector_store %arg4[%c0_7, %c0_8], %10 {strides = array<i32>} : memref<128x128xf32, #tpu.memory_space<vmem>>, vector<128x128xf32>,
    return
  }
  func.func @transform_0(%arg0: i32) -> (i32, i32) {
    %c0_i32 = arith.constant 0 : i32
    %c0_i32_0 = arith.constant 0 : i32
    return %arg0, %c0_i32 : i32, i32
  }
  func.func @transform_1(%arg0: i32) -> (i32, i32) {
    %c0_i32 = arith.constant 0 : i32
    %c0_i32_0 = arith.constant 0 : i32
    %c0_i32_1 = arith.constant 0 : i32
    return %c0_i32, %c0_i32_0 : i32, i32
  }
  func.func @transform_2(%arg0: i32) -> (i32, i32) {
    %c0_i32 = arith.constant 0 : i32
    %c0_i32_0 = arith.constant 0 : i32
    %c0_i32_1 = arith.constant 0 : i32
    return %c0_i32, %c0_i32_0 : i32, i32
  }
  func.func @transform_3(%arg0: i32) -> (i32, i32) {
    %c0_i32 = arith.constant 0 : i32
    %c0_i32_0 = arith.constant 0 : i32
    return %arg0, %c0_i32 : i32, i32
  }
}

module attributes {stable_mosaic.version = 11 : i64} {
  func.func @_mm_bias_act_kernel(%arg0: i32, %arg1: memref<256x100xbf16, #tpu.memory_space<vmem>>, %arg2: memref<100x128xbf16, #tpu.memory_space<vmem>>, %arg3: memref<1x128xf32, #tpu.memory_space<vmem>>, %arg4: memref<256x128xf32, #tpu.memory_space<vmem>>) attributes {dimension_semantics = [#tpu.dimension_semantics<parallel>], iteration_bounds = array<i64: 2>, scalar_prefetch = 0 : i64, scratch_operands = 0 : i64, tpu.core_type = #tpu.core_type<tc>, window_params = [{transform_indices = @transform_0, window_bounds = array<i64: 256, 100>}, {pipeline_mode = #tpu.pipeline_mode<synchronous>, transform_indices = @transform_1, window_bounds = array<i64: 100, 128>}, {pipeline_mode = #tpu.pipeline_mode<synchronous>, transform_indices = @transform_2, window_bounds = array<i64: 1, 128>}, {transform_indices = @transform_3, window_bounds = array<i64: 256, 128>}]} {
    %c0 = arith.constant 0 : index
    %c0_0 = arith.constant 0 : index
    %0 = vector.load %arg1[%c0, %c0_0] : memref<256x100xbf16, #tpu.memory_space<vmem>>, vector<256x100xbf16>
    %c0_1 = arith.constant 0 : index
    %c0_2 = arith.constant 0 : index
    %1 = vector.load %arg2[%c0_1, %c0_2] : memref<100x128xbf16, #tpu.memory_space<vmem>>, vector<100x128xbf16>
    %cst = arith.constant dense<0.000000e+00> : vector<256x128xf32>
    %2 = tpu.matmul %0, %1, %cst {dimension_numbers = #tpu.dot_dimension_numbers<[1], [0], [0], [1], [0, 0, 1, 1], [], []>} : vector<256x100xbf16>, vector<100x128xbf16>, vector<256x128xf32> -> vector<256x128xf32>
    %c0_3 = arith.constant 0 : index
    %c0_4 = arith.constant 0 : index
    %3 = vector.load %arg3[%c0_3, %c0_4] : memref<1x128xf32, #tpu.memory_space<vmem>>, vector<1x128xf32>
    %4 = vector.broadcast %3 : vector<1x128xf32> to vector<256x128xf32>
    %5 = arith.addf %2, %4 : vector<256x128xf32>
    %c0_5 = arith.constant 0 : index
    %c0_6 = arith.constant 0 : index
    %6 = vector.load %arg4[%c0_5, %c0_6] : memref<256x128xf32, #tpu.memory_space<vmem>>, vector<256x128xf32>
    tpu.vector_store %arg4[%c0_5, %c0_6], %5 {strides = array<i32>} : memref<256x128xf32, #tpu.memory_space<vmem>>, vector<256x128xf32>,
    return
  }
  func.func @transform_0(%arg0: i32) -> (i32, i32) {
    %c0_i32 = arith.constant 0 : i32
    %c0_i32_0 = arith.constant 0 : i32
    return %arg0, %c0_i32 : i32, i32
  }
  func.func @transform_1(%arg0: i32) -> (i32, i32) {
    %c0_i32 = arith.constant 0 : i32
    %c0_i32_0 = arith.constant 0 : i32
    %c0_i32_1 = arith.constant 0 : i32
    return %c0_i32, %c0_i32_0 : i32, i32
  }
  func.func @transform_2(%arg0: i32) -> (i32, i32) {
    %c0_i32 = arith.constant 0 : i32
    %c0_i32_0 = arith.constant 0 : i32
    %c0_i32_1 = arith.constant 0 : i32
    return %c0_i32, %c0_i32_0 : i32, i32
  }
  func.func @transform_3(%arg0: i32) -> (i32, i32) {
    %c0_i32 = arith.constant 0 : i32
    %c0_i32_0 = arith.constant 0 : i32
    return %arg0, %c0_i32 : i32, i32
  }
}

</mosaic_0001>

<bundles_post_ra>
// kernel: hour_glass_prop_forward.5
= control target key start
LH: loop header
LB: loop body
LE: loop exit
PB: predicated region body
PF: predicated region fallthrough
CT: control target
= control target key end

     0   :  { %s864_s12 = smov 0   ;;  %s1011_s0 = inlined_call_operand.vmem [shape: bf16[512,100], index: 0, kind: input, shape index: {}]   ;;  %s1012_s1 = inlined_call_operand.vmem [shape: bf16[100,128], index: 1, kind: input, shape index: {}]   ;;  %s1013_s2 = inlined_call_operand.vmem [shape: f32[1,128], index: 2, kind: input, shape index: {}]   ;;  %s1014_s3 = inlined_call_operand.vmem [shape: f32[512,128], index: 3, kind: output, shape index: {}]  }
   0x1 LB: > { %s669_s13 = sadd.s32 4294967295, %s842_s12   ;;  %p673_p0 = scmp.ge.s32.totalorder %s842_s12, 1  ;;  %s842_s12 = sphi %s864_s12, %s13_s12  }
   0x2   : > { %p138_p1 = scmp.lt.s32.totalorder %s842_s12, 3 }
   0x4   : > { %p139_p2 = pnand %p673_p0, %p138_p1 }
   0x5   : > { %s674_s20 = sshll.u32 (!%p139_p2), %s669_s13, 5 }
   0x6   : > { %142 = sbr.rel (%p139_p2) target bundleno = 240 (0xf0), region = 32  ;;  %p163_p3 = scmp.lt.s32.totalorder (!%p139_p2), %s674_s20, 63 }
   0xb   : > { %v219_v0 = vld [vmem:[%s1012_s1 + $0x30] sm:$0x3]  ;;  %vm392_vm0 = vcmask 1041408   ;;  %v805_v4 = vld [vmem:[%s1012_s1 + $0x28] sm:$0xff]  ;;  %v804_v5 = vld [vmem:[%s1012_s1 + $0x20] sm:$0xff]  ;;  %s1016_s20 = smov (!%p163_p3, %s674_s20), 63 }
   0xc   : > { %v329_v1 = vunpack.c.l.b16 %v219_v0  ;;  %v803_v6 = vld [vmem:[%s1012_s1 + $0x18] sm:$0xff]  ;;  %v802_v7 = vld [vmem:[%s1012_s1 + $0x10] sm:$0xff]  ;;  %v801_v8 = vld [vmem:[%s1012_s1 + $0x8] sm:$0xff]  ;;  %s675_s27 = sshll.u32 %s1016_s20, 2  ;;  %vm343_vm1 = vcmask 818176   ;;  %s677_s8 = sshll.u32 %s1016_s20, 3 }
   0xd   : > { %v800_v9 = vld [vmem:[%s1012_s1] sm:$0xff]  ;;  %s899_s5 = scalar_lea.vmem %s1011_s0, %s675_s27  ;;  %s944_s11 = scalar_lea.vmem %s1014_s3, %s677_s8 }
   0xe   : > { %v336_v2 = vpack.c.b16 %v329_v1, %v329_v1  ;;  %v784_v10 = vld [vmem:[%s899_s5] sm:$0xff]  ;;  %v785_v14 = vld [vmem:[%s899_s5 + $0x8] sm:$0xff]  ;;  %v786_v18 = vld [vmem:[%s899_s5 + $0x10] sm:$0xff] }
   0xf   : > { %v788_v11 = vld [vmem:[%s899_s5 + $0x20] sm:$0xff]  ;;  %v789_v15 = vld [vmem:[%s899_s5 + $0x28] sm:$0xff]  ;;  %v790_v19 = vld [vmem:[%s899_s5 + $0x30] sm:$0xff] }
  0x10   : > { %v394_v3 = vsel %vm392_vm0, %v336_v2, 0  ;;  %v792_v12 = vld [vmem:[%s899_s5 + $0x40] sm:$0xff]  ;;  %v793_v16 = vld [vmem:[%s899_s5 + $0x48] sm:$0xff]  ;;  %v794_v20 = vld [vmem:[%s899_s5 + $0x50] sm:$0xff] }
  0x11   : > { %397 = vmatpush.bf16.msra.mxu0 %v394_v3  ;;  %806 = vmatpush.bf16.msra.mxu1 %v394_v3  ;;  %v796_v13 = vld [vmem:[%s899_s5 + $0x60] sm:$0xff]  ;;  %v797_v17 = vld [vmem:[%s899_s5 + $0x68] sm:$0xff]  ;;  %v798_v21 = vld [vmem:[%s899_s5 + $0x70] sm:$0xff] }
  0x12   : > { %807 = vmatpush.bf16.msra.mxu2 %v394_v3  ;;  %808 = vmatpush.bf16.msra.mxu3 %v394_v3  ;;  %v787_v22 = vld [vmem:[%s899_s5 + $0x18] sm:$0xff]  ;;  %v936_v26 = vld [vmem:[%s1013_s2] ss:$0 sm:$0xff] }
  0x13   : > { %v791_v23 = vld [vmem:[%s899_s5 + $0x38] sm:$0xff] }
  0x14   : > { %v795_v24 = vld [vmem:[%s899_s5 + $0x58] sm:$0xff] }
  0x15   : > { %398 = vmatpush.bf16.msra.mxu0 %v805_v4  ;;  %809 = vmatpush.bf16.msra.mxu1 %v805_v4  ;;  %v799_v25 = vld [vmem:[%s899_s5 + $0x78] sm:$0xff] }
  0x16   : > { %810 = vmatpush.bf16.msra.mxu2 %v805_v4  ;;  %811 = vmatpush.bf16.msra.mxu3 %v805_v4 }
  0x19   : > { %399 = vmatpush.bf16.msra.mxu0 %v804_v5  ;;  %812 = vmatpush.bf16.msra.mxu1 %v804_v5 }
  0x1a   : > { %813 = vmatpush.bf16.msra.mxu2 %v804_v5  ;;  %814 = vmatpush.bf16.msra.mxu3 %v804_v5 }
  0x1d   : > { %400 = vmatpush.bf16.msra.mxu0 %v803_v6  ;;  %815 = vmatpush.bf16.msra.mxu1 %v803_v6 }
  0x1e   : > { %816 = vmatpush.bf16.msra.mxu2 %v803_v6  ;;  %817 = vmatpush.bf16.msra.mxu3 %v803_v6 }
  0x21   : > { %401 = vmatpush.bf16.msra.mxu0 %v802_v7  ;;  %818 = vmatpush.bf16.msra.mxu1 %v802_v7 }
  0x22   : > { %819 = vmatpush.bf16.msra.mxu2 %v802_v7  ;;  %820 = vmatpush.bf16.msra.mxu3 %v802_v7 }
  0x25   : > { %402 = vmatpush.bf16.msra.mxu0 %v801_v8  ;;  %821 = vmatpush.bf16.msra.mxu1 %v801_v8 }
  0x26   : > { %822 = vmatpush.bf16.msra.mxu2 %v801_v8  ;;  %823 = vmatpush.bf16.msra.mxu3 %v801_v8 }
  0x29   : > { %403 = vmatpush.bf16.msra.mxu0 %v800_v9  ;;  %824 = vmatpush.bf16.msra.mxu1 %v800_v9 }
  0x2a   : > { %825 = vmatpush.bf16.msra.mxu2 %v800_v9  ;;  %826 = vmatpush.bf16.msra.mxu3 %v800_v9 }
  0x2c   : > { %766 = vmatmul.msk.bf16.vlgmr.msra.gmra.mxu0 %vm343_vm1, %v784_v10  ;;  %770 = vmatmul.msk.bf16.vlgmr.msra.gmra.mxu1 %vm343_vm1, %v788_v11 }
  0x2d   : > { %774 = vmatmul.msk.bf16.vlgmr.msra.gmra.mxu2 %vm343_vm1, %v792_v12  ;;  %778 = vmatmul.msk.bf16.vlgmr.msra.gmra.mxu3 %vm343_vm1, %v796_v13 }
  0x3c   : > { %767 = vmatmul.msk.bf16.gmra.mxu0 %vm343_vm1, %v785_v14  ;;  %771 = vmatmul.msk.bf16.gmra.mxu1 %vm343_vm1, %v789_v15 }
  0x3d   : > { %775 = vmatmul.msk.bf16.gmra.mxu2 %vm343_vm1, %v793_v16  ;;  %779 = vmatmul.msk.bf16.gmra.mxu3 %vm343_vm1, %v797_v17 }
  0x4c   : > { %768 = vmatmul.msk.bf16.gmra.mxu0 %vm343_vm1, %v786_v18  ;;  %772 = vmatmul.msk.bf16.gmra.mxu1 %vm343_vm1, %v790_v19 }
  0x4d   : > { %776 = vmatmul.msk.bf16.gmra.mxu2 %vm343_vm1, %v794_v20  ;;  %780 = vmatmul.msk.bf16.gmra.mxu3 %vm343_vm1, %v798_v21 }
  0x5c   : > { %769 = vmatmul.msk.bf16.gmra.mxu0 %vm343_vm1, %v787_v22  ;;  %773 = vmatmul.msk.bf16.gmra.mxu1 %vm343_vm1, %v791_v23 }
  0x5d   : > { %777 = vmatmul.msk.bf16.gmra.mxu2 %vm343_vm1, %v795_v24  ;;  %781 = vmatmul.msk.bf16.gmra.mxu3 %vm343_vm1, %v799_v25 }
  0xa9   : > { %v405_v27 = vpop.f32.mrf.mxu0  ;;  %v425_v28 = vpop.f32.mrf.mxu1 }
  0xaa   : > { %v406_v29 = vadd.f32 %v936_v26, %v405_v27  ;;  %v426_v30 = vadd.f32 %v936_v26, %v425_v28 }
  0xac   : > { %vm485_vm2 = vcmp.ge.f32.partialorder %v406_v29, 0.0  ;;  %v517_v31 = vmul.f32 0.1, %v406_v29  ;;  %vm493_vm3 = vcmp.ge.f32.partialorder %v426_v30, 0.0  ;;  %v525_v32 = vmul.f32 0.1, %v426_v30 }
  0xae   : > { %v549_v33 = vsel %vm485_vm2, %v406_v29, %v517_v31  ;;  %v557_v34 = vsel %vm493_vm3, %v426_v30, %v525_v32 }
  0xaf   : > { %581 = vst [vmem:[%s944_s11] sm:$0xff] %v549_v33 }
  0xb0   : > { %589 = vst [vmem:[%s944_s11 + $0x40] sm:$0xff] %v557_v34  ;;  %v445_v35 = vpop.f32.mrf.mxu2  ;;  %v465_v36 = vpop.f32.mrf.mxu3 }
  0xb1   : > { %v446_v37 = vadd.f32 %v936_v26, %v445_v35  ;;  %v466_v38 = vadd.f32 %v936_v26, %v465_v36  ;;  %v407_v39 = vpop.f32.mrf.mxu0  ;;  %v427_v40 = vpop.f32.mrf.mxu1 }
  0xb2   : > { %v408_v41 = vadd.f32 %v936_v26, %v407_v39  ;;  %v428_v42 = vadd.f32 %v936_v26, %v427_v40 }
  0xb3   : > { %vm501_vm4 = vcmp.ge.f32.partialorder %v446_v37, 0.0  ;;  %v533_v43 = vmul.f32 0.1, %v446_v37  ;;  %vm509_vm5 = vcmp.ge.f32.partialorder %v466_v38, 0.0  ;;  %v541_v44 = vmul.f32 0.1, %v466_v38 }
  0xb4   : > { %vm486_vm6 = vcmp.ge.f32.partialorder %v408_v41, 0.0  ;;  %v518_v45 = vmul.f32 0.1, %v408_v41  ;;  %vm494_vm7 = vcmp.ge.f32.partialorder %v428_v42, 0.0  ;;  %v526_v46 = vmul.f32 0.1, %v428_v42 }
  0xb5   : > { %v565_v47 = vsel %vm501_vm4, %v446_v37, %v533_v43  ;;  %v573_v48 = vsel %vm509_vm5, %v466_v38, %v541_v44 }
  0xb6   : > { %597 = vst [vmem:[%s944_s11 + $0x80] sm:$0xff] %v565_v47  ;;  %v550_v49 = vsel %vm486_vm6, %v408_v41, %v518_v45  ;;  %v558_v50 = vsel %vm494_vm7, %v428_v42, %v526_v46 }
  0xb7   : > { %605 = vst [vmem:[%s944_s11 + $0xc0] sm:$0xff] %v573_v48 }
  0xb8   : > { %582 = vst [vmem:[%s944_s11 + $0x8] sm:$0xff] %v550_v49  ;;  %v447_v51 = vpop.f32.mrf.mxu2  ;;  %v467_v52 = vpop.f32.mrf.mxu3 }
  0xb9   : > { %590 = vst [vmem:[%s944_s11 + $0x48] sm:$0xff] %v558_v50  ;;  %v448_v53 = vadd.f32 %v936_v26, %v447_v51  ;;  %v468_v54 = vadd.f32 %v936_v26, %v467_v52  ;;  %v410_v55 = vpop.f32.mrf.mxu0  ;;  %v430_v56 = vpop.f32.mrf.mxu1 }
  0xba   : > { %v411_v57 = vadd.f32 %v936_v26, %v410_v55  ;;  %v431_v58 = vadd.f32 %v936_v26, %v430_v56 }
  0xbb   : > { %vm502_vm8 = vcmp.ge.f32.partialorder %v448_v53, 0.0  ;;  %v534_v59 = vmul.f32 0.1, %v448_v53  ;;  %vm510_vm9 = vcmp.ge.f32.partialorder %v468_v54, 0.0  ;;  %v542_v60 = vmul.f32 0.1, %v468_v54 }
  0xbc   : > { %vm487_vm10 = vcmp.ge.f32.partialorder %v411_v57, 0.0  ;;  %v519_v61 = vmul.f32 0.1, %v411_v57  ;;  %vm495_vm11 = vcmp.ge.f32.partialorder %v431_v58, 0.0  ;;  %v527_v62 = vmul.f32 0.1, %v431_v58 }
  0xbd   : > { %v566_v63 = vsel %vm502_vm8, %v448_v53, %v534_v59  ;;  %v574_v0 = vsel %vm510_vm9, %v468_v54, %v542_v60 }
  0xbe   : > { %598 = vst [vmem:[%s944_s11 + $0x88] sm:$0xff] %v566_v63  ;;  %v551_v1 = vsel %vm487_vm10, %v411_v57, %v519_v61  ;;  %v559_v2 = vsel %vm495_vm11, %v431_v58, %v527_v62 }
  0xbf   : > { %606 = vst [vmem:[%s944_s11 + $0xc8] sm:$0xff] %v574_v0 }
  0xc0   : > { %583 = vst [vmem:[%s944_s11 + $0x10] sm:$0xff] %v551_v1  ;;  %v450_v3 = vpop.f32.mrf.mxu2  ;;  %v470_v4 = vpop.f32.mrf.mxu3 }
  0xc1   : > { %591 = vst [vmem:[%s944_s11 + $0x50] sm:$0xff] %v559_v2  ;;  %v451_v5 = vadd.f32 %v936_v26, %v450_v3  ;;  %v471_v6 = vadd.f32 %v936_v26, %v470_v4  ;;  %v412_v7 = vpop.f32.mrf.mxu0  ;;  %v432_v8 = vpop.f32.mrf.mxu1 }
  0xc2   : > { %v413_v9 = vadd.f32 %v936_v26, %v412_v7  ;;  %v433_v10 = vadd.f32 %v936_v26, %v432_v8 }
  0xc3   : > { %vm503_vm12 = vcmp.ge.f32.partialorder %v451_v5, 0.0  ;;  %v535_v11 = vmul.f32 0.1, %v451_v5  ;;  %vm511_vm13 = vcmp.ge.f32.partialorder %v471_v6, 0.0  ;;  %v543_v12 = vmul.f32 0.1, %v471_v6 }
  0xc4   : > { %vm488_vm14 = vcmp.ge.f32.partialorder %v413_v9, 0.0  ;;  %v520_v13 = vmul.f32 0.1, %v413_v9  ;;  %vm496_vm15 = vcmp.ge.f32.partialorder %v433_v10, 0.0  ;;  %v528_v14 = vmul.f32 0.1, %v433_v10 }
  0xc5   : > { %v567_v15 = vsel %vm503_vm12, %v451_v5, %v535_v11  ;;  %v575_v16 = vsel %vm511_vm13, %v471_v6, %v543_v12 }
  0xc6   : > { %599 = vst [vmem:[%s944_s11 + $0x90] sm:$0xff] %v567_v15  ;;  %v552_v17 = vsel %vm488_vm14, %v413_v9, %v520_v13  ;;  %v560_v18 = vsel %vm496_vm15, %v433_v10, %v528_v14 }
  0xc7   : > { %607 = vst [vmem:[%s944_s11 + $0xd0] sm:$0xff] %v575_v16 }
  0xc8   : > { %584 = vst [vmem:[%s944_s11 + $0x18] sm:$0xff] %v552_v17  ;;  %v452_v19 = vpop.f32.mrf.mxu2  ;;  %v472_v20 = vpop.f32.mrf.mxu3 }
  0xc9   : > { %592 = vst [vmem:[%s944_s11 + $0x58] sm:$0xff] %v560_v18  ;;  %v453_v21 = vadd.f32 %v936_v26, %v452_v19  ;;  %v473_v22 = vadd.f32 %v936_v26, %v472_v20  ;;  %v415_v23 = vpop.f32.mrf.mxu0  ;;  %v435_v24 = vpop.f32.mrf.mxu1 }
  0xca   : > { %v416_v25 = vadd.f32 %v936_v26, %v415_v23  ;;  %v436_v27 = vadd.f32 %v936_v26, %v435_v24 }
  0xcb   : > { %vm504_vm0 = vcmp.ge.f32.partialorder %v453_v21, 0.0  ;;  %v536_v28 = vmul.f32 0.1, %v453_v21  ;;  %vm512_vm1 = vcmp.ge.f32.partialorder %v473_v22, 0.0  ;;  %v544_v29 = vmul.f32 0.1, %v473_v22 }
  0xcc   : > { %vm489_vm2 = vcmp.ge.f32.partialorder %v416_v25, 0.0  ;;  %v521_v30 = vmul.f32 0.1, %v416_v25  ;;  %vm497_vm3 = vcmp.ge.f32.partialorder %v436_v27, 0.0  ;;  %v529_v31 = vmul.f32 0.1, %v436_v27 }
  0xcd   : > { %v568_v32 = vsel %vm504_vm0, %v453_v21, %v536_v28  ;;  %v576_v33 = vsel %vm512_vm1, %v473_v22, %v544_v29 }
  0xce   : > { %600 = vst [vmem:[%s944_s11 + $0x98] sm:$0xff] %v568_v32  ;;  %v553_v34 = vsel %vm489_vm2, %v416_v25, %v521_v30  ;;  %v561_v35 = vsel %vm497_vm3, %v436_v27, %v529_v31 }
  0xcf   : > { %608 = vst [vmem:[%s944_s11 + $0xd8] sm:$0xff] %v576_v33 }
  0xd0   : > { %585 = vst [vmem:[%s944_s11 + $0x20] sm:$0xff] %v553_v34  ;;  %v455_v36 = vpop.f32.mrf.mxu2  ;;  %v475_v37 = vpop.f32.mrf.mxu3 }
  0xd1   : > { %593 = vst [vmem:[%s944_s11 + $0x60] sm:$0xff] %v561_v35  ;;  %v456_v38 = vadd.f32 %v936_v26, %v455_v36  ;;  %v476_v39 = vadd.f32 %v936_v26, %v475_v37  ;;  %v417_v40 = vpop.f32.mrf.mxu0  ;;  %v437_v41 = vpop.f32.mrf.mxu1 }
  0xd2   : > { %v418_v42 = vadd.f32 %v936_v26, %v417_v40  ;;  %v438_v43 = vadd.f32 %v936_v26, %v437_v41 }
  0xd3   : > { %vm505_vm4 = vcmp.ge.f32.partialorder %v456_v38, 0.0  ;;  %v537_v44 = vmul.f32 0.1, %v456_v38  ;;  %vm513_vm5 = vcmp.ge.f32.partialorder %v476_v39, 0.0  ;;  %v545_v45 = vmul.f32 0.1, %v476_v39 }
  0xd4   : > { %vm490_vm6 = vcmp.ge.f32.partialorder %v418_v42, 0.0  ;;  %v522_v46 = vmul.f32 0.1, %v418_v42  ;;  %vm498_vm7 = vcmp.ge.f32.partialorder %v438_v43, 0.0  ;;  %v530_v47 = vmul.f32 0.1, %v438_v43 }
  0xd5   : > { %v569_v48 = vsel %vm505_vm4, %v456_v38, %v537_v44  ;;  %v577_v49 = vsel %vm513_vm5, %v476_v39, %v545_v45 }
  0xd6   : > { %601 = vst [vmem:[%s944_s11 + $0xa0] sm:$0xff] %v569_v48  ;;  %v554_v50 = vsel %vm490_vm6, %v418_v42, %v522_v46  ;;  %v562_v51 = vsel %vm498_vm7, %v438_v43, %v530_v47 }
  0xd7   : > { %609 = vst [vmem:[%s944_s11 + $0xe0] sm:$0xff] %v577_v49 }
  0xd8   : > { %586 = vst [vmem:[%s944_s11 + $0x28] sm:$0xff] %v554_v50  ;;  %v457_v52 = vpop.f32.mrf.mxu2  ;;  %v477_v53 = vpop.f32.mrf.mxu3 }
  0xd9   : > { %594 = vst [vmem:[%s944_s11 + $0x68] sm:$0xff] %v562_v51  ;;  %v458_v54 = vadd.f32 %v936_v26, %v457_v52  ;;  %v478_v55 = vadd.f32 %v936_v26, %v477_v53  ;;  %v420_v56 = vpop.f32.mrf.mxu0  ;;  %v440_v57 = vpop.f32.mrf.mxu1 }
  0xda   : > { %v421_v58 = vadd.f32 %v936_v26, %v420_v56  ;;  %v441_v59 = vadd.f32 %v936_v26, %v440_v57 }
  0xdb   : > { %vm506_vm8 = vcmp.ge.f32.partialorder %v458_v54, 0.0  ;;  %v538_v60 = vmul.f32 0.1, %v458_v54  ;;  %vm514_vm9 = vcmp.ge.f32.partialorder %v478_v55, 0.0  ;;  %v546_v61 = vmul.f32 0.1, %v478_v55 }
  0xdc   : > { %vm491_vm10 = vcmp.ge.f32.partialorder %v421_v58, 0.0  ;;  %v523_v62 = vmul.f32 0.1, %v421_v58  ;;  %vm499_vm11 = vcmp.ge.f32.partialorder %v441_v59, 0.0  ;;  %v531_v63 = vmul.f32 0.1, %v441_v59 }
  0xdd   : > { %v570_v0 = vsel %vm506_vm8, %v458_v54, %v538_v60  ;;  %v578_v1 = vsel %vm514_vm9, %v478_v55, %v546_v61 }
  0xde   : > { %602 = vst [vmem:[%s944_s11 + $0xa8] sm:$0xff] %v570_v0  ;;  %v555_v2 = vsel %vm491_vm10, %v421_v58, %v523_v62  ;;  %v563_v3 = vsel %vm499_vm11, %v441_v59, %v531_v63 }
  0xdf   : > { %610 = vst [vmem:[%s944_s11 + $0xe8] sm:$0xff] %v578_v1 }
  0xe0   : > { %587 = vst [vmem:[%s944_s11 + $0x30] sm:$0xff] %v555_v2  ;;  %v460_v4 = vpop.f32.mrf.mxu2  ;;  %v480_v5 = vpop.f32.mrf.mxu3 }
  0xe1   : > { %595 = vst [vmem:[%s944_s11 + $0x70] sm:$0xff] %v563_v3  ;;  %v461_v6 = vadd.f32 %v936_v26, %v460_v4  ;;  %v481_v7 = vadd.f32 %v936_v26, %v480_v5  ;;  %v422_v8 = vpop.f32.mrf.mxu0  ;;  %v442_v9 = vpop.f32.mrf.mxu1 }
  0xe2   : > { %v423_v10 = vadd.f32 %v936_v26, %v422_v8  ;;  %v443_v11 = vadd.f32 %v936_v26, %v442_v9 }
  0xe3   : > { %vm507_vm12 = vcmp.ge.f32.partialorder %v461_v6, 0.0  ;;  %v539_v12 = vmul.f32 0.1, %v461_v6  ;;  %vm515_vm13 = vcmp.ge.f32.partialorder %v481_v7, 0.0  ;;  %v547_v13 = vmul.f32 0.1, %v481_v7 }
  0xe4   : > { %vm492_vm14 = vcmp.ge.f32.partialorder %v423_v10, 0.0  ;;  %v524_v14 = vmul.f32 0.1, %v423_v10  ;;  %vm500_vm15 = vcmp.ge.f32.partialorder %v443_v11, 0.0  ;;  %v532_v15 = vmul.f32 0.1, %v443_v11 }
  0xe5   : > { %v571_v16 = vsel %vm507_vm12, %v461_v6, %v539_v12  ;;  %v579_v17 = vsel %vm515_vm13, %v481_v7, %v547_v13 }
  0xe6   : > { %603 = vst [vmem:[%s944_s11 + $0xb0] sm:$0xff] %v571_v16  ;;  %v556_v18 = vsel %vm492_vm14, %v423_v10, %v524_v14  ;;  %v564_v19 = vsel %vm500_vm15, %v443_v11, %v532_v15 }
  0xe7   : > { %611 = vst [vmem:[%s944_s11 + $0xf0] sm:$0xff] %v579_v17 }
  0xe8   : > { %588 = vst [vmem:[%s944_s11 + $0x38] sm:$0xff] %v556_v18  ;;  %v462_v20 = vpop.f32.mrf.mxu2  ;;  %v482_v21 = vpop.f32.mrf.mxu3 }
  0xe9   : > { %596 = vst [vmem:[%s944_s11 + $0x78] sm:$0xff] %v564_v19  ;;  %v463_v22 = vadd.f32 %v936_v26, %v462_v20  ;;  %v483_v23 = vadd.f32 %v936_v26, %v482_v21 }
  0xeb   : > { %vm508_vm0 = vcmp.ge.f32.partialorder %v463_v22, 0.0  ;;  %v540_v24 = vmul.f32 0.1, %v463_v22  ;;  %vm516_vm1 = vcmp.ge.f32.partialorder %v483_v23, 0.0  ;;  %v548_v25 = vmul.f32 0.1, %v483_v23 }
  0xed   : > { %v572_v27 = vsel %vm508_vm0, %v463_v22, %v540_v24  ;;  %v580_v28 = vsel %vm516_vm1, %v483_v23, %v548_v25 }
  0xee   : > { %604 = vst [vmem:[%s944_s11 + $0xb8] sm:$0xff] %v572_v27 }
  0xef   : > { %612 = vst [vmem:[%s944_s11 + $0xf8] sm:$0xff] %v580_v28 }
  0xf0 PF: > { %s13_s12 = sadd.s32 1, %s842_s12  }
  0xf1   : > { %p10_p4 = scmp.ge.s32.totalorder %s13_s12, 4  }
  0xf3   :  { %12 = sbr.rel (!%p10_p4) target bundleno = 1 (0x1), region = 62 }

// kernel: hour_glass_prop_forward.6
= control target key start
LH: loop header
LB: loop body
LE: loop exit
PB: predicated region body
PF: predicated region fallthrough
CT: control target
= control target key end

     0   :  { %vm1451_vm0 = vcmask 523264   ;;  %s4399_s1 = inlined_call_operand.vmem [shape: bf16[1600,128], index: 1, kind: input, shape index: {}]   ;;  %s4400_s2 = inlined_call_operand.vmem [shape: f32[1,128], index: 2, kind: input, shape index: {}]   ;;  %s4401_s0 = inlined_call_operand.vmem [shape: bf16[128,1600], index: 0, kind: input, shape index: {}]   ;;  %s4402_s3 = inlined_call_operand.vmem [shape: f32[128,128], index: 3, kind: output, shape index: {}]  }
   0x1   :  { %v3116_v0 = vld [vmem:[%s4399_s1 + $0x38] sm:$0xff]  ;;  %v3115_v1 = vld [vmem:[%s4399_s1 + $0x30] sm:$0xff]  ;;  %v3114_v2 = vld [vmem:[%s4399_s1 + $0x28] sm:$0xff] }
   0x2   :  { %3209 = vmatpush.bf16.msra.mxu1 %v3116_v0  ;;  %3210 = vmatpush.bf16.msra.mxu2 %v3116_v0  ;;  %v3113_v3 = vld [vmem:[%s4399_s1 + $0x20] sm:$0xff]  ;;  %v3112_v4 = vld [vmem:[%s4399_s1 + $0x18] sm:$0xff]  ;;  %v3111_v5 = vld [vmem:[%s4399_s1 + $0x10] sm:$0xff] }
   0x3   :  { %3211 = vmatpush.bf16.msra.mxu3 %v3116_v0  ;;  %1476 = vmatpush.bf16.msra.mxu0 %v3116_v0  ;;  %v3110_v6 = vld [vmem:[%s4399_s1 + $0x8] sm:$0xff]  ;;  %v3109_v7 = vld [vmem:[%s4399_s1] sm:$0xff]  ;;  %v2287_v8 = vld [vmem:[%s4401_s0 + $0xd0] sm:$0xf] }
   0x4   :  { %v3037_v9 = vld [vmem:[%s4401_s0 + $0x100] sm:$0xf0]  ;;  %v2391_v10 = vld [vmem:[%s4401_s0 + $0x1a0] sm:$0xf]  ;;  %v3063_v11 = vld [vmem:[%s4401_s0 + $0x1d0] sm:$0xf0] }
   0x5   :  { %v2495_v12 = vld [vmem:[%s4401_s0 + $0x270] sm:$0xf]  ;;  %v3089_v13 = vld [vmem:[%s4401_s0 + $0x2a0] sm:$0xf0]  ;;  %v2183_v14 = vld [vmem:[%s4401_s0] sm:$0xf]  ;;  %v2288_v18 = vor.u32 %v3037_v9, %v2287_v8  ;;  %v2392_v19 = vor.u32 %v3063_v11, %v2391_v10 }
   0x6   :  { %3212 = vmatpush.bf16.msra.mxu1 %v3115_v1  ;;  %3213 = vmatpush.bf16.msra.mxu2 %v3115_v1  ;;  %v3011_v15 = vld [vmem:[%s4401_s0 + $0x30] sm:$0xf0]  ;;  %v3132_v16 = vld [vmem:[%s4399_s1 + $0xb8] sm:$0xff]  ;;  %v2496_v20 = vor.u32 %v3089_v13, %v2495_v12  ;;  %v3130_v28 = vld [vmem:[%s4399_s1 + $0xa8] sm:$0xff] }
   0x7   :  { %3214 = vmatpush.bf16.msra.mxu3 %v3115_v1  ;;  %1477 = vmatpush.bf16.msra.mxu0 %v3115_v1  ;;  %v3124_v17 = vld [vmem:[%s4399_s1 + $0x78] sm:$0xff]  ;;  %v2184_v21 = vor.u32 %v3011_v15, %v2183_v14  ;;  %v3131_v24 = vld [vmem:[%s4399_s1 + $0xb0] sm:$0xff]  ;;  %v3122_v29 = vld [vmem:[%s4399_s1 + $0x68] sm:$0xff] }
   0x8   :  { %v3140_v22 = vld [vmem:[%s4399_s1 + $0xf8] sm:$0xff]  ;;  %v3123_v25 = vld [vmem:[%s4399_s1 + $0x70] sm:$0xff]  ;;  %v3138_v30 = vld [vmem:[%s4399_s1 + $0xe8] sm:$0xff] }
   0x9   :  { %v3148_v23 = vld [vmem:[%s4399_s1 + $0x138] sm:$0xff]  ;;  %v3139_v26 = vld [vmem:[%s4399_s1 + $0xf0] sm:$0xff]  ;;  %v3146_v31 = vld [vmem:[%s4399_s1 + $0x128] sm:$0xff] }
   0xa   :  { %3215 = vmatpush.bf16.msra.mxu1 %v3114_v2  ;;  %3216 = vmatpush.bf16.msra.mxu2 %v3114_v2  ;;  %v3147_v27 = vld [vmem:[%s4399_s1 + $0x130] sm:$0xff]  ;;  %v3129_v32 = vld [vmem:[%s4399_s1 + $0xa0] sm:$0xff]  ;;  %v2339_v36 = vld [vmem:[%s4401_s0 + $0x138] sm:$0xf] }
   0xb   :  { %3217 = vmatpush.bf16.msra.mxu3 %v3114_v2  ;;  %1478 = vmatpush.bf16.msra.mxu0 %v3114_v2  ;;  %v3121_v33 = vld [vmem:[%s4399_s1 + $0x60] sm:$0xff]  ;;  %v3050_v37 = vld [vmem:[%s4401_s0 + $0x168] sm:$0xf0]  ;;  %v2443_v38 = vld [vmem:[%s4401_s0 + $0x208] sm:$0xf] }
   0xc   :  { %v3137_v34 = vld [vmem:[%s4399_s1 + $0xe0] sm:$0xff]  ;;  %v3076_v39 = vld [vmem:[%s4401_s0 + $0x238] sm:$0xf0]  ;;  %v2547_v40 = vld [vmem:[%s4401_s0 + $0x2d8] sm:$0xf]  ;;  %v2340_v46 = vor.u32 %v3050_v37, %v2339_v36 }
   0xd   :  { %v3145_v35 = vld [vmem:[%s4399_s1 + $0x120] sm:$0xff]  ;;  %v3102_v41 = vld [vmem:[%s4401_s0 + $0x308] sm:$0xf0]  ;;  %v2235_v42 = vld [vmem:[%s4401_s0 + $0x68] sm:$0xf]  ;;  %v2444_v47 = vor.u32 %v3076_v39, %v2443_v38 }
   0xe   :  { %3218 = vmatpush.bf16.msra.mxu1 %v3113_v3  ;;  %3219 = vmatpush.bf16.msra.mxu2 %v3113_v3  ;;  %v3024_v43 = vld [vmem:[%s4401_s0 + $0x98] sm:$0xf0]  ;;  %v2548_v48 = vor.u32 %v3102_v41, %v2547_v40  ;;  %v3127_v52 = vld [vmem:[%s4399_s1 + $0x90] sm:$0xff]  ;;  %v3126_v56 = vld [vmem:[%s4399_s1 + $0x88] sm:$0xff] }
   0xf   :  { %3220 = vmatpush.bf16.msra.mxu3 %v3113_v3  ;;  %1479 = vmatpush.bf16.msra.mxu0 %v3113_v3  ;;  %v3128_v44 = vld [vmem:[%s4399_s1 + $0x98] sm:$0xff]  ;;  %v2236_v49 = vor.u32 %v3024_v43, %v2235_v42  ;;  %v3119_v53 = vld [vmem:[%s4399_s1 + $0x50] sm:$0xff]  ;;  %v3118_v57 = vld [vmem:[%s4399_s1 + $0x48] sm:$0xff] }
  0x10   :  { %v3120_v45 = vld [vmem:[%s4399_s1 + $0x58] sm:$0xff]  ;;  %v3135_v54 = vld [vmem:[%s4399_s1 + $0xd0] sm:$0xff]  ;;  %v3134_v58 = vld [vmem:[%s4399_s1 + $0xc8] sm:$0xff] }
  0x11   :  { %v3136_v50 = vld [vmem:[%s4399_s1 + $0xd8] sm:$0xff]  ;;  %v3143_v55 = vld [vmem:[%s4399_s1 + $0x110] sm:$0xff]  ;;  %v3142_v59 = vld [vmem:[%s4399_s1 + $0x108] sm:$0xff] }
  0x12   :  { %3221 = vmatpush.bf16.msra.mxu1 %v3112_v4  ;;  %3222 = vmatpush.bf16.msra.mxu2 %v3112_v4  ;;  %v3144_v51 = vld [vmem:[%s4399_s1 + $0x118] sm:$0xff]  ;;  %v3125_v60 = vld [vmem:[%s4399_s1 + $0x80] sm:$0xff]  ;;  %v2199_v8 = vld [vmem:[%s4401_s0 + $0x10] sm:$0xf] }
  0x13   :  { %3223 = vmatpush.bf16.msra.mxu3 %v3112_v4  ;;  %1480 = vmatpush.bf16.msra.mxu0 %v3112_v4  ;;  %v3117_v61 = vld [vmem:[%s4399_s1 + $0x40] sm:$0xff]  ;;  %v2185_v1 = vld [vmem:[%s4401_s0 + $0x34] sm:$0xf0]  ;;  %v2191_v4 = vld [vmem:[%s4401_s0 + $0x8] sm:$0xf] }
  0x14   :  { %v3005_v62 = vld [vmem:[%s4401_s0 + $0x4] sm:$0xf]  ;;  %v3164_v2 = vld [vmem:[%s4399_s1 + $0x1b8] sm:$0xff]  ;;  %v3031_v40 = vld [vmem:[%s4401_s0 + $0xd4] sm:$0xf] }
  0x15   :  { %v3133_v63 = vld [vmem:[%s4399_s1 + $0xc0] sm:$0xff]  ;;  %v3156_v3 = vld [vmem:[%s4399_s1 + $0x178] sm:$0xff]  ;;  %v2188_v12 = vor.u32 %v3005_v62, %v2185_v1  ;;  %v2289_v41 = vld [vmem:[%s4401_s0 + $0x104] sm:$0xf0] }
  0x16   :  { %3224 = vmatpush.bf16.msra.mxu1 %v3111_v5  ;;  %3225 = vmatpush.bf16.msra.mxu2 %v3111_v5  ;;  %v3141_v0 = vld [vmem:[%s4399_s1 + $0x100] sm:$0xff]  ;;  %v3172_v10 = vld [vmem:[%s4399_s1 + $0x1f8] sm:$0xff]  ;;  %v3038_v43 = vld [vmem:[%s4401_s0 + $0x108] sm:$0xf0] }
  0x17   :  { %3226 = vmatpush.bf16.msra.mxu3 %v3111_v5  ;;  %1481 = vmatpush.bf16.msra.mxu0 %v3111_v5  ;;  %v3012_v5 = vld [vmem:[%s4401_s0 + $0x38] sm:$0xf0]  ;;  %v3013_v9 = vld [vmem:[%s4401_s0 + $0x40] sm:$0xf0]  ;;  %v2295_v42 = vld [vmem:[%s4401_s0 + $0xd8] sm:$0xf] }
  0x18   :  { %v3180_v11 = vld [vmem:[%s4399_s1 + $0x238] sm:$0xff]  ;;  %v2192_v13 = vor.u32 %v3012_v5, %v2191_v4  ;;  %v2200_v15 = vor.u32 %v3013_v9, %v2199_v8  ;;  %v3161_v36 = vld [vmem:[%s4399_s1 + $0x1a0] sm:$0xff]  ;;  %v2355_v62 = vld [vmem:[%s4401_s0 + $0x148] sm:$0xf] }
  0x19   :  { %v3169_v37 = vld [vmem:[%s4399_s1 + $0x1e0] sm:$0xff]  ;;  %v3159_v4 = vld [vmem:[%s4399_s1 + $0x190] sm:$0xff]  ;;  %v2393_v9 = vld [vmem:[%s4401_s0 + $0x1d4] sm:$0xf0] }
  0x1a   :  { %3227 = vmatpush.bf16.msra.mxu1 %v3110_v6  ;;  %3228 = vmatpush.bf16.msra.mxu2 %v3110_v6  ;;  %v3153_v38 = vld [vmem:[%s4399_s1 + $0x160] sm:$0xff]  ;;  %v3167_v5 = vld [vmem:[%s4399_s1 + $0x1d0] sm:$0xff] }
  0x1b   :  { %3229 = vmatpush.bf16.msra.mxu3 %v3110_v6  ;;  %1482 = vmatpush.bf16.msra.mxu0 %v3110_v6  ;;  %v3006_v6 = vld [vmem:[%s4401_s0 + $0xc] sm:$0xf]  ;;  %v3177_v39 = vld [vmem:[%s4399_s1 + $0x220] sm:$0xff] }
  0x1c   :  { %v3057_v8 = vld [vmem:[%s4401_s0 + $0x1a4] sm:$0xf] }
  0x1e   :  { %3230 = vmatpush.bf16.msra.mxu1 %v3109_v7  ;;  %3231 = vmatpush.bf16.msra.mxu2 %v3109_v7 }
  0x1f   :  { %3232 = vmatpush.bf16.msra.mxu3 %v3109_v7  ;;  %1483 = vmatpush.bf16.msra.mxu0 %v3109_v7  ;;  %v2193_v7 = vld [vmem:[%s4401_s0 + $0x3c] sm:$0xf0] }
  0x20   :  { %v2196_v14 = vor.u32 %v3006_v6, %v2193_v7  ;;  %v3151_v6 = vld [vmem:[%s4399_s1 + $0x150] sm:$0xff] }
  0x21   :  { %1494 = vmatmul.bf16.vlgmr.msra.gmra.mxu1 %v2288_v18  ;;  %1504 = vmatmul.bf16.vlgmr.msra.gmra.mxu2 %v2392_v19  ;;  %v3171_v18 = vld [vmem:[%s4399_s1 + $0x1f0] sm:$0xff] }
  0x22   :  { %1574 = vmatpush.bf16.msrb.mxu2 %v3132_v16  ;;  %1525 = vmatpush.bf16.msrb.mxu1 %v3124_v17  ;;  %v3163_v16 = vld [vmem:[%s4399_s1 + $0x1b0] sm:$0xff] }
  0x23   :  { %1514 = vmatmul.bf16.vlgmr.msra.gmra.mxu3 %v2496_v20  ;;  %1484 = vmatmul.bf16.vlgmr.msra.gmra.mxu0 %v2184_v21  ;;  %v3155_v17 = vld [vmem:[%s4399_s1 + $0x170] sm:$0xff]  ;;  %v3162_v20 = vld [vmem:[%s4399_s1 + $0x1a8] sm:$0xff] }
  0x24   :  { %1623 = vmatpush.bf16.msrb.mxu3 %v3140_v22  ;;  %1672 = vmatpush.bf16.msrb.mxu0 %v3148_v23  ;;  %v3179_v19 = vld [vmem:[%s4399_s1 + $0x230] sm:$0xff]  ;;  %v3154_v21 = vld [vmem:[%s4399_s1 + $0x168] sm:$0xff] }
  0x25   :  { %v3170_v22 = vld [vmem:[%s4399_s1 + $0x1e8] sm:$0xff]  ;;  %v3175_v7 = vld [vmem:[%s4399_s1 + $0x210] sm:$0xff] }
  0x26   :  { %1575 = vmatpush.bf16.msrb.mxu2 %v3131_v24  ;;  %1526 = vmatpush.bf16.msrb.mxu1 %v3123_v25  ;;  %v3178_v23 = vld [vmem:[%s4399_s1 + $0x228] sm:$0xff]  ;;  %v2237_v25 = vld [vmem:[%s4401_s0 + $0x9c] sm:$0xf0] }
  0x27   :  { %v3018_v24 = vld [vmem:[%s4401_s0 + $0x6c] sm:$0xf] }
  0x28   :  { %1624 = vmatpush.bf16.msrb.mxu3 %v3139_v26  ;;  %1673 = vmatpush.bf16.msrb.mxu0 %v3147_v27  ;;  %v2243_v26 = vld [vmem:[%s4401_s0 + $0x70] sm:$0xf]  ;;  %v3025_v27 = vld [vmem:[%s4401_s0 + $0xa0] sm:$0xf0] }
  0x2a   :  { %1576 = vmatpush.bf16.msrb.mxu2 %v3130_v28  ;;  %1527 = vmatpush.bf16.msrb.mxu1 %v3122_v29  ;;  %v3019_v28 = vld [vmem:[%s4401_s0 + $0x74] sm:$0xf]  ;;  %v2245_v29 = vld [vmem:[%s4401_s0 + $0xa4] sm:$0xf0] }
  0x2c   :  { %1625 = vmatpush.bf16.msrb.mxu3 %v3138_v30  ;;  %1674 = vmatpush.bf16.msrb.mxu0 %v3146_v31  ;;  %v2251_v30 = vld [vmem:[%s4401_s0 + $0x78] sm:$0xf]  ;;  %v3026_v31 = vld [vmem:[%s4401_s0 + $0xa8] sm:$0xf0] }
  0x2e   :  { %1577 = vmatpush.bf16.msrb.mxu2 %v3129_v32  ;;  %1528 = vmatpush.bf16.msrb.mxu1 %v3121_v33  ;;  %v2240_v32 = vor.u32 %v3018_v24, %v2237_v25  ;;  %v2244_v33 = vor.u32 %v3025_v27, %v2243_v26  ;;  %v3070_v24 = vld [vmem:[%s4401_s0 + $0x20c] sm:$0xf]  ;;  %v2445_v25 = vld [vmem:[%s4401_s0 + $0x23c] sm:$0xf0]  ;;  %v2451_v26 = vld [vmem:[%s4401_s0 + $0x210] sm:$0xf] }
  0x2f   :  { %v3077_v27 = vld [vmem:[%s4401_s0 + $0x240] sm:$0xf0] }
  0x30   :  { %1626 = vmatpush.bf16.msrb.mxu3 %v3137_v34  ;;  %1675 = vmatpush.bf16.msrb.mxu0 %v3145_v35  ;;  %v2248_v34 = vor.u32 %v3019_v28, %v2245_v29  ;;  %v2252_v35 = vor.u32 %v3026_v31, %v2251_v30  ;;  %v3071_v28 = vld [vmem:[%s4401_s0 + $0x214] sm:$0xf]  ;;  %v2453_v29 = vld [vmem:[%s4401_s0 + $0x244] sm:$0xf0]  ;;  %v2459_v30 = vld [vmem:[%s4401_s0 + $0x218] sm:$0xf] }
  0x31   :  { %1499 = vmatmul.bf16.gmra.mxu1 %v2340_v46  ;;  %1509 = vmatmul.bf16.gmra.mxu2 %v2444_v47  ;;  %v2303_v46 = vld [vmem:[%s4401_s0 + $0xe0] sm:$0xf]  ;;  %v3039_v47 = vld [vmem:[%s4401_s0 + $0x110] sm:$0xf0]  ;;  %v3078_v31 = vld [vmem:[%s4401_s0 + $0x248] sm:$0xf0] }
  0x32   :  { %1578 = vmatpush.bf16.msrb.mxu2 %v3128_v44  ;;  %1529 = vmatpush.bf16.msrb.mxu1 %v3120_v45  ;;  %v3032_v44 = vld [vmem:[%s4401_s0 + $0xdc] sm:$0xf]  ;;  %v2297_v45 = vld [vmem:[%s4401_s0 + $0x10c] sm:$0xf0] }
  0x33   :  { %1519 = vmatmul.bf16.gmra.mxu3 %v2548_v48  ;;  %1489 = vmatmul.bf16.gmra.mxu0 %v2236_v49  ;;  %v2292_v48 = vor.u32 %v3031_v40, %v2289_v41  ;;  %v2296_v49 = vor.u32 %v3038_v43, %v2295_v42  ;;  %v3083_v40 = vld [vmem:[%s4401_s0 + $0x274] sm:$0xf]  ;;  %v2497_v41 = vld [vmem:[%s4401_s0 + $0x2a4] sm:$0xf0]  ;;  %v2503_v42 = vld [vmem:[%s4401_s0 + $0x278] sm:$0xf] }
  0x34   :  { %1627 = vmatpush.bf16.msrb.mxu3 %v3136_v50  ;;  %1676 = vmatpush.bf16.msrb.mxu0 %v3144_v51  ;;  %v2300_v50 = vor.u32 %v3032_v44, %v2297_v45  ;;  %v2304_v51 = vor.u32 %v3039_v47, %v2303_v46  ;;  %v3090_v43 = vld [vmem:[%s4401_s0 + $0x2a8] sm:$0xf0]  ;;  %v3084_v44 = vld [vmem:[%s4401_s0 + $0x27c] sm:$0xf]  ;;  %v2505_v45 = vld [vmem:[%s4401_s0 + $0x2ac] sm:$0xf0] }
  0x35   :  { %v2511_v46 = vld [vmem:[%s4401_s0 + $0x280] sm:$0xf]  ;;  %v3091_v47 = vld [vmem:[%s4401_s0 + $0x2b0] sm:$0xf0] }
  0x36   :  { %1579 = vmatpush.bf16.msrb.mxu2 %v3127_v52  ;;  %1530 = vmatpush.bf16.msrb.mxu1 %v3119_v53  ;;  %v3160_v52 = vld [vmem:[%s4399_s1 + $0x198] sm:$0xff] }
  0x37   :  { %v3168_v53 = vld [vmem:[%s4399_s1 + $0x1d8] sm:$0xff] }
  0x38   :  { %1628 = vmatpush.bf16.msrb.mxu3 %v3135_v54  ;;  %1677 = vmatpush.bf16.msrb.mxu0 %v3143_v55  ;;  %v3152_v54 = vld [vmem:[%s4399_s1 + $0x158] sm:$0xff] }
  0x39   :  { %v3176_v55 = vld [vmem:[%s4399_s1 + $0x218] sm:$0xff] }
  0x3a   :  { %1580 = vmatpush.bf16.msrb.mxu2 %v3126_v56  ;;  %1531 = vmatpush.bf16.msrb.mxu1 %v3118_v57  ;;  %v3044_v56 = vld [vmem:[%s4401_s0 + $0x13c] sm:$0xf]  ;;  %v2341_v57 = vld [vmem:[%s4401_s0 + $0x16c] sm:$0xf0] }
  0x3c   :  { %1629 = vmatpush.bf16.msrb.mxu3 %v3134_v58  ;;  %1678 = vmatpush.bf16.msrb.mxu0 %v3142_v59  ;;  %v2347_v58 = vld [vmem:[%s4401_s0 + $0x140] sm:$0xf]  ;;  %v3051_v59 = vld [vmem:[%s4401_s0 + $0x170] sm:$0xf0] }
  0x3d   :  { %v2348_v1 = vor.u32 %v3051_v59, %v2347_v58 }
  0x3e   :  { %1581 = vmatpush.bf16.msrb.mxu2 %v3125_v60  ;;  %1532 = vmatpush.bf16.msrb.mxu1 %v3117_v61  ;;  %v3045_v60 = vld [vmem:[%s4401_s0 + $0x144] sm:$0xf]  ;;  %v2349_v61 = vld [vmem:[%s4401_s0 + $0x174] sm:$0xf0] }
  0x40   :  { %1630 = vmatpush.bf16.msrb.mxu3 %v3133_v63  ;;  %1679 = vmatpush.bf16.msrb.mxu0 %v3141_v0  ;;  %v3052_v63 = vld [vmem:[%s4401_s0 + $0x178] sm:$0xf0]  ;;  %v2344_v0 = vor.u32 %v3044_v56, %v2341_v57  ;;  %v3699_v56 = vld [vmem:[%s4400_s2] ss:$0 sm:$0xff] }
  0x41   :  { %1533 = vmatmul.bf16.vlgmr.msrb.gmra.mxu1 %v2188_v12  ;;  %1582 = vmatmul.bf16.vlgmr.msrb.gmra.mxu2 %v2192_v13  ;;  %v3058_v12 = vld [vmem:[%s4401_s0 + $0x1ac] sm:$0xf]  ;;  %v2401_v13 = vld [vmem:[%s4401_s0 + $0x1dc] sm:$0xf0] }
  0x42   :  { %1770 = vmatpush.bf16.msra.mxu2 %v3164_v2  ;;  %1721 = vmatpush.bf16.msra.mxu1 %v3156_v3  ;;  %v2352_v2 = vor.u32 %v3045_v60, %v2349_v61  ;;  %v2356_v3 = vor.u32 %v3052_v63, %v2355_v62  ;;  %v3188_v63 = vld [vmem:[%s4399_s1 + $0x278] sm:$0xff] }
  0x43   :  { %1631 = vmatmul.bf16.vlgmr.msrb.gmra.mxu3 %v2196_v14  ;;  %1680 = vmatmul.bf16.vlgmr.msrb.gmra.mxu0 %v2200_v15  ;;  %v2407_v14 = vld [vmem:[%s4401_s0 + $0x1b0] sm:$0xf]  ;;  %v3065_v15 = vld [vmem:[%s4401_s0 + $0x1e0] sm:$0xf0] }
  0x44   :  { %1819 = vmatpush.bf16.msra.mxu3 %v3172_v10  ;;  %1868 = vmatpush.bf16.msra.mxu0 %v3180_v11  ;;  %v2399_v10 = vld [vmem:[%s4401_s0 + $0x1a8] sm:$0xf]  ;;  %v3064_v11 = vld [vmem:[%s4401_s0 + $0x1d8] sm:$0xf0] }
  0x46   :  { %1771 = vmatpush.bf16.msra.mxu2 %v3163_v16  ;;  %1722 = vmatpush.bf16.msra.mxu1 %v3155_v17  ;;  %v2396_v16 = vor.u32 %v3057_v8, %v2393_v9  ;;  %v2400_v17 = vor.u32 %v3064_v11, %v2399_v10  ;;  %v3104_v8 = vld [vmem:[%s4401_s0 + $0x318] sm:$0xf0] }
  0x48   :  { %1820 = vmatpush.bf16.msra.mxu3 %v3171_v18  ;;  %1869 = vmatpush.bf16.msra.mxu0 %v3179_v19  ;;  %v2404_v18 = vor.u32 %v3058_v12, %v2401_v13  ;;  %v2408_v19 = vor.u32 %v3065_v15, %v2407_v14 }
  0x4a   :  { %1772 = vmatpush.bf16.msra.mxu2 %v3162_v20  ;;  %1723 = vmatpush.bf16.msra.mxu1 %v3154_v21  ;;  %v3158_v20 = vld [vmem:[%s4399_s1 + $0x188] sm:$0xff] }
  0x4b   :  { %v3166_v21 = vld [vmem:[%s4399_s1 + $0x1c8] sm:$0xff] }
  0x4c   :  { %1821 = vmatpush.bf16.msra.mxu3 %v3170_v22  ;;  %1870 = vmatpush.bf16.msra.mxu0 %v3178_v23  ;;  %v3150_v22 = vld [vmem:[%s4399_s1 + $0x148] sm:$0xff] }
  0x4d   :  { %v3174_v23 = vld [vmem:[%s4399_s1 + $0x208] sm:$0xff] }
  0x4e   :  { %1773 = vmatpush.bf16.msra.mxu2 %v3161_v36  ;;  %1724 = vmatpush.bf16.msra.mxu1 %v3153_v38  ;;  %v3157_v36 = vld [vmem:[%s4399_s1 + $0x180] sm:$0xff] }
  0x4f   :  { %v3149_v38 = vld [vmem:[%s4399_s1 + $0x140] sm:$0xff] }
  0x50   :  { %1822 = vmatpush.bf16.msra.mxu3 %v3169_v37  ;;  %1871 = vmatpush.bf16.msra.mxu0 %v3177_v39  ;;  %v3165_v37 = vld [vmem:[%s4399_s1 + $0x1c0] sm:$0xff] }
  0x51   :  { %1538 = vmatmul.bf16.gmra.mxu1 %v2240_v32  ;;  %1587 = vmatmul.bf16.gmra.mxu2 %v2244_v33  ;;  %v2448_v32 = vor.u32 %v3070_v24, %v2445_v25  ;;  %v2452_v33 = vor.u32 %v3077_v27, %v2451_v26  ;;  %v3173_v39 = vld [vmem:[%s4399_s1 + $0x200] sm:$0xff]  ;;  %v3187_v27 = vld [vmem:[%s4399_s1 + $0x270] sm:$0xff] }
  0x52   :  { %1774 = vmatpush.bf16.msra.mxu2 %v3160_v52  ;;  %1725 = vmatpush.bf16.msra.mxu1 %v3152_v54  ;;  %v2512_v52 = vor.u32 %v3091_v47, %v2511_v46  ;;  %v3196_v54 = vld [vmem:[%s4399_s1 + $0x2b8] sm:$0xff] }
  0x53   :  { %1636 = vmatmul.bf16.gmra.mxu3 %v2248_v34  ;;  %1685 = vmatmul.bf16.gmra.mxu0 %v2252_v35  ;;  %v2456_v34 = vor.u32 %v3071_v28, %v2453_v29  ;;  %v2460_v35 = vor.u32 %v3078_v31, %v2459_v30  ;;  %v3007_v28 = vld [vmem:[%s4401_s0 + $0x14] sm:$0xf]  ;;  %v2201_v29 = vld [vmem:[%s4401_s0 + $0x44] sm:$0xf0]  ;;  %v2207_v30 = vld [vmem:[%s4401_s0 + $0x18] sm:$0xf] }
  0x54   :  { %1823 = vmatpush.bf16.msra.mxu3 %v3168_v53  ;;  %1872 = vmatpush.bf16.msra.mxu0 %v3176_v55  ;;  %v3204_v55 = vld [vmem:[%s4399_s1 + $0x2f8] sm:$0xff]  ;;  %v3014_v31 = vld [vmem:[%s4401_s0 + $0x48] sm:$0xf0] }
  0x56   :  { %1775 = vmatpush.bf16.msra.mxu2 %v3159_v4  ;;  %1726 = vmatpush.bf16.msra.mxu1 %v3151_v6  ;;  %v3103_v4 = vld [vmem:[%s4401_s0 + $0x310] sm:$0xf0]  ;;  %v2557_v6 = vld [vmem:[%s4401_s0 + $0x314] sm:$0xf0] }
  0x58   :  { %1824 = vmatpush.bf16.msra.mxu3 %v3167_v5  ;;  %1873 = vmatpush.bf16.msra.mxu0 %v3175_v7  ;;  %v3097_v5 = vld [vmem:[%s4401_s0 + $0x2e4] sm:$0xf]  ;;  %v2563_v7 = vld [vmem:[%s4401_s0 + $0x2e8] sm:$0xf] }
  0x5a   :  { %1776 = vmatpush.bf16.msra.mxu2 %v3158_v20  ;;  %1727 = vmatpush.bf16.msra.mxu1 %v3150_v22  ;;  %v3203_v20 = vld [vmem:[%s4399_s1 + $0x2f0] sm:$0xff] }
  0x5c   :  { %1825 = vmatpush.bf16.msra.mxu3 %v3166_v21  ;;  %1874 = vmatpush.bf16.msra.mxu0 %v3174_v23 }
  0x5e   :  { %1777 = vmatpush.bf16.msra.mxu2 %v3157_v36  ;;  %1728 = vmatpush.bf16.msra.mxu1 %v3149_v38 }
  0x60   :  { %1826 = vmatpush.bf16.msra.mxu3 %v3165_v37  ;;  %1875 = vmatpush.bf16.msra.mxu0 %v3173_v39 }
  0x61   :  { %1543 = vmatmul.bf16.gmra.mxu1 %v2292_v48  ;;  %1592 = vmatmul.bf16.gmra.mxu2 %v2296_v49  ;;  %v2500_v48 = vor.u32 %v3083_v40, %v2497_v41  ;;  %v2504_v49 = vor.u32 %v3090_v43, %v2503_v42  ;;  %v2204_v40 = vor.u32 %v3007_v28, %v2201_v29 }
  0x62   :  { %1966 = vmatpush.bf16.msrb.mxu2 %v3196_v54  ;;  %1917 = vmatpush.bf16.msrb.mxu1 %v3188_v63  ;;  %v2208_v41 = vor.u32 %v3014_v31, %v2207_v30  ;;  %v3201_v31 = vld [vmem:[%s4399_s1 + $0x2e0] sm:$0xff] }
  0x63   :  { %1641 = vmatmul.bf16.gmra.mxu3 %v2300_v50  ;;  %1690 = vmatmul.bf16.gmra.mxu0 %v2304_v51  ;;  %v2508_v51 = vor.u32 %v3084_v44, %v2505_v45 }
  0x64   :  { %2015 = vmatpush.bf16.msrb.mxu3 %v3204_v55 }
  0x66   :  { %1918 = vmatpush.bf16.msrb.mxu1 %v3187_v27 }
  0x68   :  { %2016 = vmatpush.bf16.msrb.mxu3 %v3203_v20 }
  0x71   :  { %1548 = vmatmul.bf16.gmra.mxu1 %v2344_v0  ;;  %1597 = vmatmul.bf16.gmra.mxu2 %v2348_v1  ;;  %v3208_v0 = vld [vmem:[%s4399_s1 + $0x318] sm:$0xff] }
  0x72   :  { %v3096_v1 = vld [vmem:[%s4401_s0 + $0x2dc] sm:$0xf]  ;;  %2068 = vmatpush.bf16.msrb.mxu0 %v3208_v0  ;;  %v3186_v0 = vld [vmem:[%s4399_s1 + $0x268] sm:$0xff] }
  0x73   :  { %1646 = vmatmul.bf16.gmra.mxu3 %v2352_v2  ;;  %1695 = vmatmul.bf16.gmra.mxu0 %v2356_v3  ;;  %v2549_v2 = vld [vmem:[%s4401_s0 + $0x30c] sm:$0xf0]  ;;  %v2555_v3 = vld [vmem:[%s4401_s0 + $0x2e0] sm:$0xf] }
  0x74   :  { %v2552_v12 = vor.u32 %v3096_v1, %v2549_v2  ;;  %v2556_v13 = vor.u32 %v3103_v4, %v2555_v3  ;;  %v3207_v1 = vld [vmem:[%s4399_s1 + $0x310] sm:$0xff]  ;;  %v3020_v2 = vld [vmem:[%s4401_s0 + $0x7c] sm:$0xf]  ;;  %1919 = vmatpush.bf16.msrb.mxu1 %v3186_v0  ;;  %v2259_v4 = vld [vmem:[%s4401_s0 + $0x80] sm:$0xf] }
  0x76   :  { %2069 = vmatpush.bf16.msrb.mxu0 %v3207_v1 }
  0x81   :  { %1553 = vmatmul.bf16.gmra.mxu1 %v2396_v16  ;;  %1602 = vmatmul.bf16.gmra.mxu2 %v2400_v17  ;;  %v2560_v16 = vor.u32 %v3097_v5, %v2557_v6  ;;  %v2564_v17 = vor.u32 %v3104_v8, %v2563_v7  ;;  %v3027_v5 = vld [vmem:[%s4401_s0 + $0xb0] sm:$0xf0]  ;;  %v3021_v6 = vld [vmem:[%s4401_s0 + $0x84] sm:$0xf]  ;;  %v2261_v7 = vld [vmem:[%s4401_s0 + $0xb4] sm:$0xf0] }
  0x82   :  { %v2267_v8 = vld [vmem:[%s4401_s0 + $0x88] sm:$0xf] }
  0x83   :  { %1651 = vmatmul.bf16.gmra.mxu3 %v2404_v18  ;;  %1700 = vmatmul.bf16.gmra.mxu0 %v2408_v19  ;;  %v3195_v19 = vld [vmem:[%s4399_s1 + $0x2b0] sm:$0xff] }
  0x84   :  { %1967 = vmatpush.bf16.msrb.mxu2 %v3195_v19  ;;  %v2260_v19 = vor.u32 %v3027_v5, %v2259_v4 }
  0x91   :  { %1558 = vmatmul.bf16.gmra.mxu1 %v2448_v32  ;;  %1607 = vmatmul.bf16.gmra.mxu2 %v2452_v33  ;;  %v3008_v32 = vld [vmem:[%s4401_s0 + $0x1c] sm:$0xf]  ;;  %v2209_v33 = vld [vmem:[%s4401_s0 + $0x4c] sm:$0xf0] }
  0x92   :  { %v2212_v44 = vor.u32 %v3008_v32, %v2209_v33 }
  0x93   :  { %1656 = vmatmul.bf16.gmra.mxu3 %v2456_v34  ;;  %1705 = vmatmul.bf16.gmra.mxu0 %v2460_v35  ;;  %v2215_v34 = vld [vmem:[%s4401_s0 + $0x20] sm:$0xf]  ;;  %v3015_v35 = vld [vmem:[%s4401_s0 + $0x50] sm:$0xf0] }
  0x94   :  { %v2216_v45 = vor.u32 %v3015_v35, %v2215_v34 }
  0x9e   :  { %v3686_v50 = vpop.f32.mrf.mxu1 }
  0xa0   :  { %v3688_v53 = vpop.f32.mrf.mxu0 }
  0xa1   :  { %1563 = vmatmul.bf16.gmra.mxu1 %v2500_v48  ;;  %1612 = vmatmul.bf16.gmra.mxu2 %v2504_v49  ;;  %v1486_v37 = vadd.f32 %v3699_v56, %v3688_v53  ;;  %v3194_v48 = vld [vmem:[%s4399_s1 + $0x2a8] sm:$0xff] }
  0xa2   :  { %v3202_v49 = vld [vmem:[%s4399_s1 + $0x2e8] sm:$0xff]  ;;  %1968 = vmatpush.bf16.msrb.mxu2 %v3194_v48  ;;  %v2313_v48 = vld [vmem:[%s4401_s0 + $0x11c] sm:$0xf0] }
  0xa3   :  { %1661 = vmatmul.bf16.gmra.mxu3 %v2508_v51  ;;  %1710 = vmatmul.bf16.gmra.mxu0 %v2512_v52 }
  0xa4   :  { %v1505_v57 = vpop.f32.mrf.mxu2  ;;  %2017 = vmatpush.bf16.msrb.mxu3 %v3202_v49  ;;  %v2319_v49 = vld [vmem:[%s4401_s0 + $0xf0] sm:$0xf] }
  0xa5   :  { %v3702_v58 = vadd.f32 %v3699_v56, %v1505_v57 }
  0xa6   :  { %v1515_v59 = vpop.f32.mrf.mxu3  ;;  %v3707_v61 = vpop.f32.mrf.mxu1 }
  0xa7   :  { %v3705_v60 = vadd.f32 %v3699_v56, %v1515_v59 }
  0xa8   :  { %v3709_v62 = vpop.f32.mrf.mxu0  ;;  %2018 = vmatpush.bf16.msrb.mxu3 %v3201_v31  ;;  %v2371_v31 = vld [vmem:[%s4401_s0 + $0x158] sm:$0xf] }
  0xa9   :  { %v1488_v52 = vadd.f32 %v3699_v56, %v3709_v62  ;;  %v2253_v62 = vld [vmem:[%s4401_s0 + $0xac] sm:$0xf0] }
  0xac   :  { %v1507_v9 = vpop.f32.mrf.mxu2 }
  0xad   :  { %v3742_v10 = vadd.f32 %v3699_v56, %v1507_v9  ;;  %v3028_v9 = vld [vmem:[%s4401_s0 + $0xb8] sm:$0xf0] }
  0xae   :  { %v1517_v11 = vpop.f32.mrf.mxu3  ;;  %v3747_v15 = vpop.f32.mrf.mxu1 }
  0xaf   :  { %v3745_v14 = vadd.f32 %v3699_v56, %v1517_v11 }
  0xb0   :  { %v3749_v18 = vpop.f32.mrf.mxu0 }
  0xb1   :  { %1568 = vmatmul.bf16.gmra.mxu1 %v2552_v12  ;;  %1617 = vmatmul.bf16.gmra.mxu2 %v2556_v13  ;;  %v1491_v12 = vadd.f32 %v3699_v56, %v3749_v18  ;;  %v3193_v18 = vld [vmem:[%s4399_s1 + $0x2a0] sm:$0xff] }
  0xb2   :  { %1969 = vmatpush.bf16.msrb.mxu2 %v3193_v18  ;;  %v2365_v18 = vld [vmem:[%s4401_s0 + $0x184] sm:$0xf0] }
  0xb3   :  { %1666 = vmatmul.bf16.gmra.mxu3 %v2560_v16  ;;  %1715 = vmatmul.bf16.gmra.mxu0 %v2564_v17  ;;  %v2256_v17 = vor.u32 %v3020_v2, %v2253_v62 }
  0xb4   :  { %v1510_v21 = vpop.f32.mrf.mxu2 }
  0xb5   :  { %v3758_v22 = vadd.f32 %v3699_v56, %v1510_v21  ;;  %v2264_v21 = vor.u32 %v3021_v6, %v2261_v7  ;;  %v3200_v6 = vld [vmem:[%s4399_s1 + $0x2d8] sm:$0xff] }
  0xb6   :  { %v1520_v23 = vpop.f32.mrf.mxu3  ;;  %v3763_v25 = vpop.f32.mrf.mxu1  ;;  %2019 = vmatpush.bf16.msrb.mxu3 %v3200_v6  ;;  %v3067_v6 = vld [vmem:[%s4401_s0 + $0x1f0] sm:$0xf0] }
  0xb7   :  { %v3761_v24 = vadd.f32 %v3699_v56, %v1520_v23  ;;  %v2268_v23 = vor.u32 %v3028_v9, %v2267_v8  ;;  %v1498_v8 = vadd.f32 %v3699_v56, %v3707_v61  ;;  %v2357_v61 = vld [vmem:[%s4401_s0 + $0x17c] sm:$0xf0] }
  0xb8   :  { %v3765_v26 = vpop.f32.mrf.mxu0 }
  0xb9   :  { %v1493_v33 = vadd.f32 %v3699_v56, %v3765_v26 }
  0xbc   :  { %v1512_v36 = vpop.f32.mrf.mxu2 }
  0xbd   :  { %v3797_v38 = vadd.f32 %v3699_v56, %v1512_v36 }
  0xbe   :  { %v1522_v39 = vpop.f32.mrf.mxu3  ;;  %v1534_v43 = vpop.f32.mrf.mxu1 }
  0xbf   :  { %v3800_v42 = vadd.f32 %v3699_v56, %v1522_v39  ;;  %v1535_v46 = vadd.f32 %v1534_v43, %v1486_v37  ;;  %v3033_v43 = vld [vmem:[%s4401_s0 + $0xe4] sm:$0xf] }
  0xc0   :  { %v1681_v47 = vpop.f32.mrf.mxu0 }
  0xc1   :  { %1729 = vmatmul.bf16.vlgmr.msra.gmra.mxu1 %v2204_v40  ;;  %1778 = vmatmul.bf16.vlgmr.msra.gmra.mxu2 %v2208_v41  ;;  %v3185_v41 = vld [vmem:[%s4399_s1 + $0x260] sm:$0xff] }
  0xc2   :  { %1920 = vmatpush.bf16.msrb.mxu1 %v3185_v41 }
  0xc3   :  { %1827 = vmatmul.bf16.vlgmr.msra.gmra.mxu3 %v2212_v44  ;;  %1876 = vmatmul.bf16.vlgmr.msra.gmra.mxu0 %v2216_v45  ;;  %v2305_v44 = vld [vmem:[%s4401_s0 + $0x114] sm:$0xf0]  ;;  %v2311_v45 = vld [vmem:[%s4401_s0 + $0xe8] sm:$0xf] }
  0xc4   :  { %v1583_v51 = vpop.f32.mrf.mxu2 }
  0xc5   :  { %v1584_v53 = vadd.f32 %v1583_v51, %v1535_v46  ;;  %v3040_v46 = vld [vmem:[%s4401_s0 + $0x118] sm:$0xf0]  ;;  %v3041_v51 = vld [vmem:[%s4401_s0 + $0x120] sm:$0xf0] }
  0xc6   :  { %v1632_v54 = vpop.f32.mrf.mxu3  ;;  %v1536_v55 = vpop.f32.mrf.mxu1  ;;  %v2320_v1 = vor.u32 %v3041_v51, %v2319_v49  ;;  %v1503_v51 = vadd.f32 %v3699_v56, %v3763_v25  ;;  %v2415_v25 = vld [vmem:[%s4401_s0 + $0x1b8] sm:$0xf] }
  0xc7   :  { %v1633_v57 = vadd.f32 %v1632_v54, %v1584_v53  ;;  %v1537_v59 = vadd.f32 %v1536_v55, %v1488_v52  ;;  %v1496_v53 = vadd.f32 %v3699_v56, %v3686_v50  ;;  %v3192_v50 = vld [vmem:[%s4399_s1 + $0x298] sm:$0xff] }
  0xc8   :  { %v1683_v63 = vpop.f32.mrf.mxu0  ;;  %1970 = vmatpush.bf16.msrb.mxu2 %v3192_v50  ;;  %v2423_v50 = vld [vmem:[%s4401_s0 + $0x1c0] sm:$0xf] }
  0xc9   :  { %v3822_v3 = vadd.f32 %v1681_v47, %v1633_v57  ;;  %v3034_v47 = vld [vmem:[%s4401_s0 + $0xec] sm:$0xf]  ;;  %v2308_v57 = vor.u32 %v3033_v43, %v2305_v44 }
  0xca   :  { %v2316_v0 = vor.u32 %v3034_v47, %v2313_v48  ;;  %v3199_v48 = vld [vmem:[%s4399_s1 + $0x2d0] sm:$0xff] }
  0xcb   :  { %2020 = vmatpush.bf16.msrb.mxu3 %v3199_v48 }
  0xcc   :  { %v1585_v11 = vpop.f32.mrf.mxu2 }
  0xcd   :  { %v1586_v13 = vadd.f32 %v1585_v11, %v1537_v59  ;;  %v2312_v59 = vor.u32 %v3040_v46, %v2311_v45 }
  0xce   :  { %v1634_v16 = vpop.f32.mrf.mxu3  ;;  %v1539_v20 = vpop.f32.mrf.mxu1 }
  0xcf   :  { %v1635_v27 = vadd.f32 %v1634_v16, %v1586_v13  ;;  %v1540_v28 = vadd.f32 %v1539_v20, %v1491_v12  ;;  %v3206_v20 = vld [vmem:[%s4399_s1 + $0x308] sm:$0xff] }
  0xd0   :  { %v1686_v29 = vpop.f32.mrf.mxu0  ;;  %2070 = vmatpush.bf16.msrb.mxu0 %v3206_v20 }
  0xd1   :  { %1734 = vmatmul.bf16.gmra.mxu1 %v2256_v17  ;;  %1783 = vmatmul.bf16.gmra.mxu2 %v2260_v19  ;;  %v3844_v30 = vadd.f32 %v1683_v63, %v1635_v27  ;;  %v3184_v19 = vld [vmem:[%s4399_s1 + $0x258] sm:$0xff]  ;;  %v2363_v27 = vld [vmem:[%s4401_s0 + $0x150] sm:$0xf] }
  0xd2   :  { %1921 = vmatpush.bf16.msrb.mxu1 %v3184_v19 }
  0xd3   :  { %1832 = vmatmul.bf16.gmra.mxu3 %v2264_v21  ;;  %1881 = vmatmul.bf16.gmra.mxu0 %v2268_v23  ;;  %v3046_v21 = vld [vmem:[%s4401_s0 + $0x14c] sm:$0xf] }
  0xd4   :  { %v1588_v32 = vpop.f32.mrf.mxu2 }
  0xd5   :  { %v1589_v34 = vadd.f32 %v1588_v32, %v1540_v28  ;;  %v3053_v28 = vld [vmem:[%s4401_s0 + $0x180] sm:$0xf0]  ;;  %v3054_v32 = vld [vmem:[%s4401_s0 + $0x188] sm:$0xf0] }
  0xd6   :  { %v1637_v35 = vpop.f32.mrf.mxu3  ;;  %v1541_v36 = vpop.f32.mrf.mxu1  ;;  %v2372_v43 = vor.u32 %v3054_v32, %v2371_v31 }
  0xd7   :  { %v1638_v37 = vadd.f32 %v1637_v35, %v1589_v34  ;;  %v1542_v39 = vadd.f32 %v1541_v36, %v1493_v33  ;;  %v1501_v34 = vadd.f32 %v3699_v56, %v3747_v15  ;;  %v3191_v15 = vld [vmem:[%s4399_s1 + $0x290] sm:$0xff] }
  0xd8   :  { %v1688_v40 = vpop.f32.mrf.mxu0  ;;  %1971 = vmatpush.bf16.msrb.mxu2 %v3191_v15 }
  0xd9   :  { %v3863_v26 = vadd.f32 %v1686_v29, %v1638_v37  ;;  %v3047_v29 = vld [vmem:[%s4401_s0 + $0x154] sm:$0xf]  ;;  %v2360_v37 = vor.u32 %v3046_v21, %v2357_v61 }
  0xda   :  { %v2368_v41 = vor.u32 %v3047_v29, %v2365_v18 }
  0xdc   :  { %v1590_v52 = vpop.f32.mrf.mxu2 }
  0xdd   :  { %v1591_v54 = vadd.f32 %v1590_v52, %v1542_v39  ;;  %v2364_v39 = vor.u32 %v3053_v28, %v2363_v27  ;;  %v3190_v27 = vld [vmem:[%s4399_s1 + $0x288] sm:$0xff] }
  0xde   :  { %v1639_v55 = vpop.f32.mrf.mxu3  ;;  %v1544_v63 = vpop.f32.mrf.mxu1  ;;  %v3198_v28 = vld [vmem:[%s4399_s1 + $0x2c8] sm:$0xff]  ;;  %1972 = vmatpush.bf16.msrb.mxu2 %v3190_v27 }
  0xdf   :  { %v1640_v2 = vadd.f32 %v1639_v55, %v1591_v54  ;;  %v1545_v62 = vadd.f32 %v1544_v63, %v1496_v53  ;;  %v3183_v63 = vld [vmem:[%s4399_s1 + $0x250] sm:$0xff]  ;;  %2021 = vmatpush.bf16.msrb.mxu3 %v3198_v28 }
  0xe0   :  { %v1691_v4 = vpop.f32.mrf.mxu0  ;;  %1922 = vmatpush.bf16.msrb.mxu1 %v3183_v63 }
  0xe1   :  { %1739 = vmatmul.bf16.gmra.mxu1 %v2308_v57  ;;  %1788 = vmatmul.bf16.gmra.mxu2 %v2312_v59  ;;  %v3885_v5 = vadd.f32 %v1688_v40, %v1640_v2  ;;  %v3066_v2 = vld [vmem:[%s4401_s0 + $0x1e8] sm:$0xf0] }
  0xe3   :  { %1837 = vmatmul.bf16.gmra.mxu3 %v2316_v0  ;;  %1886 = vmatmul.bf16.gmra.mxu0 %v2320_v1  ;;  %v3059_v0 = vld [vmem:[%s4401_s0 + $0x1b4] sm:$0xf]  ;;  %v2409_v1 = vld [vmem:[%s4401_s0 + $0x1e4] sm:$0xf0] }
  0xe4   :  { %v1593_v7 = vpop.f32.mrf.mxu2 }
  0xe5   :  { %v1594_v9 = vadd.f32 %v1593_v7, %v1545_v62  ;;  %v3060_v62 = vld [vmem:[%s4401_s0 + $0x1bc] sm:$0xf] }
  0xe6   :  { %v1642_v11 = vpop.f32.mrf.mxu3  ;;  %v1546_v12 = vpop.f32.mrf.mxu1 }
  0xe7   :  { %v1643_v13 = vadd.f32 %v1642_v11, %v1594_v9  ;;  %v1547_v16 = vadd.f32 %v1546_v12, %v1498_v8  ;;  %v2412_v11 = vor.u32 %v3059_v0, %v2409_v1  ;;  %v2416_v12 = vor.u32 %v3066_v2, %v2415_v25  ;;  %v3189_v1 = vld [vmem:[%s4399_s1 + $0x280] sm:$0xff] }
  0xe8   :  { %v1693_v17 = vpop.f32.mrf.mxu0  ;;  %v3197_v25 = vld [vmem:[%s4399_s1 + $0x2c0] sm:$0xff]  ;;  %1973 = vmatpush.bf16.msrb.mxu2 %v3189_v1 }
  0xe9   :  { %v3907_v23 = vadd.f32 %v1691_v4, %v1643_v13  ;;  %v2417_v4 = vld [vmem:[%s4401_s0 + $0x1ec] sm:$0xf0]  ;;  %2022 = vmatpush.bf16.msrb.mxu3 %v3197_v25 }
  0xec   :  { %v1595_v33 = vpop.f32.mrf.mxu2 }
  0xed   :  { %v1596_v35 = vadd.f32 %v1595_v33, %v1547_v16  ;;  %v2420_v16 = vor.u32 %v3060_v62, %v2417_v4 }
  0xee   :  { %v1644_v36 = vpop.f32.mrf.mxu3  ;;  %v1549_v40 = vpop.f32.mrf.mxu1 }
  0xef   :  { %v1645_v44 = vadd.f32 %v1644_v36, %v1596_v35  ;;  %v1550_v45 = vadd.f32 %v1549_v40, %v1501_v34  ;;  %v3182_v35 = vld [vmem:[%s4399_s1 + $0x248] sm:$0xff]  ;;  %v3205_v36 = vld [vmem:[%s4399_s1 + $0x300] sm:$0xff] }
  0xf0   :  { %v1696_v46 = vpop.f32.mrf.mxu0  ;;  %1923 = vmatpush.bf16.msrb.mxu1 %v3182_v35  ;;  %2071 = vmatpush.bf16.msrb.mxu0 %v3205_v36  ;;  %v2467_v40 = vld [vmem:[%s4401_s0 + $0x220] sm:$0xf] }
  0xf1   :  { %1744 = vmatmul.bf16.gmra.mxu1 %v2360_v37  ;;  %1793 = vmatmul.bf16.gmra.mxu2 %v2364_v39  ;;  %v3929_v47 = vadd.f32 %v1693_v17, %v1645_v44  ;;  %v2424_v17 = vor.u32 %v3067_v6, %v2423_v50  ;;  %v3072_v37 = vld [vmem:[%s4401_s0 + $0x21c] sm:$0xf]  ;;  %v2461_v39 = vld [vmem:[%s4401_s0 + $0x24c] sm:$0xf0]  ;;  %v2469_v44 = vld [vmem:[%s4401_s0 + $0x254] sm:$0xf0] }
  0xf3   :  { %1842 = vmatmul.bf16.gmra.mxu3 %v2368_v41  ;;  %1891 = vmatmul.bf16.gmra.mxu0 %v2372_v43  ;;  %v3079_v41 = vld [vmem:[%s4401_s0 + $0x250] sm:$0xf0]  ;;  %v3073_v43 = vld [vmem:[%s4401_s0 + $0x224] sm:$0xf] }
  0xf4   :  { %v1598_v49 = vpop.f32.mrf.mxu2 }
  0xf5   :  { %v1599_v52 = vadd.f32 %v1598_v49, %v1550_v45  ;;  %v2475_v45 = vld [vmem:[%s4401_s0 + $0x228] sm:$0xf] }
  0xf6   :  { %v1647_v53 = vpop.f32.mrf.mxu3  ;;  %v1551_v54 = vpop.f32.mrf.mxu1 }
  0xf7   :  { %v1648_v55 = vadd.f32 %v1647_v53, %v1599_v52  ;;  %v1552_v57 = vadd.f32 %v1551_v54, %v1503_v51  ;;  %v2464_v51 = vor.u32 %v3072_v37, %v2461_v39  ;;  %v2468_v52 = vor.u32 %v3079_v41, %v2467_v40 }
  0xf8   :  { %v1698_v59 = vpop.f32.mrf.mxu0  ;;  %v2472_v54 = vor.u32 %v3073_v43, %v2469_v44 }
  0xf9   :  { %v3948_v56 = vadd.f32 %v1696_v46, %v1648_v55  ;;  %v3080_v46 = vld [vmem:[%s4401_s0 + $0x258] sm:$0xf0] }
  0xfa   :  { %v2476_v55 = vor.u32 %v3080_v46, %v2475_v45  ;;  %v3098_v46 = vld [vmem:[%s4401_s0 + $0x2ec] sm:$0xf] }
  0xfc   :  { %v1600_v7 = vpop.f32.mrf.mxu2 }
  0xfd   :  { %v1601_v8 = vadd.f32 %v1600_v7, %v1552_v57 }
  0xfe   :  { %v1649_v9 = vpop.f32.mrf.mxu3  ;;  %v1554_v13 = vpop.f32.mrf.mxu1 }
  0xff   :  { %v1650_v19 = vadd.f32 %v1649_v9, %v1601_v8  ;;  %v1555_v20 = vadd.f32 %v1554_v13, %v3702_v58  ;;  %v3181_v8 = vld [vmem:[%s4399_s1 + $0x240] sm:$0xff]  ;;  %v3092_v13 = vld [vmem:[%s4401_s0 + $0x2b8] sm:$0xf0] }
 0x100   :  { %v1701_v21 = vpop.f32.mrf.mxu0  ;;  %v3085_v9 = vld [vmem:[%s4401_s0 + $0x284] sm:$0xf]  ;;  %1924 = vmatpush.bf16.msrb.mxu1 %v3181_v8 }
 0x101   :  { %1749 = vmatmul.bf16.gmra.mxu1 %v2412_v11  ;;  %1798 = vmatmul.bf16.gmra.mxu2 %v2416_v12  ;;  %v3969_v61 = vadd.f32 %v1698_v59, %v1650_v19  ;;  %v2513_v11 = vld [vmem:[%s4401_s0 + $0x2b4] sm:$0xf0]  ;;  %v2527_v19 = vld [vmem:[%s4401_s0 + $0x290] sm:$0xf] }
 0x103   :  { %1847 = vmatmul.bf16.gmra.mxu3 %v2420_v16  ;;  %1896 = vmatmul.bf16.gmra.mxu0 %v2424_v17  ;;  %v3086_v16 = vld [vmem:[%s4401_s0 + $0x28c] sm:$0xf]  ;;  %v2521_v17 = vld [vmem:[%s4401_s0 + $0x2bc] sm:$0xf0] }
 0x104   :  { %v1603_v29 = vpop.f32.mrf.mxu2 }
 0x105   :  { %v1604_v18 = vadd.f32 %v1603_v29, %v1555_v20  ;;  %v3093_v20 = vld [vmem:[%s4401_s0 + $0x2c0] sm:$0xf0]  ;;  %v2516_v29 = vor.u32 %v3085_v9, %v2513_v11 }
 0x106   :  { %v1652_v58 = vpop.f32.mrf.mxu3  ;;  %v1556_v31 = vpop.f32.mrf.mxu1 }
 0x107   :  { %v1653_v32 = vadd.f32 %v1652_v58, %v1604_v18  ;;  %v1557_v33 = vadd.f32 %v1556_v31, %v3742_v10  ;;  %v2524_v31 = vor.u32 %v3086_v16, %v2521_v17  ;;  %v3009_v16 = vld [vmem:[%s4401_s0 + $0x24] sm:$0xf] }
 0x108   :  { %v1703_v34 = vpop.f32.mrf.mxu0 }
 0x109   :  { %v3990_v10 = vadd.f32 %v1701_v21, %v1653_v32  ;;  %v2528_v32 = vor.u32 %v3093_v20, %v2527_v19  ;;  %v2223_v19 = vld [vmem:[%s4401_s0 + $0x28] sm:$0xf]  ;;  %v3016_v20 = vld [vmem:[%s4401_s0 + $0x58] sm:$0xf0] }
 0x10c   :  { %v1605_v15 = vpop.f32.mrf.mxu2 }
 0x10d   :  { %v1606_v48 = vadd.f32 %v1605_v15, %v1557_v33 }
 0x10e   :  { %v1654_v49 = vpop.f32.mrf.mxu3  ;;  %v1559_v53 = vpop.f32.mrf.mxu1 }
 0x10f   :  { %v1655_v57 = vadd.f32 %v1654_v49, %v1606_v48  ;;  %v1560_v59 = vadd.f32 %v1559_v53, %v3758_v22  ;;  %v2571_v48 = vld [vmem:[%s4401_s0 + $0x2f0] sm:$0xf]  ;;  %v3105_v49 = vld [vmem:[%s4401_s0 + $0x320] sm:$0xf0]  ;;  %v3106_v53 = vld [vmem:[%s4401_s0 + $0x328] sm:$0xf0] }
 0x110   :  { %v1706_v63 = vpop.f32.mrf.mxu0 }
 0x111   :  { %1754 = vmatmul.bf16.gmra.mxu1 %v2464_v51  ;;  %1803 = vmatmul.bf16.gmra.mxu2 %v2468_v52  ;;  %v4011_v0 = vadd.f32 %v1703_v34, %v1655_v57  ;;  %v2573_v51 = vld [vmem:[%s4401_s0 + $0x324] sm:$0xf0]  ;;  %v2579_v52 = vld [vmem:[%s4401_s0 + $0x2f8] sm:$0xf] }
 0x113   :  { %1852 = vmatmul.bf16.gmra.mxu3 %v2472_v54  ;;  %1901 = vmatmul.bf16.gmra.mxu0 %v2476_v55 }
 0x114   :  { %v1608_v2 = vpop.f32.mrf.mxu2 }
 0x115   :  { %v1609_v62 = vadd.f32 %v1608_v2, %v1560_v59  ;;  %v2580_v2 = vor.u32 %v3106_v53, %v2579_v52  ;;  %v2275_v52 = vld [vmem:[%s4401_s0 + $0x90] sm:$0xf]  ;;  %v3029_v53 = vld [vmem:[%s4401_s0 + $0xc0] sm:$0xf0] }
 0x116   :  { %v1657_v22 = vpop.f32.mrf.mxu3  ;;  %v1561_v4 = vpop.f32.mrf.mxu1 }
 0x117   :  { %v1658_v50 = vadd.f32 %v1657_v22, %v1609_v62  ;;  %v1562_v6 = vadd.f32 %v1561_v4, %v3797_v38  ;;  %v2519_v38 = vld [vmem:[%s4401_s0 + $0x288] sm:$0xf] }
 0x118   :  { %v1708_v7 = vpop.f32.mrf.mxu0  ;;  %v2520_v18 = vor.u32 %v3092_v13, %v2519_v38 }
 0x119   :  { %v4029_v12 = vadd.f32 %v1706_v63, %v1658_v50  ;;  %v2572_v63 = vor.u32 %v3105_v49, %v2571_v48 }
 0x11c   :  { %v1610_v21 = vpop.f32.mrf.mxu2 }
 0x11d   :  { %v1611_v27 = vadd.f32 %v1610_v21, %v1562_v6  ;;  %v2225_v21 = vld [vmem:[%s4401_s0 + $0x5c] sm:$0xf0] }
 0x11e   :  { %v1659_v28 = vpop.f32.mrf.mxu3  ;;  %v1564_v58 = vpop.f32.mrf.mxu1 }
 0x11f   :  { %v1660_v33 = vadd.f32 %v1659_v28, %v1611_v27  ;;  %v1565_v34 = vadd.f32 %v1564_v58, %v3705_v60  ;;  %v2565_v60 = vld [vmem:[%s4401_s0 + $0x31c] sm:$0xf0]  ;;  %v2231_v27 = vld [vmem:[%s4401_s0 + $0x30] sm:$0xf]  ;;  %v3017_v28 = vld [vmem:[%s4401_s0 + $0x60] sm:$0xf0] }
 0x120   :  { %v1711_v35 = vpop.f32.mrf.mxu0  ;;  %v2568_v59 = vor.u32 %v3098_v46, %v2565_v60 }
 0x121   :  { %1759 = vmatmul.bf16.gmra.mxu1 %v2516_v29  ;;  %1808 = vmatmul.bf16.gmra.mxu2 %v2520_v18  ;;  %v4050_v36 = vadd.f32 %v1708_v7, %v1660_v33 }
 0x123   :  { %1857 = vmatmul.bf16.gmra.mxu3 %v2524_v31  ;;  %1906 = vmatmul.bf16.gmra.mxu0 %v2528_v32  ;;  %v2224_v32 = vor.u32 %v3016_v20, %v2223_v19 }
 0x124   :  { %v1613_v37 = vpop.f32.mrf.mxu2 }
 0x125   :  { %v1614_v39 = vadd.f32 %v1613_v37, %v1565_v34 }
 0x126   :  { %v1662_v40 = vpop.f32.mrf.mxu3  ;;  %v1566_v41 = vpop.f32.mrf.mxu1 }
 0x127   :  { %v1663_v43 = vadd.f32 %v1662_v40, %v1614_v39  ;;  %v1567_v44 = vadd.f32 %v1566_v41, %v3745_v14  ;;  %v3099_v14 = vld [vmem:[%s4401_s0 + $0x2f4] sm:$0xf] }
 0x128   :  { %v1713_v45 = vpop.f32.mrf.mxu0  ;;  %v2576_v25 = vor.u32 %v3099_v14, %v2573_v51  ;;  %v2269_v14 = vld [vmem:[%s4401_s0 + $0xbc] sm:$0xf0] }
 0x129   :  { %v4059_v15 = vadd.f32 %v1711_v35, %v1663_v43  ;;  %v2232_v35 = vor.u32 %v3017_v28, %v2231_v27  ;;  %v2327_v27 = vld [vmem:[%s4401_s0 + $0xf8] sm:$0xf]  ;;  %v3042_v28 = vld [vmem:[%s4401_s0 + $0x128] sm:$0xf0] }
 0x12c   :  { %v1615_v54 = vpop.f32.mrf.mxu2 }
 0x12d   :  { %v1616_v55 = vadd.f32 %v1615_v54, %v1567_v44  ;;  %v2277_v54 = vld [vmem:[%s4401_s0 + $0xc4] sm:$0xf0] }
 0x12e   :  { %v1664_v57 = vpop.f32.mrf.mxu3  ;;  %v1569_v1 = vpop.f32.mrf.mxu1 }
 0x12f   :  { %v1665_v62 = vadd.f32 %v1664_v57, %v1616_v55  ;;  %v1570_v22 = vadd.f32 %v1569_v1, %v3761_v24  ;;  %v2217_v24 = vld [vmem:[%s4401_s0 + $0x54] sm:$0xf0]  ;;  %v3030_v57 = vld [vmem:[%s4401_s0 + $0xc8] sm:$0xf0] }
 0x130   :  { %v1716_v4 = vpop.f32.mrf.mxu0  ;;  %v2220_v31 = vor.u32 %v3009_v16, %v2217_v24  ;;  %v2283_v55 = vld [vmem:[%s4401_s0 + $0x98] sm:$0xf] }
 0x131   :  { %1764 = vmatmul.bf16.gmra.mxu1 %v2568_v59  ;;  %1813 = vmatmul.bf16.gmra.mxu2 %v2572_v63  ;;  %v4080_v50 = vadd.f32 %v1713_v45, %v1665_v62 }
 0x133   :  { %1862 = vmatmul.bf16.gmra.mxu3 %v2576_v25  ;;  %1911 = vmatmul.bf16.gmra.mxu0 %v2580_v2  ;;  %v2276_v2 = vor.u32 %v3029_v53, %v2275_v52 }
 0x134   :  { %v1618_v6 = vpop.f32.mrf.mxu2 }
 0x135   :  { %v1619_v7 = vadd.f32 %v1618_v6, %v1570_v22 }
 0x136   :  { %v1667_v8 = vpop.f32.mrf.mxu3  ;;  %v1571_v9 = vpop.f32.mrf.mxu1 }
 0x137   :  { %v1668_v11 = vadd.f32 %v1667_v8, %v1619_v7  ;;  %v1572_v38 = vadd.f32 %v1571_v9, %v3800_v42  ;;  %v3010_v42 = vld [vmem:[%s4401_s0 + $0x2c] sm:$0xf] }
 0x138   :  { %v1718_v13 = vpop.f32.mrf.mxu0  ;;  %v2228_v34 = vor.u32 %v3010_v42, %v2225_v21  ;;  %v2321_v42 = vld [vmem:[%s4401_s0 + $0x124] sm:$0xf0] }
 0x139   :  { %v4089_v17 = vadd.f32 %v1716_v4, %v1668_v11  ;;  %v2284_v4 = vor.u32 %v3030_v57, %v2283_v55  ;;  %v2379_v55 = vld [vmem:[%s4401_s0 + $0x160] sm:$0xf]  ;;  %v3055_v57 = vld [vmem:[%s4401_s0 + $0x190] sm:$0xf0] }
 0x13c   :  { %v1620_v29 = vpop.f32.mrf.mxu2 }
 0x13d   :  { %v1621_v18 = vadd.f32 %v1620_v29, %v1572_v38  ;;  %v2329_v29 = vld [vmem:[%s4401_s0 + $0x12c] sm:$0xf0] }
 0x13e   :  { %v1669_v58 = vpop.f32.mrf.mxu3  ;;  %v1730_v33 = vpop.f32.mrf.mxu1 }
 0x13f   :  { %v1670_v37 = vadd.f32 %v1669_v58, %v1621_v18  ;;  %v1731_v39 = vadd.f32 %v1730_v33, %v3822_v3  ;;  %v3022_v3 = vld [vmem:[%s4401_s0 + $0x8c] sm:$0xf]  ;;  %v2335_v18 = vld [vmem:[%s4401_s0 + $0x100] sm:$0xf]  ;;  %v3043_v58 = vld [vmem:[%s4401_s0 + $0x130] sm:$0xf0] }
 0x140   :  { %v1877_v40 = vpop.f32.mrf.mxu0  ;;  %v2272_v25 = vor.u32 %v3022_v3, %v2269_v14 }
 0x141   :  { %1925 = vmatmul.bf16.vlgmr.msrb.gmra.mxu1 %v2220_v31  ;;  %1974 = vmatmul.bf16.vlgmr.msrb.gmra.mxu2 %v2224_v32  ;;  %v4110_v41 = vadd.f32 %v1718_v13, %v1670_v37 }
 0x143   :  { %2023 = vmatmul.bf16.vlgmr.msrb.gmra.mxu3 %v2228_v34  ;;  %2997 = vmatmul.msk.bf16.vlgmr.msrb.gmra.mxu0 %vm1451_vm0, %v2232_v35  ;;  %v2328_v35 = vor.u32 %v3042_v28, %v2327_v27 }
 0x144   :  { %v1779_v43 = vpop.f32.mrf.mxu2 }
 0x145   :  { %v1780_v44 = vadd.f32 %v1779_v43, %v1731_v39 }
 0x146   :  { %v1828_v45 = vpop.f32.mrf.mxu3  ;;  %v1732_v46 = vpop.f32.mrf.mxu1 }
 0x147   :  { %v1829_v60 = vadd.f32 %v1828_v45, %v1780_v44  ;;  %v1733_v48 = vadd.f32 %v1732_v46, %v3844_v30  ;;  %v3023_v30 = vld [vmem:[%s4401_s0 + $0x94] sm:$0xf] }
 0x148   :  { %v1879_v49 = vpop.f32.mrf.mxu0  ;;  %v2280_v22 = vor.u32 %v3023_v30, %v2277_v54  ;;  %v2373_v30 = vld [vmem:[%s4401_s0 + $0x18c] sm:$0xf0] }
 0x149   :  { %v4120_v51 = vadd.f32 %v1877_v40, %v1829_v60  ;;  %v2336_v40 = vor.u32 %v3043_v58, %v2335_v18  ;;  %v2431_v18 = vld [vmem:[%s4401_s0 + $0x1c8] sm:$0xf]  ;;  %v3068_v58 = vld [vmem:[%s4401_s0 + $0x1f8] sm:$0xf0] }
 0x14c   :  { %v1781_v59 = vpop.f32.mrf.mxu2 }
 0x14d   :  { %v1782_v63 = vadd.f32 %v1781_v59, %v1733_v48  ;;  %v2381_v59 = vld [vmem:[%s4401_s0 + $0x194] sm:$0xf0] }
 0x14e   :  { %v1830_v1 = vpop.f32.mrf.mxu3  ;;  %v1735_v62 = vpop.f32.mrf.mxu1 }
 0x14f   :  { %v1831_v6 = vadd.f32 %v1830_v1, %v1782_v63  ;;  %v1736_v7 = vadd.f32 %v1735_v62, %v3863_v26  ;;  %v3035_v26 = vld [vmem:[%s4401_s0 + $0xf4] sm:$0xf]  ;;  %v2387_v63 = vld [vmem:[%s4401_s0 + $0x168] sm:$0xf]  ;;  %v3056_v1 = vld [vmem:[%s4401_s0 + $0x198] sm:$0xf0] }
 0x150   :  { %v1882_v8 = vpop.f32.mrf.mxu0  ;;  %v2324_v34 = vor.u32 %v3035_v26, %v2321_v42 }
 0x151   :  { %1930 = vmatmul.bf16.gmra.mxu1 %v2272_v25  ;;  %1979 = vmatmul.bf16.gmra.mxu2 %v2276_v2  ;;  %v4141_v9 = vadd.f32 %v1879_v49, %v1831_v6 }
 0x153   :  { %2028 = vmatmul.bf16.gmra.mxu3 %v2280_v22  ;;  %2998 = vmatmul.msk.bf16.gmra.mxu0 %vm1451_vm0, %v2284_v4  ;;  %v2380_v4 = vor.u32 %v3055_v57, %v2379_v55 }
 0x154   :  { %v1784_v11 = vpop.f32.mrf.mxu2 }
 0x155   :  { %v1785_v38 = vadd.f32 %v1784_v11, %v1736_v7 }
 0x156   :  { %v1833_v13 = vpop.f32.mrf.mxu3  ;;  %v1737_v16 = vpop.f32.mrf.mxu1 }
 0x157   :  { %v1834_v24 = vadd.f32 %v1833_v13, %v1785_v38  ;;  %v1738_v19 = vadd.f32 %v1737_v16, %v3885_v5  ;;  %v3036_v5 = vld [vmem:[%s4401_s0 + $0xfc] sm:$0xf] }
 0x158   :  { %v1884_v20 = vpop.f32.mrf.mxu0  ;;  %v2332_v39 = vor.u32 %v3036_v5, %v2329_v29  ;;  %v2425_v5 = vld [vmem:[%s4401_s0 + $0x1f4] sm:$0xf0] }
 0x159   :  { %v4151_v21 = vadd.f32 %v1882_v8, %v1834_v24  ;;  %v2388_v8 = vor.u32 %v3056_v1, %v2387_v63  ;;  %v2483_v63 = vld [vmem:[%s4401_s0 + $0x230] sm:$0xf]  ;;  %v3081_v1 = vld [vmem:[%s4401_s0 + $0x260] sm:$0xf0] }
 0x15c   :  { %v1786_v31 = vpop.f32.mrf.mxu2 }
 0x15d   :  { %v1787_v32 = vadd.f32 %v1786_v31, %v1738_v19  ;;  %v2433_v31 = vld [vmem:[%s4401_s0 + $0x1fc] sm:$0xf0] }
 0x15e   :  { %v1835_v33 = vpop.f32.mrf.mxu3  ;;  %v1740_v37 = vpop.f32.mrf.mxu1 }
 0x15f   :  { %v1836_v43 = vadd.f32 %v1835_v33, %v1787_v32  ;;  %v1741_v44 = vadd.f32 %v1740_v37, %v3907_v23  ;;  %v3048_v23 = vld [vmem:[%s4401_s0 + $0x15c] sm:$0xf]  ;;  %v2439_v32 = vld [vmem:[%s4401_s0 + $0x1d0] sm:$0xf]  ;;  %v3069_v33 = vld [vmem:[%s4401_s0 + $0x200] sm:$0xf0] }
 0x160   :  { %v1887_v45 = vpop.f32.mrf.mxu0  ;;  %v2376_v22 = vor.u32 %v3048_v23, %v2373_v30 }
 0x161   :  { %1935 = vmatmul.bf16.gmra.mxu1 %v2324_v34  ;;  %1984 = vmatmul.bf16.gmra.mxu2 %v2328_v35  ;;  %v4172_v46 = vadd.f32 %v1884_v20, %v1836_v43 }
 0x163   :  { %2033 = vmatmul.bf16.gmra.mxu3 %v2332_v39  ;;  %2999 = vmatmul.msk.bf16.gmra.mxu0 %vm1451_vm0, %v2336_v40  ;;  %v2432_v40 = vor.u32 %v3068_v58, %v2431_v18 }
 0x164   :  { %v1789_v60 = vpop.f32.mrf.mxu2 }
 0x165   :  { %v1790_v48 = vadd.f32 %v1789_v60, %v1741_v44 }
 0x166   :  { %v1838_v49 = vpop.f32.mrf.mxu3  ;;  %v1742_v3 = vpop.f32.mrf.mxu1 }
 0x167   :  { %v1839_v14 = vadd.f32 %v1838_v49, %v1790_v48  ;;  %v1743_v52 = vadd.f32 %v1742_v3, %v3929_v47  ;;  %v3049_v47 = vld [vmem:[%s4401_s0 + $0x164] sm:$0xf] }
 0x168   :  { %v1889_v53 = vpop.f32.mrf.mxu0  ;;  %v2384_v7 = vor.u32 %v3049_v47, %v2381_v59  ;;  %v2477_v47 = vld [vmem:[%s4401_s0 + $0x25c] sm:$0xf0] }
 0x169   :  { %v4182_v54 = vadd.f32 %v1887_v45, %v1839_v14  ;;  %v2440_v45 = vor.u32 %v3069_v33, %v2439_v32  ;;  %v2535_v32 = vld [vmem:[%s4401_s0 + $0x298] sm:$0xf]  ;;  %v3094_v33 = vld [vmem:[%s4401_s0 + $0x2c8] sm:$0xf0] }
 0x16c   :  { %v1791_v25 = vpop.f32.mrf.mxu2 }
 0x16d   :  { %v1792_v2 = vadd.f32 %v1791_v25, %v1743_v52  ;;  %v2485_v25 = vld [vmem:[%s4401_s0 + $0x264] sm:$0xf0] }
 0x16e   :  { %v1840_v62 = vpop.f32.mrf.mxu3  ;;  %v1745_v6 = vpop.f32.mrf.mxu1 }
 0x16f   :  { %v1841_v11 = vadd.f32 %v1840_v62, %v1792_v2  ;;  %v1746_v38 = vadd.f32 %v1745_v6, %v3948_v56  ;;  %v3061_v56 = vld [vmem:[%s4401_s0 + $0x1c4] sm:$0xf]  ;;  %v2491_v2 = vld [vmem:[%s4401_s0 + $0x238] sm:$0xf]  ;;  %v3082_v62 = vld [vmem:[%s4401_s0 + $0x268] sm:$0xf0] }
 0x170   :  { %v1892_v13 = vpop.f32.mrf.mxu0  ;;  %v2428_v39 = vor.u32 %v3061_v56, %v2425_v5 }
 0x171   :  { %1940 = vmatmul.bf16.gmra.mxu1 %v2376_v22  ;;  %1989 = vmatmul.bf16.gmra.mxu2 %v2380_v4  ;;  %v4203_v16 = vadd.f32 %v1889_v53, %v1841_v11 }
 0x173   :  { %2038 = vmatmul.bf16.gmra.mxu3 %v2384_v7  ;;  %3000 = vmatmul.msk.bf16.gmra.mxu0 %vm1451_vm0, %v2388_v8  ;;  %v2484_v8 = vor.u32 %v3081_v1, %v2483_v63 }
 0x174   :  { %v1794_v24 = vpop.f32.mrf.mxu2 }
 0x175   :  { %v1795_v19 = vadd.f32 %v1794_v24, %v1746_v38 }
 0x176   :  { %v1843_v20 = vpop.f32.mrf.mxu3  ;;  %v1747_v26 = vpop.f32.mrf.mxu1 }
 0x177   :  { %v1844_v42 = vadd.f32 %v1843_v20, %v1795_v19  ;;  %v1748_v27 = vadd.f32 %v1747_v26, %v3969_v61  ;;  %v3062_v61 = vld [vmem:[%s4401_s0 + $0x1cc] sm:$0xf] }
 0x178   :  { %v1894_v28 = vpop.f32.mrf.mxu0  ;;  %v2436_v44 = vor.u32 %v3062_v61, %v2433_v31  ;;  %v2529_v61 = vld [vmem:[%s4401_s0 + $0x2c4] sm:$0xf0] }
 0x179   :  { %v4213_v29 = vadd.f32 %v1892_v13, %v1844_v42  ;;  %v2492_v13 = vor.u32 %v3082_v62, %v2491_v2  ;;  %v2587_v2 = vld [vmem:[%s4401_s0 + $0x300] sm:$0xf]  ;;  %v3107_v62 = vld [vmem:[%s4401_s0 + $0x330] sm:$0xf0] }
 0x17c   :  { %v1796_v34 = vpop.f32.mrf.mxu2 }
 0x17d   :  { %v1797_v35 = vadd.f32 %v1796_v34, %v1748_v27  ;;  %v2537_v34 = vld [vmem:[%s4401_s0 + $0x2cc] sm:$0xf0] }
 0x17e   :  { %v1845_v37 = vpop.f32.mrf.mxu3  ;;  %v1750_v43 = vpop.f32.mrf.mxu1 }
 0x17f   :  { %v1846_v60 = vadd.f32 %v1845_v37, %v1797_v35  ;;  %v1751_v48 = vadd.f32 %v1750_v43, %v3990_v10  ;;  %v3074_v10 = vld [vmem:[%s4401_s0 + $0x22c] sm:$0xf]  ;;  %v2543_v35 = vld [vmem:[%s4401_s0 + $0x2a0] sm:$0xf]  ;;  %v3095_v37 = vld [vmem:[%s4401_s0 + $0x2d0] sm:$0xf0] }
 0x180   :  { %v1897_v49 = vpop.f32.mrf.mxu0  ;;  %v2480_v7 = vor.u32 %v3074_v10, %v2477_v47 }
 0x181   :  { %1945 = vmatmul.bf16.gmra.mxu1 %v2428_v39  ;;  %1994 = vmatmul.bf16.gmra.mxu2 %v2432_v40  ;;  %v4234_v3 = vadd.f32 %v1894_v28, %v1846_v60 }
 0x183   :  { %2043 = vmatmul.bf16.gmra.mxu3 %v2436_v44  ;;  %3001 = vmatmul.msk.bf16.gmra.mxu0 %vm1451_vm0, %v2440_v45  ;;  %v2536_v45 = vor.u32 %v3094_v33, %v2535_v32 }
 0x184   :  { %v1799_v14 = vpop.f32.mrf.mxu2 }
 0x185   :  { %v1800_v52 = vadd.f32 %v1799_v14, %v1751_v48 }
 0x186   :  { %v1848_v53 = vpop.f32.mrf.mxu3  ;;  %v1752_v23 = vpop.f32.mrf.mxu1 }
 0x187   :  { %v1849_v30 = vadd.f32 %v1848_v53, %v1800_v52  ;;  %v1753_v55 = vadd.f32 %v1752_v23, %v4011_v0  ;;  %v3075_v0 = vld [vmem:[%s4401_s0 + $0x234] sm:$0xf] }
 0x188   :  { %v1899_v57 = vpop.f32.mrf.mxu0  ;;  %v2488_v38 = vor.u32 %v3075_v0, %v2485_v25  ;;  %v2581_v0 = vld [vmem:[%s4401_s0 + $0x32c] sm:$0xf0] }
 0x189   :  { %v4244_v59 = vadd.f32 %v1897_v49, %v1849_v30  ;;  %v2544_v49 = vor.u32 %v3095_v37, %v2543_v35 }
 0x18c   :  { %v1801_v22 = vpop.f32.mrf.mxu2 }
 0x18d   :  { %v1802_v4 = vadd.f32 %v1801_v22, %v1753_v55  ;;  %v2589_v22 = vld [vmem:[%s4401_s0 + $0x334] sm:$0xf0] }
 0x18e   :  { %v1850_v6 = vpop.f32.mrf.mxu3  ;;  %v1755_v11 = vpop.f32.mrf.mxu1 }
 0x18f   :  { %v1851_v24 = vadd.f32 %v1850_v6, %v1802_v4  ;;  %v1756_v19 = vadd.f32 %v1755_v11, %v4029_v12  ;;  %v3087_v12 = vld [vmem:[%s4401_s0 + $0x294] sm:$0xf]  ;;  %v2595_v4 = vld [vmem:[%s4401_s0 + $0x308] sm:$0xf]  ;;  %v3108_v6 = vld [vmem:[%s4401_s0 + $0x338] sm:$0xf0] }
 0x190   :  { %v1902_v20 = vpop.f32.mrf.mxu0  ;;  %v2532_v44 = vor.u32 %v3087_v12, %v2529_v61 }
 0x191   :  { %1950 = vmatmul.bf16.gmra.mxu1 %v2480_v7  ;;  %1999 = vmatmul.bf16.gmra.mxu2 %v2484_v8  ;;  %v4265_v26 = vadd.f32 %v1899_v57, %v1851_v24 }
 0x193   :  { %2048 = vmatmul.bf16.gmra.mxu3 %v2488_v38  ;;  %3002 = vmatmul.msk.bf16.gmra.mxu0 %vm1451_vm0, %v2492_v13  ;;  %v2588_v13 = vor.u32 %v3107_v62, %v2587_v2 }
 0x194   :  { %v1804_v42 = vpop.f32.mrf.mxu2 }
 0x195   :  { %v1805_v27 = vadd.f32 %v1804_v42, %v1756_v19 }
 0x196   :  { %v1853_v28 = vpop.f32.mrf.mxu3  ;;  %v1757_v56 = vpop.f32.mrf.mxu1 }
 0x197   :  { %v1854_v5 = vadd.f32 %v1853_v28, %v1805_v27  ;;  %v1758_v18 = vadd.f32 %v1757_v56, %v4050_v36  ;;  %v3088_v36 = vld [vmem:[%s4401_s0 + $0x29c] sm:$0xf] }
 0x198   :  { %v1904_v58 = vpop.f32.mrf.mxu0  ;;  %v2540_v48 = vor.u32 %v3088_v36, %v2537_v34 }
 0x199   :  { %v4275_v31 = vadd.f32 %v1902_v20, %v1854_v5  ;;  %v2596_v20 = vor.u32 %v3108_v6, %v2595_v4 }
 0x19c   :  { %v1806_v39 = vpop.f32.mrf.mxu2 }
 0x19d   :  { %v1807_v40 = vadd.f32 %v1806_v39, %v1758_v18 }
 0x19e   :  { %v1855_v43 = vpop.f32.mrf.mxu3  ;;  %v1760_v60 = vpop.f32.mrf.mxu1 }
 0x19f   :  { %v1856_v14 = vadd.f32 %v1855_v43, %v1807_v40  ;;  %v1761_v52 = vadd.f32 %v1760_v60, %v4059_v15  ;;  %v3100_v15 = vld [vmem:[%s4401_s0 + $0x2fc] sm:$0xf] }
 0x1a0   :  { %v1907_v53 = vpop.f32.mrf.mxu0  ;;  %v2584_v38 = vor.u32 %v3100_v15, %v2581_v0 }
 0x1a1   :  { %1955 = vmatmul.bf16.gmra.mxu1 %v2532_v44  ;;  %2004 = vmatmul.bf16.gmra.mxu2 %v2536_v45  ;;  %v4296_v23 = vadd.f32 %v1904_v58, %v1856_v14 }
 0x1a3   :  { %2053 = vmatmul.bf16.gmra.mxu3 %v2540_v48  ;;  %3003 = vmatmul.msk.bf16.gmra.mxu0 %vm1451_vm0, %v2544_v49 }
 0x1a4   :  { %v1809_v30 = vpop.f32.mrf.mxu2 }
 0x1a5   :  { %v1810_v55 = vadd.f32 %v1809_v30, %v1761_v52 }
 0x1a6   :  { %v1858_v57 = vpop.f32.mrf.mxu3  ;;  %v1762_v10 = vpop.f32.mrf.mxu1 }
 0x1a7   :  { %v1859_v47 = vadd.f32 %v1858_v57, %v1810_v55  ;;  %v1763_v63 = vadd.f32 %v1762_v10, %v4080_v50  ;;  %v3101_v50 = vld [vmem:[%s4401_s0 + $0x304] sm:$0xf] }
 0x1a8   :  { %v1909_v1 = vpop.f32.mrf.mxu0  ;;  %v2592_v19 = vor.u32 %v3101_v50, %v2589_v22 }
 0x1a9   :  { %v4306_v25 = vadd.f32 %v1907_v53, %v1859_v47 }
 0x1ac   :  { %v1811_v7 = vpop.f32.mrf.mxu2 }
 0x1ad   :  { %v1812_v8 = vadd.f32 %v1811_v7, %v1763_v63 }
 0x1ae   :  { %v1860_v11 = vpop.f32.mrf.mxu3  ;;  %v1765_v24 = vpop.f32.mrf.mxu1 }
 0x1af   :  { %v1861_v42 = vadd.f32 %v1860_v11, %v1812_v8  ;;  %v1766_v27 = vadd.f32 %v1765_v24, %v4089_v17 }
 0x1b0   :  { %v1912_v28 = vpop.f32.mrf.mxu0 }
 0x1b1   :  { %1960 = vmatmul.bf16.gmra.mxu1 %v2584_v38  ;;  %2009 = vmatmul.bf16.gmra.mxu2 %v2588_v13  ;;  %v4327_v56 = vadd.f32 %v1909_v1, %v1861_v42 }
 0x1b3   :  { %2058 = vmatmul.bf16.gmra.mxu3 %v2592_v19  ;;  %3004 = vmatmul.msk.bf16.gmra.mxu0 %vm1451_vm0, %v2596_v20 }
 0x1b4   :  { %v1814_v5 = vpop.f32.mrf.mxu2 }
 0x1b5   :  { %v1815_v18 = vadd.f32 %v1814_v5, %v1766_v27 }
 0x1b6   :  { %v1863_v58 = vpop.f32.mrf.mxu3  ;;  %v1767_v12 = vpop.f32.mrf.mxu1 }
 0x1b7   :  { %v1864_v61 = vadd.f32 %v1863_v58, %v1815_v18  ;;  %v1768_v32 = vadd.f32 %v1767_v12, %v4110_v41 }
 0x1b8   :  { %v1914_v33 = vpop.f32.mrf.mxu0 }
 0x1b9   :  { %v4331_v36 = vadd.f32 %v1912_v28, %v1864_v61 }
 0x1bc   :  { %v1816_v34 = vpop.f32.mrf.mxu2 }
 0x1bd   :  { %v1817_v17 = vadd.f32 %v1816_v34, %v1768_v32 }
 0x1be   :  { %v1865_v35 = vpop.f32.mrf.mxu3  ;;  %v1926_v37 = vpop.f32.mrf.mxu1 }
 0x1bf   :  { %v1866_v39 = vadd.f32 %v1865_v35, %v1817_v17  ;;  %v1927_v44 = vadd.f32 %v1926_v37, %v4120_v51 }
 0x1c0   :  { %v2073_v40 = vpop.f32.mrf.mxu0 }
 0x1c1   :  { %v4333_v43 = vadd.f32 %v1914_v33, %v1866_v39 }
 0x1c4   :  { %v1975_v45 = vpop.f32.mrf.mxu2 }
 0x1c5   :  { %v1976_v60 = vadd.f32 %v1975_v45, %v1927_v44 }
 0x1c6   :  { %v2024_v48 = vpop.f32.mrf.mxu3  ;;  %v1928_v49 = vpop.f32.mrf.mxu1 }
 0x1c7   :  { %v2025_v14 = vadd.f32 %v2024_v48, %v1976_v60  ;;  %v1929_v30 = vadd.f32 %v1928_v49, %v4141_v9 }
 0x1c8   :  { %v2075_v52 = vpop.f32.mrf.mxu0 }
 0x1c9   :  { %v2074_v41 = vadd.f32 %v2073_v40, %v2025_v14 }
 0x1cb   :  { %vm2113_vm1 = vcmp.ge.f32.partialorder %v2074_v41, 0.0  ;;  %v2129_v53 = vmul.f32 0.1, %v2074_v41 }
 0x1cc   :  { %v1977_v55 = vpop.f32.mrf.mxu2 }
 0x1cd   :  { %v2145_v57 = vsel %vm2113_vm1, %v2074_v41, %v2129_v53  ;;  %v1978_v10 = vadd.f32 %v1977_v55, %v1929_v30 }
 0x1ce   :  { %v2026_v47 = vpop.f32.mrf.mxu3  ;;  %2161 = vst [vmem:[%s4402_s3] sm:$0xff] %v2145_v57  ;;  %v1931_v51 = vpop.f32.mrf.mxu1 }
 0x1cf   :  { %v2027_v63 = vadd.f32 %v2026_v47, %v1978_v10  ;;  %v1932_v2 = vadd.f32 %v1931_v51, %v4151_v21 }
 0x1d0   :  { %v2078_v1 = vpop.f32.mrf.mxu0 }
 0x1d1   :  { %v2076_v15 = vadd.f32 %v2075_v52, %v2027_v63 }
 0x1d3   :  { %vm2114_vm2 = vcmp.ge.f32.partialorder %v2076_v15, 0.0  ;;  %v2130_v0 = vmul.f32 0.1, %v2076_v15 }
 0x1d4   :  { %v1980_v62 = vpop.f32.mrf.mxu2 }
 0x1d5   :  { %v2146_v50 = vsel %vm2114_vm2, %v2076_v15, %v2130_v0  ;;  %v1981_v22 = vadd.f32 %v1980_v62, %v1932_v2 }
 0x1d6   :  { %v2029_v9 = vpop.f32.mrf.mxu3  ;;  %2162 = vst [vmem:[%s4402_s3 + $0x8] sm:$0xff] %v2146_v50  ;;  %v1933_v4 = vpop.f32.mrf.mxu1 }
 0x1d7   :  { %v2030_v6 = vadd.f32 %v2029_v9, %v1981_v22  ;;  %v1934_v38 = vadd.f32 %v1933_v4, %v4172_v46 }
 0x1d8   :  { %v2080_v7 = vpop.f32.mrf.mxu0 }
 0x1d9   :  { %v2079_v8 = vadd.f32 %v2078_v1, %v2030_v6 }
 0x1db   :  { %vm2115_vm3 = vcmp.ge.f32.partialorder %v2079_v8, 0.0  ;;  %v2131_v11 = vmul.f32 0.1, %v2079_v8 }
 0x1dc   :  { %v1982_v13 = vpop.f32.mrf.mxu2 }
 0x1dd   :  { %v2147_v24 = vsel %vm2115_vm3, %v2079_v8, %v2131_v11  ;;  %v1983_v19 = vadd.f32 %v1982_v13, %v1934_v38 }
 0x1de   :  { %v2031_v21 = vpop.f32.mrf.mxu3  ;;  %2163 = vst [vmem:[%s4402_s3 + $0x10] sm:$0xff] %v2147_v24  ;;  %v1936_v20 = vpop.f32.mrf.mxu1 }
 0x1df   :  { %v2032_v42 = vadd.f32 %v2031_v21, %v1983_v19  ;;  %v1937_v18 = vadd.f32 %v1936_v20, %v4182_v54 }
 0x1e0   :  { %v2083_v27 = vpop.f32.mrf.mxu0 }
 0x1e1   :  { %v2081_v28 = vadd.f32 %v2080_v7, %v2032_v42 }
 0x1e3   :  { %vm2116_vm4 = vcmp.ge.f32.partialorder %v2081_v28, 0.0  ;;  %v2132_v5 = vmul.f32 0.1, %v2081_v28 }
 0x1e4   :  { %v1985_v58 = vpop.f32.mrf.mxu2 }
 0x1e5   :  { %v2148_v12 = vsel %vm2116_vm4, %v2081_v28, %v2132_v5  ;;  %v1986_v61 = vadd.f32 %v1985_v58, %v1937_v18 }
 0x1e6   :  { %v2034_v46 = vpop.f32.mrf.mxu3  ;;  %2164 = vst [vmem:[%s4402_s3 + $0x18] sm:$0xff] %v2148_v12  ;;  %v1938_v32 = vpop.f32.mrf.mxu1 }
 0x1e7   :  { %v2035_v33 = vadd.f32 %v2034_v46, %v1986_v61  ;;  %v1939_v37 = vadd.f32 %v1938_v32, %v4203_v16 }
 0x1e8   :  { %v2085_v34 = vpop.f32.mrf.mxu0 }
 0x1e9   :  { %v2084_v17 = vadd.f32 %v2083_v27, %v2035_v33 }
 0x1eb   :  { %vm2117_vm5 = vcmp.ge.f32.partialorder %v2084_v17, 0.0  ;;  %v2133_v35 = vmul.f32 0.1, %v2084_v17 }
 0x1ec   :  { %v1987_v39 = vpop.f32.mrf.mxu2 }
 0x1ed   :  { %v2149_v40 = vsel %vm2117_vm5, %v2084_v17, %v2133_v35  ;;  %v1988_v44 = vadd.f32 %v1987_v39, %v1939_v37 }
 0x1ee   :  { %v2036_v54 = vpop.f32.mrf.mxu3  ;;  %2165 = vst [vmem:[%s4402_s3 + $0x20] sm:$0xff] %v2149_v40  ;;  %v1941_v45 = vpop.f32.mrf.mxu1 }
 0x1ef   :  { %v2037_v60 = vadd.f32 %v2036_v54, %v1988_v44  ;;  %v1942_v52 = vadd.f32 %v1941_v45, %v4213_v29 }
 0x1f0   :  { %v2088_v48 = vpop.f32.mrf.mxu0 }
 0x1f1   :  { %v2086_v49 = vadd.f32 %v2085_v34, %v2037_v60 }
 0x1f3   :  { %vm2118_vm6 = vcmp.ge.f32.partialorder %v2086_v49, 0.0  ;;  %v2134_v14 = vmul.f32 0.1, %v2086_v49 }
 0x1f4   :  { %v1990_v41 = vpop.f32.mrf.mxu2 }
 0x1f5   :  { %v2150_v53 = vsel %vm2118_vm6, %v2086_v49, %v2134_v14  ;;  %v1991_v30 = vadd.f32 %v1990_v41, %v1942_v52 }
 0x1f6   :  { %v2039_v16 = vpop.f32.mrf.mxu3  ;;  %2166 = vst [vmem:[%s4402_s3 + $0x28] sm:$0xff] %v2150_v53  ;;  %v1943_v55 = vpop.f32.mrf.mxu1 }
 0x1f7   :  { %v2040_v57 = vadd.f32 %v2039_v16, %v1991_v30  ;;  %v1944_v63 = vadd.f32 %v1943_v55, %v4234_v3 }
 0x1f8   :  { %v2090_v10 = vpop.f32.mrf.mxu0 }
 0x1f9   :  { %v2089_v47 = vadd.f32 %v2088_v48, %v2040_v57 }
 0x1fb   :  { %vm2119_vm7 = vcmp.ge.f32.partialorder %v2089_v47, 0.0  ;;  %v2135_v51 = vmul.f32 0.1, %v2089_v47 }
 0x1fc   :  { %v1992_v1 = vpop.f32.mrf.mxu2 }
 0x1fd   :  { %v2151_v15 = vsel %vm2119_vm7, %v2089_v47, %v2135_v51  ;;  %v1993_v0 = vadd.f32 %v1992_v1, %v1944_v63 }
 0x1fe   :  { %v2041_v29 = vpop.f32.mrf.mxu3  ;;  %2167 = vst [vmem:[%s4402_s3 + $0x30] sm:$0xff] %v2151_v15  ;;  %v1946_v2 = vpop.f32.mrf.mxu1 }
 0x1ff   :  { %v2042_v62 = vadd.f32 %v2041_v29, %v1993_v0  ;;  %v1947_v4 = vadd.f32 %v1946_v2, %v4244_v59 }
 0x200   :  { %v2093_v50 = vpop.f32.mrf.mxu0 }
 0x201   :  { %v2091_v22 = vadd.f32 %v2090_v10, %v2042_v62 }
 0x203   :  { %vm2120_vm8 = vcmp.ge.f32.partialorder %v2091_v22, 0.0  ;;  %v2136_v9 = vmul.f32 0.1, %v2091_v22 }
 0x204   :  { %v1995_v6 = vpop.f32.mrf.mxu2 }
 0x205   :  { %v2152_v7 = vsel %vm2120_vm8, %v2091_v22, %v2136_v9  ;;  %v1996_v8 = vadd.f32 %v1995_v6, %v1947_v4 }
 0x206   :  { %v2044_v3 = vpop.f32.mrf.mxu3  ;;  %2168 = vst [vmem:[%s4402_s3 + $0x38] sm:$0xff] %v2152_v7  ;;  %v1948_v11 = vpop.f32.mrf.mxu1 }
 0x207   :  { %v2045_v38 = vadd.f32 %v2044_v3, %v1996_v8  ;;  %v1949_v21 = vadd.f32 %v1948_v11, %v4265_v26 }
 0x208   :  { %v2095_v13 = vpop.f32.mrf.mxu0 }
 0x209   :  { %v2094_v24 = vadd.f32 %v2093_v50, %v2045_v38 }
 0x20b   :  { %vm2121_vm9 = vcmp.ge.f32.partialorder %v2094_v24, 0.0  ;;  %v2137_v19 = vmul.f32 0.1, %v2094_v24 }
 0x20c   :  { %v1997_v20 = vpop.f32.mrf.mxu2 }
 0x20d   :  { %v2153_v42 = vsel %vm2121_vm9, %v2094_v24, %v2137_v19  ;;  %v1998_v27 = vadd.f32 %v1997_v20, %v1949_v21 }
 0x20e   :  { %v2046_v59 = vpop.f32.mrf.mxu3  ;;  %2169 = vst [vmem:[%s4402_s3 + $0x40] sm:$0xff] %v2153_v42  ;;  %v1951_v28 = vpop.f32.mrf.mxu1 }
 0x20f   :  { %v2047_v5 = vadd.f32 %v2046_v59, %v1998_v27  ;;  %v1952_v61 = vadd.f32 %v1951_v28, %v4275_v31 }
 0x210   :  { %v2098_v18 = vpop.f32.mrf.mxu0 }
 0x211   :  { %v2096_v58 = vadd.f32 %v2095_v13, %v2047_v5 }
 0x213   :  { %vm2122_vm10 = vcmp.ge.f32.partialorder %v2096_v58, 0.0  ;;  %v2138_v12 = vmul.f32 0.1, %v2096_v58 }
 0x214   :  { %v2000_v46 = vpop.f32.mrf.mxu2 }
 0x215   :  { %v2154_v32 = vsel %vm2122_vm10, %v2096_v58, %v2138_v12  ;;  %v2001_v33 = vadd.f32 %v2000_v46, %v1952_v61 }
 0x216   :  { %v2049_v26 = vpop.f32.mrf.mxu3  ;;  %2170 = vst [vmem:[%s4402_s3 + $0x48] sm:$0xff] %v2154_v32  ;;  %v1953_v34 = vpop.f32.mrf.mxu1 }
 0x217   :  { %v2050_v17 = vadd.f32 %v2049_v26, %v2001_v33  ;;  %v1954_v40 = vadd.f32 %v1953_v34, %v4296_v23 }
 0x218   :  { %v2100_v35 = vpop.f32.mrf.mxu0 }
 0x219   :  { %v2099_v37 = vadd.f32 %v2098_v18, %v2050_v17 }
 0x21b   :  { %vm2123_vm11 = vcmp.ge.f32.partialorder %v2099_v37, 0.0  ;;  %v2139_v39 = vmul.f32 0.1, %v2099_v37 }
 0x21c   :  { %v2002_v44 = vpop.f32.mrf.mxu2 }
 0x21d   :  { %v2155_v54 = vsel %vm2123_vm11, %v2099_v37, %v2139_v39  ;;  %v2003_v45 = vadd.f32 %v2002_v44, %v1954_v40 }
 0x21e   :  { %v2051_v31 = vpop.f32.mrf.mxu3  ;;  %2171 = vst [vmem:[%s4402_s3 + $0x50] sm:$0xff] %v2155_v54  ;;  %v1956_v60 = vpop.f32.mrf.mxu1 }
 0x21f   :  { %v2052_v48 = vadd.f32 %v2051_v31, %v2003_v45  ;;  %v1957_v41 = vadd.f32 %v1956_v60, %v4306_v25 }
 0x220   :  { %v2103_v14 = vpop.f32.mrf.mxu0 }
 0x221   :  { %v2101_v49 = vadd.f32 %v2100_v35, %v2052_v48 }
 0x223   :  { %vm2124_vm12 = vcmp.ge.f32.partialorder %v2101_v49, 0.0  ;;  %v2140_v52 = vmul.f32 0.1, %v2101_v49 }
 0x224   :  { %v2005_v53 = vpop.f32.mrf.mxu2 }
 0x225   :  { %v2156_v30 = vsel %vm2124_vm12, %v2101_v49, %v2140_v52  ;;  %v2006_v16 = vadd.f32 %v2005_v53, %v1957_v41 }
 0x226   :  { %v2054_v23 = vpop.f32.mrf.mxu3  ;;  %2172 = vst [vmem:[%s4402_s3 + $0x58] sm:$0xff] %v2156_v30  ;;  %v1958_v55 = vpop.f32.mrf.mxu1 }
 0x227   :  { %v2055_v57 = vadd.f32 %v2054_v23, %v2006_v16  ;;  %v1959_v51 = vadd.f32 %v1958_v55, %v4327_v56 }
 0x228   :  { %v2105_v63 = vpop.f32.mrf.mxu0 }
 0x229   :  { %v2104_v10 = vadd.f32 %v2103_v14, %v2055_v57 }
 0x22b   :  { %vm2125_vm13 = vcmp.ge.f32.partialorder %v2104_v10, 0.0  ;;  %v2141_v47 = vmul.f32 0.1, %v2104_v10 }
 0x22c   :  { %v2007_v1 = vpop.f32.mrf.mxu2 }
 0x22d   :  { %v2157_v15 = vsel %vm2125_vm13, %v2104_v10, %v2141_v47  ;;  %v2008_v0 = vadd.f32 %v2007_v1, %v1959_v51 }
 0x22e   :  { %v2056_v25 = vpop.f32.mrf.mxu3  ;;  %2173 = vst [vmem:[%s4402_s3 + $0x60] sm:$0xff] %v2157_v15  ;;  %v1961_v29 = vpop.f32.mrf.mxu1 }
 0x22f   :  { %v2057_v2 = vadd.f32 %v2056_v25, %v2008_v0  ;;  %v1962_v22 = vadd.f32 %v1961_v29, %v4331_v36 }
 0x230   :  { %v2108_v7 = vpop.f32.mrf.mxu0 }
 0x231   :  { %v2106_v62 = vadd.f32 %v2105_v63, %v2057_v2 }
 0x233   :  { %vm2126_vm14 = vcmp.ge.f32.partialorder %v2106_v62, 0.0  ;;  %v2142_v50 = vmul.f32 0.1, %v2106_v62 }
 0x234   :  { %v2010_v9 = vpop.f32.mrf.mxu2 }
 0x235   :  { %v2158_v4 = vsel %vm2126_vm14, %v2106_v62, %v2142_v50  ;;  %v2011_v6 = vadd.f32 %v2010_v9, %v1962_v22 }
 0x236   :  { %v2059_v56 = vpop.f32.mrf.mxu3  ;;  %2174 = vst [vmem:[%s4402_s3 + $0x68] sm:$0xff] %v2158_v4  ;;  %v1963_v3 = vpop.f32.mrf.mxu1 }
 0x237   :  { %v2060_v8 = vadd.f32 %v2059_v56, %v2011_v6  ;;  %v1964_v13 = vadd.f32 %v1963_v3, %v4333_v43 }
 0x238   :  { %v2110_v42 = vpop.f32.mrf.mxu0 }
 0x239   :  { %v2109_v11 = vadd.f32 %v2108_v7, %v2060_v8 }
 0x23b   :  { %vm2127_vm15 = vcmp.ge.f32.partialorder %v2109_v11, 0.0  ;;  %v2143_v38 = vmul.f32 0.1, %v2109_v11 }
 0x23c   :  { %v2012_v24 = vpop.f32.mrf.mxu2 }
 0x23d   :  { %v2159_v19 = vsel %vm2127_vm15, %v2109_v11, %v2143_v38  ;;  %v2013_v21 = vadd.f32 %v2012_v24, %v1964_v13 }
 0x23e   :  { %2175 = vst [vmem:[%s4402_s3 + $0x70] sm:$0xff] %v2159_v19  ;;  %v2061_v36 = vpop.f32.mrf.mxu3 }
 0x23f   :  { %v2062_v20 = vadd.f32 %v2061_v36, %v2013_v21 }
 0x241   :  { %v2111_v27 = vadd.f32 %v2110_v42, %v2062_v20 }
 0x243   :  { %vm2128_vm0 = vcmp.ge.f32.partialorder %v2111_v27, 0.0  ;;  %v2144_v59 = vmul.f32 0.1, %v2111_v27 }
 0x245   :  { %v2160_v28 = vsel %vm2128_vm0, %v2111_v27, %v2144_v59 }
 0x246   :  { %2176 = vst [vmem:[%s4402_s3 + $0x78] sm:$0xff] %v2160_v28 }

// kernel: hour_glass_prop_forward.7
= control target key start
LH: loop header
LB: loop body
LE: loop exit
PB: predicated region body
PF: predicated region fallthrough
CT: control target
= control target key end

     0   :  { %s3295_s1 = inlined_call_operand.vmem [shape: bf16[1152,256], index: 1, kind: input, shape index: {}]   ;;  %s3296_s0 = inlined_call_operand.vmem [shape: bf16[32,1152], index: 0, kind: input, shape index: {}]   ;;  %s3297_s2 = inlined_call_operand.vmem [shape: f32[1,256], index: 2, kind: input, shape index: {}]   ;;  %s3298_s3 = inlined_call_operand.vmem [shape: f32[32,256], index: 3, kind: output, shape index: {}]  }
   0x1   :  { %v1504_v0 = vld [vmem:[%s3295_s1 + $0x70] sm:$0xf]  ;;  %v2055_v1 = vld [vmem:[%s3295_s1 + $0x74] sm:$0xf0]  ;;  %v1496_v11 = vld [vmem:[%s3295_s1 + $0x60] sm:$0xf] }
   0x2   :  { %v1568_v2 = vld [vmem:[%s3295_s1 + $0xf0] sm:$0xf]  ;;  %v1505_v3 = vor.u32 %v2055_v1, %v1504_v0  ;;  %v2071_v4 = vld [vmem:[%s3295_s1 + $0xf4] sm:$0xf0]  ;;  %v2053_v13 = vld [vmem:[%s3295_s1 + $0x64] sm:$0xf0] }
   0x3   :  { %v1632_v5 = vld [vmem:[%s3295_s1 + $0x170] sm:$0xf]  ;;  %v2087_v6 = vld [vmem:[%s3295_s1 + $0x174] sm:$0xf0]  ;;  %v1569_v7 = vor.u32 %v2071_v4, %v1568_v2  ;;  %v1560_v14 = vld [vmem:[%s3295_s1 + $0xe0] sm:$0xf]  ;;  %v1497_v16 = vor.u32 %v2053_v13, %v1496_v11 }
   0x4   :  { %v1633_v8 = vor.u32 %v2087_v6, %v1632_v5  ;;  %v1696_v9 = vld [vmem:[%s3295_s1 + $0x1f0] sm:$0xf]  ;;  %v2103_v10 = vld [vmem:[%s3295_s1 + $0x1f4] sm:$0xf0]  ;;  %996 = vmatpush.bf16.msra.mxu0 %v1505_v3  ;;  %v2069_v15 = vld [vmem:[%s3295_s1 + $0xe4] sm:$0xf0] }
   0x5   :  { %v1697_v12 = vor.u32 %v2103_v10, %v1696_v9  ;;  %1015 = vmatpush.bf16.msra.mxu1 %v1569_v7  ;;  %v1561_v17 = vor.u32 %v2069_v15, %v1560_v14  ;;  %v1624_v18 = vld [vmem:[%s3295_s1 + $0x160] sm:$0xf]  ;;  %v2085_v19 = vld [vmem:[%s3295_s1 + $0x164] sm:$0xf0]  ;;  %v1488_v23 = vld [vmem:[%s3295_s1 + $0x50] sm:$0xf] }
   0x6   :  { %1034 = vmatpush.bf16.msra.mxu2 %v1633_v8  ;;  %v1688_v20 = vld [vmem:[%s3295_s1 + $0x1e0] sm:$0xf]  ;;  %v1625_v21 = vor.u32 %v2085_v19, %v1624_v18  ;;  %v2101_v22 = vld [vmem:[%s3295_s1 + $0x1e4] sm:$0xf0]  ;;  %v2051_v24 = vld [vmem:[%s3295_s1 + $0x54] sm:$0xf0] }
   0x7   :  { %1053 = vmatpush.bf16.msra.mxu3 %v1697_v12  ;;  %v1689_v25 = vor.u32 %v2101_v22, %v1688_v20  ;;  %v1552_v26 = vld [vmem:[%s3295_s1 + $0xd0] sm:$0xf]  ;;  %v2067_v27 = vld [vmem:[%s3295_s1 + $0xd4] sm:$0xf0]  ;;  %v1489_v29 = vor.u32 %v2051_v24, %v1488_v23  ;;  %v1480_v35 = vld [vmem:[%s3295_s1 + $0x40] sm:$0xf] }
   0x8   :  { %v1616_v28 = vld [vmem:[%s3295_s1 + $0x150] sm:$0xf]  ;;  %997 = vmatpush.bf16.msra.mxu0 %v1497_v16  ;;  %v2083_v30 = vld [vmem:[%s3295_s1 + $0x154] sm:$0xf0]  ;;  %v1553_v33 = vor.u32 %v2067_v27, %v1552_v26  ;;  %v2049_v36 = vld [vmem:[%s3295_s1 + $0x44] sm:$0xf0] }
   0x9   :  { %v1680_v31 = vld [vmem:[%s3295_s1 + $0x1d0] sm:$0xf]  ;;  %v2099_v32 = vld [vmem:[%s3295_s1 + $0x1d4] sm:$0xf0]  ;;  %1016 = vmatpush.bf16.msra.mxu1 %v1561_v17  ;;  %v1617_v34 = vor.u32 %v2083_v30, %v1616_v28  ;;  %v1544_v37 = vld [vmem:[%s3295_s1 + $0xc0] sm:$0xf]  ;;  %v1481_v44 = vor.u32 %v2049_v36, %v1480_v35 }
   0xa   :  { %1035 = vmatpush.bf16.msra.mxu2 %v1625_v21  ;;  %v1681_v38 = vor.u32 %v2099_v32, %v1680_v31  ;;  %v2065_v39 = vld [vmem:[%s3295_s1 + $0xc4] sm:$0xf0]  ;;  %v1608_v40 = vld [vmem:[%s3295_s1 + $0x140] sm:$0xf]  ;;  %v1472_v47 = vld [vmem:[%s3295_s1 + $0x30] sm:$0xf] }
   0xb   :  { %1054 = vmatpush.bf16.msra.mxu3 %v1689_v25  ;;  %v2081_v41 = vld [vmem:[%s3295_s1 + $0x144] sm:$0xf0]  ;;  %v1672_v42 = vld [vmem:[%s3295_s1 + $0x1c0] sm:$0xf]  ;;  %v1545_v45 = vor.u32 %v2065_v39, %v1544_v37  ;;  %v2047_v48 = vld [vmem:[%s3295_s1 + $0x34] sm:$0xf0] }
   0xc   :  { %v2097_v43 = vld [vmem:[%s3295_s1 + $0x1c4] sm:$0xf0]  ;;  %998 = vmatpush.bf16.msra.mxu0 %v1489_v29  ;;  %v1609_v46 = vor.u32 %v2081_v41, %v1608_v40  ;;  %v1536_v49 = vld [vmem:[%s3295_s1 + $0xb0] sm:$0xf]  ;;  %v2063_v51 = vld [vmem:[%s3295_s1 + $0xb4] sm:$0xf0]  ;;  %v1473_v56 = vor.u32 %v2047_v48, %v1472_v47 }
   0xd   :  { %1017 = vmatpush.bf16.msra.mxu1 %v1553_v33  ;;  %v1673_v50 = vor.u32 %v2097_v43, %v1672_v42  ;;  %v1600_v52 = vld [vmem:[%s3295_s1 + $0x130] sm:$0xf]  ;;  %v2079_v53 = vld [vmem:[%s3295_s1 + $0x134] sm:$0xf0]  ;;  %v1537_v57 = vor.u32 %v2063_v51, %v1536_v49  ;;  %v1464_v59 = vld [vmem:[%s3295_s1 + $0x20] sm:$0xf] }
   0xe   :  { %1036 = vmatpush.bf16.msra.mxu2 %v1617_v34  ;;  %v1664_v54 = vld [vmem:[%s3295_s1 + $0x1b0] sm:$0xf]  ;;  %v2095_v55 = vld [vmem:[%s3295_s1 + $0x1b4] sm:$0xf0]  ;;  %v1601_v58 = vor.u32 %v2079_v53, %v1600_v52  ;;  %v2045_v60 = vld [vmem:[%s3295_s1 + $0x24] sm:$0xf0] }
   0xf   :  { %1055 = vmatpush.bf16.msra.mxu3 %v1681_v38  ;;  %v1528_v61 = vld [vmem:[%s3295_s1 + $0xa0] sm:$0xf]  ;;  %v1665_v62 = vor.u32 %v2095_v55, %v1664_v54  ;;  %v2061_v63 = vld [vmem:[%s3295_s1 + $0xa4] sm:$0xf0]  ;;  %v1465_v4 = vor.u32 %v2045_v60, %v1464_v59  ;;  %v1456_v7 = vld [vmem:[%s3295_s1 + $0x10] sm:$0xf] }
  0x10   :  { %999 = vmatpush.bf16.msra.mxu0 %v1481_v44  ;;  %v1592_v0 = vld [vmem:[%s3295_s1 + $0x120] sm:$0xf]  ;;  %v2077_v1 = vld [vmem:[%s3295_s1 + $0x124] sm:$0xf0]  ;;  %v1529_v5 = vor.u32 %v2061_v63, %v1528_v61  ;;  %v2043_v8 = vld [vmem:[%s3295_s1 + $0x14] sm:$0xf0] }
  0x11   :  { %1018 = vmatpush.bf16.msra.mxu1 %v1545_v45  ;;  %v1656_v2 = vld [vmem:[%s3295_s1 + $0x1a0] sm:$0xf]  ;;  %v2093_v3 = vld [vmem:[%s3295_s1 + $0x1a4] sm:$0xf0]  ;;  %v1593_v6 = vor.u32 %v2077_v1, %v1592_v0  ;;  %v1520_v9 = vld [vmem:[%s3295_s1 + $0x90] sm:$0xf]  ;;  %v1457_v17 = vor.u32 %v2043_v8, %v1456_v7 }
  0x12   :  { %1037 = vmatpush.bf16.msra.mxu2 %v1609_v46  ;;  %v1657_v10 = vor.u32 %v2093_v3, %v1656_v2  ;;  %v2059_v11 = vld [vmem:[%s3295_s1 + $0x94] sm:$0xf0]  ;;  %v1584_v12 = vld [vmem:[%s3295_s1 + $0x110] sm:$0xf]  ;;  %v1448_v16 = vld [vmem:[%s3295_s1] sm:$0xf] }
  0x13   :  { %1056 = vmatpush.bf16.msra.mxu3 %v1673_v50  ;;  %v2075_v13 = vld [vmem:[%s3295_s1 + $0x114] sm:$0xf0]  ;;  %v1648_v14 = vld [vmem:[%s3295_s1 + $0x190] sm:$0xf]  ;;  %v2041_v18 = vld [vmem:[%s3295_s1 + $0x4] sm:$0xf0]  ;;  %v1521_v21 = vor.u32 %v2059_v11, %v1520_v9 }
  0x14   :  { %1000 = vmatpush.bf16.msra.mxu0 %v1473_v56  ;;  %v2091_v15 = vld [vmem:[%s3295_s1 + $0x194] sm:$0xf0]  ;;  %v1512_v19 = vld [vmem:[%s3295_s1 + $0x80] sm:$0xf]  ;;  %v2057_v20 = vld [vmem:[%s3295_s1 + $0x84] sm:$0xf0]  ;;  %v1585_v22 = vor.u32 %v2075_v13, %v1584_v12  ;;  %v1449_v34 = vor.u32 %v2041_v18, %v1448_v16 }
  0x15   :  { %1019 = vmatpush.bf16.msra.mxu1 %v1537_v57  ;;  %v1576_v23 = vld [vmem:[%s3295_s1 + $0x100] sm:$0xf]  ;;  %v2073_v24 = vld [vmem:[%s3295_s1 + $0x104] sm:$0xf0]  ;;  %v1649_v26 = vor.u32 %v2091_v15, %v1648_v14  ;;  %v2026_v29 = vld [vmem:[%s3296_s0 + $0x20] sm:$0xf0]  ;;  %v1513_v38 = vor.u32 %v2057_v20, %v1512_v19 }
  0x16   :  { %1038 = vmatpush.bf16.msra.mxu2 %v1601_v58  ;;  %v1640_v25 = vld [vmem:[%s3295_s1 + $0x180] sm:$0xf]  ;;  %v2089_v27 = vld [vmem:[%s3295_s1 + $0x184] sm:$0xf0]  ;;  %v2022_v30 = vld [vmem:[%s3296_s0 + $0x4] sm:$0xf]  ;;  %v1577_v39 = vor.u32 %v2073_v24, %v1576_v23 }
  0x17   :  { %1057 = vmatpush.bf16.msra.mxu3 %v1665_v62  ;;  %v1376_v28 = vld [vmem:[%s3296_s0] sm:$0xf]  ;;  %v1378_v31 = vld [vmem:[%s3296_s0 + $0x24] sm:$0xf0]  ;;  %v1888_v32 = vld [vmem:[%s3295_s1 + $0x370] sm:$0xf]  ;;  %v1641_v43 = vor.u32 %v2089_v27, %v1640_v25 }
  0x18   :  { %1001 = vmatpush.bf16.msra.mxu0 %v1465_v4  ;;  %v2151_v33 = vld [vmem:[%s3295_s1 + $0x374] sm:$0xf0]  ;;  %v1384_v35 = vld [vmem:[%s3296_s0 + $0x8] sm:$0xf]  ;;  %v1824_v36 = vld [vmem:[%s3295_s1 + $0x2f0] sm:$0xf]  ;;  %v2457_v48 = vor.u32 %v2026_v29, %v1376_v28  ;;  %v2468_v53 = vor.u32 %v2022_v30, %v1378_v31 }
  0x19   :  { %1020 = vmatpush.bf16.msra.mxu1 %v1529_v5  ;;  %v2135_v37 = vld [vmem:[%s3295_s1 + $0x2f4] sm:$0xf0]  ;;  %v2027_v40 = vld [vmem:[%s3296_s0 + $0x28] sm:$0xf0]  ;;  %v1386_v42 = vld [vmem:[%s3296_s0 + $0x2c] sm:$0xf0]  ;;  %v1889_v44 = vor.u32 %v2151_v33, %v1888_v32 }
  0x1a   :  { %1039 = vmatpush.bf16.msra.mxu2 %v1593_v6  ;;  %v2023_v41 = vld [vmem:[%s3296_s0 + $0xc] sm:$0xf]  ;;  %v1760_v45 = vld [vmem:[%s3295_s1 + $0x270] sm:$0xf]  ;;  %v2119_v46 = vld [vmem:[%s3295_s1 + $0x274] sm:$0xf0]  ;;  %v1825_v49 = vor.u32 %v2135_v37, %v1824_v36  ;;  %v2470_v54 = vor.u32 %v2027_v40, %v1384_v35 }
  0x1b   :  { %1058 = vmatpush.bf16.msra.mxu3 %v1657_v10  ;;  %v1952_v47 = vld [vmem:[%s3295_s1 + $0x3f0] sm:$0xf]  ;;  %v2167_v50 = vld [vmem:[%s3295_s1 + $0x3f4] sm:$0xf0]  ;;  %v1880_v51 = vld [vmem:[%s3295_s1 + $0x360] sm:$0xf]  ;;  %v2478_v57 = vor.u32 %v2023_v41, %v1386_v42  ;;  %v1761_v58 = vor.u32 %v2119_v46, %v1760_v45 }
  0x1c   :  { %1002 = vmatpush.bf16.msra.mxu0 %v1457_v17  ;;  %v2149_v52 = vld [vmem:[%s3295_s1 + $0x364] sm:$0xf0]  ;;  %v1816_v55 = vld [vmem:[%s3295_s1 + $0x2e0] sm:$0xf]  ;;  %v1953_v59 = vor.u32 %v2167_v50, %v1952_v47  ;;  %v1872_v2 = vld [vmem:[%s3295_s1 + $0x350] sm:$0xf] }
  0x1d   :  { %1021 = vmatpush.bf16.msra.mxu1 %v1521_v21  ;;  %v2133_v56 = vld [vmem:[%s3295_s1 + $0x2e4] sm:$0xf0]  ;;  %v1881_v60 = vor.u32 %v2149_v52, %v1880_v51  ;;  %v1752_v61 = vld [vmem:[%s3295_s1 + $0x260] sm:$0xf]  ;;  %v2147_v3 = vld [vmem:[%s3295_s1 + $0x354] sm:$0xf0] }
  0x1e   :  { %1040 = vmatpush.bf16.msra.mxu2 %v1585_v22  ;;  %v2117_v62 = vld [vmem:[%s3295_s1 + $0x264] sm:$0xf0]  ;;  %v1944_v63 = vld [vmem:[%s3295_s1 + $0x3e0] sm:$0xf]  ;;  %v1817_v0 = vor.u32 %v2133_v56, %v1816_v55  ;;  %v1808_v4 = vld [vmem:[%s3295_s1 + $0x2d0] sm:$0xf]  ;;  %v1873_v8 = vor.u32 %v2147_v3, %v1872_v2 }
  0x1f   :  { %1059 = vmatpush.bf16.msra.mxu3 %v1649_v26  ;;  %v2165_v1 = vld [vmem:[%s3295_s1 + $0x3e4] sm:$0xf0]  ;;  %v2131_v5 = vld [vmem:[%s3295_s1 + $0x2d4] sm:$0xf0]  ;;  %v1753_v6 = vor.u32 %v2117_v62, %v1752_v61  ;;  %v1744_v9 = vld [vmem:[%s3295_s1 + $0x250] sm:$0xf] }
  0x20   :  { %1003 = vmatpush.bf16.msra.mxu0 %v1449_v34  ;;  %v1945_v7 = vor.u32 %v2165_v1, %v1944_v63  ;;  %v2115_v10 = vld [vmem:[%s3295_s1 + $0x254] sm:$0xf0]  ;;  %v1936_v11 = vld [vmem:[%s3295_s1 + $0x3d0] sm:$0xf]  ;;  %v1809_v12 = vor.u32 %v2131_v5, %v1808_v4  ;;  %v1864_v14 = vld [vmem:[%s3295_s1 + $0x340] sm:$0xf] }
  0x21   :  { %1022 = vmatpush.bf16.msra.mxu1 %v1513_v38  ;;  %v2163_v13 = vld [vmem:[%s3295_s1 + $0x3d4] sm:$0xf0]  ;;  %v2145_v15 = vld [vmem:[%s3295_s1 + $0x344] sm:$0xf0]  ;;  %v1800_v16 = vld [vmem:[%s3295_s1 + $0x2c0] sm:$0xf]  ;;  %v1745_v18 = vor.u32 %v2115_v10, %v1744_v9 }
  0x22   :  { %1041 = vmatpush.bf16.msra.mxu2 %v1577_v39  ;;  %v2129_v17 = vld [vmem:[%s3295_s1 + $0x2c4] sm:$0xf0]  ;;  %v1736_v19 = vld [vmem:[%s3295_s1 + $0x240] sm:$0xf]  ;;  %v1937_v22 = vor.u32 %v2163_v13, %v1936_v11  ;;  %v1865_v23 = vor.u32 %v2145_v15, %v1864_v14  ;;  %v2035_v26 = vld [vmem:[%s3296_s0 + $0x68] sm:$0xf0] }
  0x23   :  { %1060 = vmatpush.bf16.msra.mxu3 %v1641_v43  ;;  %1004 = vmatmul.bf16.vlgmr.msra.gmra.mxu0 %v2457_v48  ;;  %v2113_v20 = vld [vmem:[%s3295_s1 + $0x244] sm:$0xf0]  ;;  %v1928_v21 = vld [vmem:[%s3295_s1 + $0x3c0] sm:$0xf]  ;;  %v1801_v27 = vor.u32 %v2129_v17, %v1800_v16  ;;  %v2031_v28 = vld [vmem:[%s3296_s0 + $0x4c] sm:$0xf] }
  0x24   :  { %1023 = vmatmul.bf16.vlgmr.msra.gmra.mxu1 %v2468_v53  ;;  %1072 = vmatpush.bf16.msrb.mxu0 %v1761_v58  ;;  %v2161_v24 = vld [vmem:[%s3295_s1 + $0x3c4] sm:$0xf0]  ;;  %v1414_v29 = vld [vmem:[%s3296_s0 + $0x6c] sm:$0xf0]  ;;  %v2143_v31 = vld [vmem:[%s3295_s1 + $0x334] sm:$0xf0]  ;;  %v1737_v35 = vor.u32 %v2113_v20, %v1736_v19 }
  0x25   :  { %1091 = vmatpush.bf16.msrb.mxu1 %v1825_v49  ;;  %1042 = vmatmul.bf16.vlgmr.msra.gmra.mxu2 %v2470_v54  ;;  %v1412_v25 = vld [vmem:[%s3296_s0 + $0x48] sm:$0xf]  ;;  %v1856_v30 = vld [vmem:[%s3295_s1 + $0x330] sm:$0xf]  ;;  %v2127_v34 = vld [vmem:[%s3295_s1 + $0x2b4] sm:$0xf0]  ;;  %v1929_v39 = vor.u32 %v2161_v24, %v1928_v21  ;;  %v2600_v50 = vor.u32 %v2031_v28, %v1414_v29 }
  0x26   :  { %1110 = vmatpush.bf16.msrb.mxu2 %v1889_v44  ;;  %1061 = vmatmul.bf16.vlgmr.msra.gmra.mxu3 %v2478_v57  ;;  %v1420_v32 = vld [vmem:[%s3296_s0 + $0x50] sm:$0xf]  ;;  %v2036_v36 = vld [vmem:[%s3296_s0 + $0x70] sm:$0xf0]  ;;  %v1422_v38 = vld [vmem:[%s3296_s0 + $0x74] sm:$0xf0]  ;;  %v1857_v40 = vor.u32 %v2143_v31, %v1856_v30  ;;  %v2589_v44 = vor.u32 %v2035_v26, %v1412_v25 }
  0x27   :  { %1129 = vmatpush.bf16.msrb.mxu3 %v1953_v59  ;;  %v1792_v33 = vld [vmem:[%s3295_s1 + $0x2b0] sm:$0xf]  ;;  %v2032_v37 = vld [vmem:[%s3296_s0 + $0x54] sm:$0xf]  ;;  %v2111_v42 = vld [vmem:[%s3295_s1 + $0x234] sm:$0xf0]  ;;  %v2602_v51 = vor.u32 %v2036_v36, %v1420_v32 }
  0x28   :  { %1073 = vmatpush.bf16.msrb.mxu0 %v1753_v6  ;;  %v1728_v41 = vld [vmem:[%s3295_s1 + $0x230] sm:$0xf]  ;;  %v1793_v45 = vor.u32 %v2127_v34, %v1792_v33  ;;  %v2159_v46 = vld [vmem:[%s3295_s1 + $0x3b4] sm:$0xf0]  ;;  %v1848_v47 = vld [vmem:[%s3295_s1 + $0x320] sm:$0xf]  ;;  %v2610_v56 = vor.u32 %v2032_v37, %v1422_v38 }
  0x29   :  { %1092 = vmatpush.bf16.msrb.mxu1 %v1817_v0  ;;  %v1920_v43 = vld [vmem:[%s3295_s1 + $0x3b0] sm:$0xf]  ;;  %v2141_v49 = vld [vmem:[%s3295_s1 + $0x324] sm:$0xf0]  ;;  %v1784_v52 = vld [vmem:[%s3295_s1 + $0x2a0] sm:$0xf]  ;;  %v1729_v58 = vor.u32 %v2111_v42, %v1728_v41 }
  0x2a   :  { %1111 = vmatpush.bf16.msrb.mxu2 %v1881_v60  ;;  %v2125_v55 = vld [vmem:[%s3295_s1 + $0x2a4] sm:$0xf0]  ;;  %v1921_v59 = vor.u32 %v2159_v46, %v1920_v43  ;;  %v1849_v60 = vor.u32 %v2141_v49, %v1848_v47  ;;  %v1720_v61 = vld [vmem:[%s3295_s1 + $0x220] sm:$0xf]  ;;  %v1840_v2 = vld [vmem:[%s3295_s1 + $0x310] sm:$0xf] }
  0x2b   :  { %1130 = vmatpush.bf16.msrb.mxu3 %v1945_v7  ;;  %v2109_v62 = vld [vmem:[%s3295_s1 + $0x224] sm:$0xf0]  ;;  %v1912_v63 = vld [vmem:[%s3295_s1 + $0x3a0] sm:$0xf]  ;;  %v1785_v0 = vor.u32 %v2125_v55, %v1784_v52  ;;  %v2139_v3 = vld [vmem:[%s3295_s1 + $0x314] sm:$0xf0] }
  0x2c   :  { %1074 = vmatpush.bf16.msrb.mxu0 %v1745_v18  ;;  %v2157_v1 = vld [vmem:[%s3295_s1 + $0x3a4] sm:$0xf0]  ;;  %v1776_v4 = vld [vmem:[%s3295_s1 + $0x290] sm:$0xf]  ;;  %v2123_v5 = vld [vmem:[%s3295_s1 + $0x294] sm:$0xf0]  ;;  %v1721_v6 = vor.u32 %v2109_v62, %v1720_v61  ;;  %v1841_v9 = vor.u32 %v2139_v3, %v1840_v2 }
  0x2d   :  { %1093 = vmatpush.bf16.msrb.mxu1 %v1809_v12  ;;  %v1712_v7 = vld [vmem:[%s3295_s1 + $0x210] sm:$0xf]  ;;  %v2107_v10 = vld [vmem:[%s3295_s1 + $0x214] sm:$0xf0]  ;;  %v1777_v13 = vor.u32 %v2123_v5, %v1776_v4  ;;  %v1832_v14 = vld [vmem:[%s3295_s1 + $0x300] sm:$0xf] }
  0x2e   :  { %1112 = vmatpush.bf16.msrb.mxu2 %v1873_v8  ;;  %v1913_v8 = vor.u32 %v2157_v1, %v1912_v63  ;;  %v1904_v11 = vld [vmem:[%s3295_s1 + $0x390] sm:$0xf]  ;;  %v2155_v12 = vld [vmem:[%s3295_s1 + $0x394] sm:$0xf0]  ;;  %v2137_v15 = vld [vmem:[%s3295_s1 + $0x304] sm:$0xf0]  ;;  %v1713_v20 = vor.u32 %v2107_v10, %v1712_v7 }
  0x2f   :  { %1131 = vmatpush.bf16.msrb.mxu3 %v1937_v22  ;;  %v1768_v16 = vld [vmem:[%s3295_s1 + $0x280] sm:$0xf]  ;;  %v2121_v17 = vld [vmem:[%s3295_s1 + $0x284] sm:$0xf0]  ;;  %v2070_v18 = vld [vmem:[%s3295_s1 + $0xf4] sm:$0xf]  ;;  %v1905_v24 = vor.u32 %v2155_v12, %v1904_v11  ;;  %v1833_v25 = vor.u32 %v2137_v15, %v1832_v14 }
  0x30   :  { %1075 = vmatpush.bf16.msrb.mxu0 %v1737_v35  ;;  %v1570_v19 = vld [vmem:[%s3295_s1 + $0xf8] sm:$0xf0]  ;;  %v1704_v21 = vld [vmem:[%s3295_s1 + $0x200] sm:$0xf]  ;;  %v2054_v22 = vld [vmem:[%s3295_s1 + $0x74] sm:$0xf]  ;;  %v1769_v29 = vor.u32 %v2121_v17, %v1768_v16 }
  0x31   :  { %1094 = vmatpush.bf16.msrb.mxu1 %v1801_v27  ;;  %v2105_v26 = vld [vmem:[%s3295_s1 + $0x204] sm:$0xf0]  ;;  %v1896_v27 = vld [vmem:[%s3295_s1 + $0x380] sm:$0xf]  ;;  %v1392_v30 = vld [vmem:[%s3296_s0 + $0x10] sm:$0xf]  ;;  %v1573_v34 = vor.u32 %v2070_v18, %v1570_v19 }
  0x32   :  { %1113 = vmatpush.bf16.msrb.mxu2 %v1865_v23  ;;  %v1506_v23 = vld [vmem:[%s3295_s1 + $0x78] sm:$0xf0]  ;;  %v2153_v28 = vld [vmem:[%s3295_s1 + $0x384] sm:$0xf0]  ;;  %v2028_v31 = vld [vmem:[%s3296_s0 + $0x30] sm:$0xf0]  ;;  %v1705_v42 = vor.u32 %v2105_v26, %v1704_v21 }
  0x33   :  { %1132 = vmatpush.bf16.msrb.mxu3 %v1929_v39  ;;  %1009 = vmatmul.bf16.gmra.mxu0 %v2589_v44  ;;  %v2024_v32 = vld [vmem:[%s3296_s0 + $0x14] sm:$0xf]  ;;  %v1394_v33 = vld [vmem:[%s3296_s0 + $0x34] sm:$0xf0]  ;;  %v2016_v35 = vld [vmem:[%s3295_s1 + $0x470] sm:$0xf]  ;;  %v1509_v38 = vor.u32 %v2054_v22, %v1506_v23  ;;  %v1897_v47 = vor.u32 %v2153_v28, %v1896_v27 }
  0x34   :  { %1028 = vmatmul.bf16.gmra.mxu1 %v2600_v50  ;;  %1076 = vmatpush.bf16.msrb.mxu0 %v1729_v58  ;;  %v2183_v36 = vld [vmem:[%s3295_s1 + $0x474] sm:$0xf0]  ;;  %v2086_v37 = vld [vmem:[%s3295_s1 + $0x174] sm:$0xf]  ;;  %v1634_v39 = vld [vmem:[%s3295_s1 + $0x178] sm:$0xf0]  ;;  %v2747_v1 = vor.u32 %v2024_v32, %v1394_v33 }
  0x35   :  { %1095 = vmatpush.bf16.msrb.mxu1 %v1793_v45  ;;  %1047 = vmatmul.bf16.gmra.mxu2 %v2602_v51  ;;  %v1562_v41 = vld [vmem:[%s3295_s1 + $0xe8] sm:$0xf0]  ;;  %v1400_v43 = vld [vmem:[%s3296_s0 + $0x18] sm:$0xf]  ;;  %v2029_v45 = vld [vmem:[%s3296_s0 + $0x38] sm:$0xf0]  ;;  %v2017_v52 = vor.u32 %v2183_v36, %v2016_v35 }
  0x36   :  { %1114 = vmatpush.bf16.msrb.mxu2 %v1857_v40  ;;  %1066 = vmatmul.bf16.gmra.mxu3 %v2610_v56  ;;  %v2068_v40 = vld [vmem:[%s3295_s1 + $0xe4] sm:$0xf]  ;;  %v2025_v46 = vld [vmem:[%s3296_s0 + $0x1c] sm:$0xf]  ;;  %v1402_v49 = vld [vmem:[%s3296_s0 + $0x3c] sm:$0xf0]  ;;  %v2758_v5 = vor.u32 %v2029_v45, %v1400_v43 }
  0x37   :  { %1133 = vmatpush.bf16.msrb.mxu3 %v1921_v59  ;;  %v2008_v55 = vld [vmem:[%s3295_s1 + $0x460] sm:$0xf]  ;;  %v2181_v58 = vld [vmem:[%s3295_s1 + $0x464] sm:$0xf0]  ;;  %v1637_v59 = vor.u32 %v2086_v37, %v1634_v39  ;;  %v2052_v61 = vld [vmem:[%s3295_s1 + $0x64] sm:$0xf] }
  0x38   :  { %1077 = vmatpush.bf16.msrb.mxu0 %v1721_v6  ;;  %v1498_v62 = vld [vmem:[%s3295_s1 + $0x68] sm:$0xf0]  ;;  %v2084_v63 = vld [vmem:[%s3295_s1 + $0x164] sm:$0xf]  ;;  %v2066_v3 = vld [vmem:[%s3295_s1 + $0xd4] sm:$0xf]  ;;  %v2760_v6 = vor.u32 %v2025_v46, %v1402_v49  ;;  %v2009_v7 = vor.u32 %v2181_v58, %v2008_v55 }
  0x39   :  { %1096 = vmatpush.bf16.msrb.mxu1 %v1785_v0  ;;  %v2745_v0 = vor.u32 %v2028_v31, %v1392_v30  ;;  %v1626_v2 = vld [vmem:[%s3295_s1 + $0x168] sm:$0xf0]  ;;  %v1554_v4 = vld [vmem:[%s3295_s1 + $0xd8] sm:$0xf0]  ;;  %v2179_v10 = vld [vmem:[%s3295_s1 + $0x454] sm:$0xf0] }
  0x3a   :  { %1115 = vmatpush.bf16.msrb.mxu2 %v1849_v60  ;;  %v1565_v60 = vor.u32 %v2068_v40, %v1562_v41  ;;  %v1629_v11 = vor.u32 %v2084_v63, %v1626_v2  ;;  %v1557_v12 = vor.u32 %v2066_v3, %v1554_v4  ;;  %v1490_v14 = vld [vmem:[%s3295_s1 + $0x58] sm:$0xf0]  ;;  %v2082_v15 = vld [vmem:[%s3295_s1 + $0x154] sm:$0xf]  ;;  %v2064_v17 = vld [vmem:[%s3295_s1 + $0xc4] sm:$0xf] }
  0x3b   :  { %1134 = vmatpush.bf16.msrb.mxu3 %v1913_v8  ;;  %v1501_v8 = vor.u32 %v2052_v61, %v1498_v62  ;;  %v1618_v16 = vld [vmem:[%s3295_s1 + $0x158] sm:$0xf0]  ;;  %v1546_v18 = vld [vmem:[%s3295_s1 + $0xc8] sm:$0xf0]  ;;  %v1992_v21 = vld [vmem:[%s3295_s1 + $0x440] sm:$0xf] }
  0x3c   :  { %1078 = vmatpush.bf16.msrb.mxu0 %v1713_v20  ;;  %v2177_v22 = vld [vmem:[%s3295_s1 + $0x444] sm:$0xf0]  ;;  %v1621_v23 = vor.u32 %v2082_v15, %v1618_v16  ;;  %v1482_v26 = vld [vmem:[%s3295_s1 + $0x48] sm:$0xf0]  ;;  %v2080_v27 = vld [vmem:[%s3295_s1 + $0x144] sm:$0xf] }
  0x3d   :  { %1097 = vmatpush.bf16.msrb.mxu1 %v1777_v13  ;;  %v2050_v13 = vld [vmem:[%s3295_s1 + $0x54] sm:$0xf]  ;;  %v1610_v28 = vld [vmem:[%s3295_s1 + $0x148] sm:$0xf0]  ;;  %v1538_v30 = vld [vmem:[%s3295_s1 + $0xb8] sm:$0xf0]  ;;  %v1993_v31 = vor.u32 %v2177_v22, %v1992_v21 }
  0x3e   :  { %1116 = vmatpush.bf16.msrb.mxu2 %v1841_v9  ;;  %v2000_v9 = vld [vmem:[%s3295_s1 + $0x450] sm:$0xf]  ;;  %v1493_v20 = vor.u32 %v2050_v13, %v1490_v14  ;;  %v1613_v35 = vor.u32 %v2080_v27, %v1610_v28  ;;  %v1428_v36 = vld [vmem:[%s3296_s0 + $0x58] sm:$0xf]  ;;  %v2037_v37 = vld [vmem:[%s3296_s0 + $0x78] sm:$0xf0] }
  0x3f   :  { %1135 = vmatpush.bf16.msrb.mxu3 %v1905_v24  ;;  %v2001_v19 = vor.u32 %v2179_v10, %v2000_v9  ;;  %v1549_v24 = vor.u32 %v2064_v17, %v1546_v18  ;;  %v1984_v33 = vld [vmem:[%s3295_s1 + $0x430] sm:$0xf]  ;;  %v1430_v39 = vld [vmem:[%s3296_s0 + $0x7c] sm:$0xf0]  ;;  %v2046_v41 = vld [vmem:[%s3295_s1 + $0x34] sm:$0xf] }
  0x40   :  { %1079 = vmatpush.bf16.msrb.mxu0 %v1705_v42  ;;  %v1474_v42 = vld [vmem:[%s3295_s1 + $0x38] sm:$0xf0]  ;;  %v2078_v43 = vld [vmem:[%s3295_s1 + $0x134] sm:$0xf]  ;;  %v2060_v46 = vld [vmem:[%s3295_s1 + $0xa4] sm:$0xf] }
  0x41   :  { %1098 = vmatpush.bf16.msrb.mxu1 %v1769_v29  ;;  %v2062_v29 = vld [vmem:[%s3295_s1 + $0xb4] sm:$0xf]  ;;  %v1602_v45 = vld [vmem:[%s3295_s1 + $0x138] sm:$0xf0]  ;;  %v1436_v49 = vld [vmem:[%s3296_s0 + $0x60] sm:$0xf] }
  0x42   :  { %1117 = vmatpush.bf16.msrb.mxu2 %v1833_v25  ;;  %v2048_v25 = vld [vmem:[%s3295_s1 + $0x44] sm:$0xf]  ;;  %v1541_v40 = vor.u32 %v2062_v29, %v1538_v30  ;;  %v1438_v58 = vld [vmem:[%s3296_s0 + $0x84] sm:$0xf0]  ;;  %v1976_v61 = vld [vmem:[%s3295_s1 + $0x420] sm:$0xf]  ;;  %v1605_v63 = vor.u32 %v2078_v43, %v1602_v45 }
  0x43   :  { %1136 = vmatpush.bf16.msrb.mxu3 %v1897_v47  ;;  %1080 = vmatmul.bf16.vlgmr.msrb.gmra.mxu0 %v2745_v0  ;;  %v1485_v32 = vor.u32 %v2048_v25, %v1482_v26  ;;  %v1530_v47 = vld [vmem:[%s3295_s1 + $0xa8] sm:$0xf0]  ;;  %v2034_v55 = vld [vmem:[%s3296_s0 + $0x64] sm:$0xf]  ;;  %v2173_v62 = vld [vmem:[%s3295_s1 + $0x424] sm:$0xf0] }
  0x44   :  { %1148 = vmatpush.bf16.msra.mxu0 %v2017_v52  ;;  %1099 = vmatmul.bf16.vlgmr.msrb.gmra.mxu1 %v2747_v1  ;;  %v2038_v52 = vld [vmem:[%s3296_s0 + $0x80] sm:$0xf0]  ;;  %v1533_v2 = vor.u32 %v2060_v46, %v1530_v47  ;;  %v1466_v4 = vld [vmem:[%s3295_s1 + $0x28] sm:$0xf0]  ;;  %v2892_v14 = vor.u32 %v2034_v55, %v1438_v58  ;;  %v1977_v15 = vor.u32 %v2173_v62, %v1976_v61  ;;  %v1968_v17 = vld [vmem:[%s3295_s1 + $0x410] sm:$0xf] }
  0x45   :  { %1167 = vmatpush.bf16.msra.mxu1 %v1509_v38  ;;  %1118 = vmatmul.bf16.vlgmr.msrb.gmra.mxu2 %v2758_v5  ;;  %v2033_v38 = vld [vmem:[%s3296_s0 + $0x5c] sm:$0xf]  ;;  %v2044_v3 = vld [vmem:[%s3295_s1 + $0x24] sm:$0xf]  ;;  %v1594_v10 = vld [vmem:[%s3295_s1 + $0x128] sm:$0xf0]  ;;  %v2890_v13 = vor.u32 %v2038_v52, %v1436_v49 }
  0x46   :  { %1186 = vmatpush.bf16.msra.mxu2 %v1573_v34  ;;  %1137 = vmatmul.bf16.vlgmr.msrb.gmra.mxu3 %v2760_v6  ;;  %v2175_v34 = vld [vmem:[%s3295_s1 + $0x434] sm:$0xf0]  ;;  %v2879_v9 = vor.u32 %v2033_v38, %v1430_v39  ;;  %v1469_v16 = vor.u32 %v2044_v3, %v1466_v4  ;;  %v2042_v21 = vld [vmem:[%s3295_s1 + $0x14] sm:$0xf]  ;;  %v1458_v22 = vld [vmem:[%s3295_s1 + $0x18] sm:$0xf0] }
  0x47   :  { %1205 = vmatpush.bf16.msra.mxu3 %v1637_v59  ;;  %v1985_v59 = vor.u32 %v2175_v34, %v1984_v33  ;;  %v2171_v18 = vld [vmem:[%s3295_s1 + $0x414] sm:$0xf0]  ;;  %v2056_v25 = vld [vmem:[%s3295_s1 + $0x84] sm:$0xf]  ;;  %v1514_v26 = vld [vmem:[%s3295_s1 + $0x88] sm:$0xf0]  ;;  %v1461_v30 = vor.u32 %v2042_v21, %v1458_v22 }
  0x48   :  { %1149 = vmatpush.bf16.msra.mxu0 %v2009_v7  ;;  %v2076_v7 = vld [vmem:[%s3295_s1 + $0x124] sm:$0xf]  ;;  %v2134_v27 = vld [vmem:[%s3295_s1 + $0x2f4] sm:$0xf]  ;;  %v1826_v28 = vld [vmem:[%s3295_s1 + $0x2f8] sm:$0xf0]  ;;  %v1969_v29 = vor.u32 %v2171_v18, %v1968_v17 }
  0x49   :  { %1168 = vmatpush.bf16.msra.mxu1 %v1501_v8  ;;  %v2877_v8 = vor.u32 %v2037_v37, %v1428_v36  ;;  %v2040_v33 = vld [vmem:[%s3295_s1 + $0x4] sm:$0xf]  ;;  %v1450_v36 = vld [vmem:[%s3295_s1 + $0x8] sm:$0xf0]  ;;  %v1829_v39 = vor.u32 %v2134_v27, %v1826_v28  ;;  %v1762_v43 = vld [vmem:[%s3295_s1 + $0x278] sm:$0xf0] }
  0x4a   :  { %1187 = vmatpush.bf16.msra.mxu2 %v1565_v60  ;;  %v1477_v60 = vor.u32 %v2046_v41, %v1474_v42  ;;  %v2072_v37 = vld [vmem:[%s3295_s1 + $0x104] sm:$0xf]  ;;  %v1578_v38 = vld [vmem:[%s3295_s1 + $0x108] sm:$0xf0]  ;;  %v1698_v41 = vld [vmem:[%s3295_s1 + $0x1f8] sm:$0xf0]  ;;  %v1453_v49 = vor.u32 %v2040_v33, %v1450_v36 }
  0x4b   :  { %1206 = vmatpush.bf16.msra.mxu3 %v1629_v11  ;;  %v2058_v11 = vld [vmem:[%s3295_s1 + $0x94] sm:$0xf]  ;;  %v1890_v46 = vld [vmem:[%s3295_s1 + $0x378] sm:$0xf0]  ;;  %v2132_v52 = vld [vmem:[%s3295_s1 + $0x2e4] sm:$0xf]  ;;  %v1581_v58 = vor.u32 %v2072_v37, %v1578_v38 }
  0x4c   :  { %1150 = vmatpush.bf16.msra.mxu0 %v2001_v19  ;;  %v1597_v19 = vor.u32 %v2076_v7, %v1594_v10  ;;  %v2118_v42 = vld [vmem:[%s3295_s1 + $0x274] sm:$0xf]  ;;  %v1818_v55 = vld [vmem:[%s3295_s1 + $0x2e8] sm:$0xf0]  ;;  %v2100_v62 = vld [vmem:[%s3295_s1 + $0x1e4] sm:$0xf] }
  0x4d   :  { %1169 = vmatpush.bf16.msra.mxu1 %v1493_v20  ;;  %v2150_v45 = vld [vmem:[%s3295_s1 + $0x374] sm:$0xf]  ;;  %v2030_v3 = vld [vmem:[%s3296_s0 + $0x40] sm:$0xf0]  ;;  %v1821_v4 = vor.u32 %v2132_v52, %v1818_v55  ;;  %v1754_v10 = vld [vmem:[%s3295_s1 + $0x268] sm:$0xf0] }
  0x4e   :  { %1188 = vmatpush.bf16.msra.mxu2 %v1557_v12  ;;  %v1522_v12 = vld [vmem:[%s3295_s1 + $0x98] sm:$0xf0]  ;;  %v1893_v61 = vor.u32 %v2150_v45, %v1890_v46  ;;  %v2116_v7 = vld [vmem:[%s3295_s1 + $0x264] sm:$0xf]  ;;  %v2146_v27 = vld [vmem:[%s3295_s1 + $0x354] sm:$0xf] }
  0x4f   :  { %1207 = vmatpush.bf16.msra.mxu3 %v1621_v23  ;;  %v1525_v20 = vor.u32 %v2058_v11, %v1522_v12  ;;  %v2074_v23 = vld [vmem:[%s3295_s1 + $0x114] sm:$0xf]  ;;  %v2148_v12 = vld [vmem:[%s3295_s1 + $0x364] sm:$0xf]  ;;  %v1810_v18 = vld [vmem:[%s3295_s1 + $0x2d8] sm:$0xf0]  ;;  %v1757_v21 = vor.u32 %v2116_v7, %v1754_v10 }
  0x50   :  { %1151 = vmatpush.bf16.msra.mxu0 %v1993_v31  ;;  %v1960_v31 = vld [vmem:[%s3295_s1 + $0x400] sm:$0xf]  ;;  %v1874_v28 = vld [vmem:[%s3295_s1 + $0x358] sm:$0xf0]  ;;  %v2126_v38 = vld [vmem:[%s3295_s1 + $0x2b4] sm:$0xf] }
  0x51   :  { %1170 = vmatpush.bf16.msra.mxu1 %v1485_v32  ;;  %v2169_v32 = vld [vmem:[%s3295_s1 + $0x404] sm:$0xf0]  ;;  %v2110_v45 = vld [vmem:[%s3295_s1 + $0x234] sm:$0xf]  ;;  %v1730_v46 = vld [vmem:[%s3295_s1 + $0x238] sm:$0xf0] }
  0x52   :  { %1189 = vmatpush.bf16.msra.mxu2 %v1549_v24  ;;  %v1586_v24 = vld [vmem:[%s3295_s1 + $0x118] sm:$0xf0]  ;;  %v1961_v47 = vor.u32 %v2169_v32, %v1960_v31  ;;  %v2096_v31 = vld [vmem:[%s3295_s1 + $0x1c4] sm:$0xf]  ;;  %v1674_v32 = vld [vmem:[%s3295_s1 + $0x1c8] sm:$0xf0] }
  0x53   :  { %1208 = vmatpush.bf16.msra.mxu3 %v1613_v35  ;;  %1085 = vmatmul.bf16.gmra.mxu0 %v2877_v8  ;;  %v1589_v34 = vor.u32 %v2074_v23, %v1586_v24  ;;  %v1517_v35 = vor.u32 %v2056_v25, %v1514_v26  ;;  %v2114_v23 = vld [vmem:[%s3295_s1 + $0x254] sm:$0xf]  ;;  %v1746_v24 = vld [vmem:[%s3295_s1 + $0x258] sm:$0xf0]  ;;  %v1677_v37 = vor.u32 %v2096_v31, %v1674_v32  ;;  %v1722_v7 = vld [vmem:[%s3295_s1 + $0x228] sm:$0xf0] }
  0x54   :  { %1152 = vmatpush.bf16.msra.mxu0 %v1985_v59  ;;  %1104 = vmatmul.bf16.gmra.mxu1 %v2879_v9  ;;  %v1749_v33 = vor.u32 %v2114_v23, %v1746_v24  ;;  %v2142_v52 = vld [vmem:[%s3295_s1 + $0x334] sm:$0xf]  ;;  %v1858_v55 = vld [vmem:[%s3295_s1 + $0x338] sm:$0xf0]  ;;  %v1770_v31 = vld [vmem:[%s3295_s1 + $0x288] sm:$0xf0] }
  0x55   :  { %1171 = vmatpush.bf16.msra.mxu1 %v1477_v60  ;;  %1123 = vmatmul.bf16.gmra.mxu2 %v2890_v13  ;;  %v1765_v60 = vor.u32 %v2118_v42, %v1762_v43  ;;  %v2106_v24 = vld [vmem:[%s3295_s1 + $0x214] sm:$0xf]  ;;  %v2088_v32 = vld [vmem:[%s3295_s1 + $0x184] sm:$0xf] }
  0x56   :  { %1190 = vmatpush.bf16.msra.mxu2 %v1541_v40  ;;  %1142 = vmatmul.bf16.gmra.mxu3 %v2892_v14  ;;  %v2102_v40 = vld [vmem:[%s3295_s1 + $0x1f4] sm:$0xf] }
  0x57   :  { %1209 = vmatpush.bf16.msra.mxu3 %v1605_v63  ;;  %v1701_v59 = vor.u32 %v2102_v40, %v1698_v41  ;;  %v1690_v63 = vld [vmem:[%s3295_s1 + $0x1e8] sm:$0xf0]  ;;  %v2094_v40 = vld [vmem:[%s3295_s1 + $0x1b4] sm:$0xf]  ;;  %v1666_v41 = vld [vmem:[%s3295_s1 + $0x1b8] sm:$0xf0] }
  0x58   :  { %1153 = vmatpush.bf16.msra.mxu0 %v1977_v15  ;;  %v1693_v11 = vor.u32 %v2100_v62, %v1690_v63  ;;  %v1882_v15 = vld [vmem:[%s3295_s1 + $0x368] sm:$0xf0]  ;;  %v1444_v62 = vld [vmem:[%s3296_s0 + $0x68] sm:$0xf] }
  0x59   :  { %1172 = vmatpush.bf16.msra.mxu1 %v1469_v16  ;;  %v2130_v16 = vld [vmem:[%s3295_s1 + $0x2d4] sm:$0xf]  ;;  %v1885_v22 = vor.u32 %v2148_v12, %v1882_v15  ;;  %v2039_v63 = vld [vmem:[%s3296_s0 + $0x88] sm:$0xf0]  ;;  %v2140_v12 = vld [vmem:[%s3295_s1 + $0x324] sm:$0xf] }
  0x5a   :  { %1191 = vmatpush.bf16.msra.mxu2 %v1533_v2  ;;  %v1408_v2 = vld [vmem:[%s3296_s0 + $0x20] sm:$0xf]  ;;  %v1813_v25 = vor.u32 %v2130_v16, %v1810_v18  ;;  %v1850_v15 = vld [vmem:[%s3295_s1 + $0x328] sm:$0xf0]  ;;  %v2122_v16 = vld [vmem:[%s3295_s1 + $0x294] sm:$0xf]  ;;  %v3105_v18 = vor.u32 %v2039_v63, %v1444_v62 }
  0x5b   :  { %1210 = vmatpush.bf16.msra.mxu3 %v1597_v19  ;;  %v2997_v17 = vor.u32 %v2030_v3, %v1408_v2  ;;  %v2098_v19 = vld [vmem:[%s3295_s1 + $0x1d4] sm:$0xf]  ;;  %v1733_v2 = vor.u32 %v2110_v45, %v1730_v46  ;;  %v1861_v3 = vor.u32 %v2142_v52, %v1858_v55  ;;  %v1853_v23 = vor.u32 %v2140_v12, %v1850_v15  ;;  %v2010_v52 = vld [vmem:[%s3295_s1 + $0x468] sm:$0xf0] }
  0x5c   :  { %1154 = vmatpush.bf16.msra.mxu0 %v1969_v29  ;;  %v2128_v29 = vld [vmem:[%s3295_s1 + $0x2c4] sm:$0xf] }
  0x5d   :  { %1173 = vmatpush.bf16.msra.mxu1 %v1461_v30  ;;  %v1802_v30 = vld [vmem:[%s3295_s1 + $0x2c8] sm:$0xf0] }
  0x5e   :  { %1192 = vmatpush.bf16.msra.mxu2 %v1525_v20  ;;  %v1682_v20 = vld [vmem:[%s3295_s1 + $0x1d8] sm:$0xf0]  ;;  %v1805_v36 = vor.u32 %v2128_v29, %v1802_v30  ;;  %v2120_v30 = vld [vmem:[%s3295_s1 + $0x284] sm:$0xf] }
  0x5f   :  { %1211 = vmatpush.bf16.msra.mxu3 %v1589_v34  ;;  %v1685_v26 = vor.u32 %v2098_v19, %v1682_v20  ;;  %v2112_v34 = vld [vmem:[%s3295_s1 + $0x244] sm:$0xf]  ;;  %v1778_v19 = vld [vmem:[%s3295_s1 + $0x298] sm:$0xf0]  ;;  %v2090_v20 = vld [vmem:[%s3295_s1 + $0x194] sm:$0xf] }
  0x60   :  { %1155 = vmatpush.bf16.msra.mxu0 %v1961_v47  ;;  %v1842_v29 = vld [vmem:[%s3295_s1 + $0x318] sm:$0xf0] }
  0x61   :  { %1174 = vmatpush.bf16.msra.mxu1 %v1453_v49  ;;  %v1669_v49 = vor.u32 %v2094_v40, %v1666_v41  ;;  %v2018_v40 = vld [vmem:[%s3295_s1 + $0x478] sm:$0xf0]  ;;  %v2164_v41 = vld [vmem:[%s3295_s1 + $0x3e4] sm:$0xf] }
  0x62   :  { %1193 = vmatpush.bf16.msra.mxu2 %v1517_v35  ;;  %v1738_v35 = vld [vmem:[%s3295_s1 + $0x248] sm:$0xf0] }
  0x63   :  { %1212 = vmatpush.bf16.msra.mxu3 %v1581_v58  ;;  %1156 = vmatmul.bf16.vlgmr.msra.gmra.mxu0 %v2997_v17  ;;  %v1741_v42 = vor.u32 %v2112_v34, %v1738_v35  ;;  %v2124_v58 = vld [vmem:[%s3295_s1 + $0x2a4] sm:$0xf] }
  0x64   :  { %1224 = vmatpush.bf16.msrb.mxu0 %v1701_v59  ;;  %1175 = vmatmul.bf16.vlgmr.msra.gmra.mxu1 %v2457_v48  ;;  %v1877_v48 = vor.u32 %v2146_v27, %v1874_v28  ;;  %v1786_v59 = vld [vmem:[%s3295_s1 + $0x2a8] sm:$0xf0]  ;;  %v2138_v28 = vld [vmem:[%s3295_s1 + $0x314] sm:$0xf] }
  0x65   :  { %1243 = vmatpush.bf16.msrb.mxu1 %v1765_v60  ;;  %1194 = vmatmul.bf16.vlgmr.msra.gmra.mxu2 %v2468_v53  ;;  %v2144_v53 = vld [vmem:[%s3295_s1 + $0x344] sm:$0xf]  ;;  %v1789_v10 = vor.u32 %v2124_v58, %v1786_v59  ;;  %v1845_v35 = vor.u32 %v2138_v28, %v1842_v29  ;;  %v2162_v58 = vld [vmem:[%s3295_s1 + $0x3d4] sm:$0xf]  ;;  %v1938_v59 = vld [vmem:[%s3295_s1 + $0x3d8] sm:$0xf0] }
  0x66   :  { %1262 = vmatpush.bf16.msrb.mxu2 %v1829_v39  ;;  %1213 = vmatmul.bf16.vlgmr.msra.gmra.mxu3 %v2470_v54  ;;  %v1866_v54 = vld [vmem:[%s3295_s1 + $0x348] sm:$0xf0]  ;;  %v1794_v39 = vld [vmem:[%s3295_s1 + $0x2b8] sm:$0xf0]  ;;  %v2092_v60 = vld [vmem:[%s3295_s1 + $0x1a4] sm:$0xf]  ;;  %v1941_v62 = vor.u32 %v2162_v58, %v1938_v59 }
  0x67   :  { %1281 = vmatpush.bf16.msrb.mxu3 %v1893_v61  ;;  %v1869_v43 = vor.u32 %v2144_v53, %v1866_v54  ;;  %v1797_v47 = vor.u32 %v2126_v38, %v1794_v39  ;;  %v1658_v61 = vld [vmem:[%s3295_s1 + $0x1a8] sm:$0xf0]  ;;  %v2136_v53 = vld [vmem:[%s3295_s1 + $0x304] sm:$0xf]  ;;  %v2182_v39 = vld [vmem:[%s3295_s1 + $0x474] sm:$0xf] }
  0x68   :  { %1225 = vmatpush.bf16.msrb.mxu0 %v1693_v11  ;;  %v1661_v11 = vor.u32 %v2092_v60, %v1658_v61  ;;  %v1834_v54 = vld [vmem:[%s3295_s1 + $0x308] sm:$0xf0]  ;;  %v2021_v46 = vor.u32 %v2182_v39, %v2018_v40  ;;  %v2178_v60 = vld [vmem:[%s3295_s1 + $0x454] sm:$0xf]  ;;  %v2002_v61 = vld [vmem:[%s3295_s1 + $0x458] sm:$0xf0] }
  0x69   :  { %1244 = vmatpush.bf16.msrb.mxu1 %v1757_v21  ;;  %v1650_v21 = vld [vmem:[%s3295_s1 + $0x198] sm:$0xf0]  ;;  %v1837_v45 = vor.u32 %v2136_v53, %v1834_v54  ;;  %v2005_v63 = vor.u32 %v2178_v60, %v2002_v61 }
  0x6a   :  { %1263 = vmatpush.bf16.msrb.mxu2 %v1821_v4  ;;  %v2108_v4 = vld [vmem:[%s3295_s1 + $0x224] sm:$0xf]  ;;  %v1653_v27 = vor.u32 %v2090_v20, %v1650_v21  ;;  %v1978_v21 = vld [vmem:[%s3295_s1 + $0x428] sm:$0xf0] }
  0x6b   :  { %1282 = vmatpush.bf16.msrb.mxu3 %v1885_v22  ;;  %v1725_v22 = vor.u32 %v2108_v4, %v1722_v7  ;;  %v2176_v4 = vld [vmem:[%s3295_s1 + $0x444] sm:$0xf]  ;;  %v1994_v7 = vld [vmem:[%s3295_s1 + $0x448] sm:$0xf0] }
  0x6c   :  { %1226 = vmatpush.bf16.msrb.mxu0 %v1685_v26  ;;  %v1781_v26 = vor.u32 %v2122_v16, %v1778_v19  ;;  %v2156_v16 = vld [vmem:[%s3295_s1 + $0x3a4] sm:$0xf]  ;;  %v1914_v19 = vld [vmem:[%s3295_s1 + $0x3a8] sm:$0xf0] }
  0x6d   :  { %1245 = vmatpush.bf16.msrb.mxu1 %v1749_v33  ;;  %v1642_v33 = vld [vmem:[%s3295_s1 + $0x188] sm:$0xf0]  ;;  %v2172_v20 = vld [vmem:[%s3295_s1 + $0x424] sm:$0xf] }
  0x6e   :  { %1264 = vmatpush.bf16.msrb.mxu2 %v1813_v25  ;;  %v1714_v25 = vld [vmem:[%s3295_s1 + $0x218] sm:$0xf0] }
  0x6f   :  { %1283 = vmatpush.bf16.msrb.mxu3 %v1877_v48  ;;  %v1954_v48 = vld [vmem:[%s3295_s1 + $0x3f8] sm:$0xf0]  ;;  %v1717_v34 = vor.u32 %v2106_v24, %v1714_v25  ;;  %v2154_v24 = vld [vmem:[%s3295_s1 + $0x394] sm:$0xf] }
  0x70   :  { %1227 = vmatpush.bf16.msrb.mxu0 %v1677_v37  ;;  %v1706_v37 = vld [vmem:[%s3295_s1 + $0x208] sm:$0xf0]  ;;  %v1906_v25 = vld [vmem:[%s3295_s1 + $0x398] sm:$0xf0] }
  0x71   :  { %1246 = vmatpush.bf16.msrb.mxu1 %v1741_v42  ;;  %v1946_v42 = vld [vmem:[%s3295_s1 + $0x3e8] sm:$0xf0]  ;;  %v1909_v28 = vor.u32 %v2154_v24, %v1906_v25 }
  0x72   :  { %1265 = vmatpush.bf16.msrb.mxu2 %v1805_v36  ;;  %v2104_v36 = vld [vmem:[%s3295_s1 + $0x204] sm:$0xf] }
  0x73   :  { %1284 = vmatpush.bf16.msrb.mxu3 %v1869_v43  ;;  %1161 = vmatmul.bf16.gmra.mxu0 %v3105_v18  ;;  %v1709_v43 = vor.u32 %v2104_v36, %v1706_v37 }
  0x74   :  { %1228 = vmatpush.bf16.msrb.mxu0 %v1669_v49  ;;  %1180 = vmatmul.bf16.gmra.mxu1 %v2589_v44  ;;  %v2166_v44 = vld [vmem:[%s3295_s1 + $0x3f4] sm:$0xf]  ;;  %v2180_v49 = vld [vmem:[%s3295_s1 + $0x464] sm:$0xf] }
  0x75   :  { %1247 = vmatpush.bf16.msrb.mxu1 %v1733_v2  ;;  %1199 = vmatmul.bf16.gmra.mxu2 %v2600_v50  ;;  %v1773_v50 = vor.u32 %v2120_v30, %v1770_v31  ;;  %v1957_v38 = vor.u32 %v2166_v44, %v1954_v48  ;;  %v2013_v55 = vor.u32 %v2180_v49, %v2010_v52  ;;  %v2160_v2 = vld [vmem:[%s3295_s1 + $0x3c4] sm:$0xf]  ;;  %v1898_v31 = vld [vmem:[%s3295_s1 + $0x388] sm:$0xf0] }
  0x76   :  { %1266 = vmatpush.bf16.msrb.mxu2 %v1797_v47  ;;  %1218 = vmatmul.bf16.gmra.mxu3 %v2602_v51  ;;  %v1645_v51 = vor.u32 %v2088_v32, %v1642_v33  ;;  %v1949_v47 = vor.u32 %v2164_v41, %v1946_v42  ;;  %v2152_v30 = vld [vmem:[%s3295_s1 + $0x384] sm:$0xf]  ;;  %v1962_v33 = vld [vmem:[%s3295_s1 + $0x408] sm:$0xf0] }
  0x77   :  { %1285 = vmatpush.bf16.msrb.mxu3 %v1861_v3  ;;  %v1930_v3 = vld [vmem:[%s3295_s1 + $0x3c8] sm:$0xf0]  ;;  %v2168_v32 = vld [vmem:[%s3295_s1 + $0x404] sm:$0xf]  ;;  %v1901_v44 = vor.u32 %v2152_v30, %v1898_v31 }
  0x78   :  { %1229 = vmatpush.bf16.msrb.mxu0 %v1661_v11  ;;  %v1922_v11 = vld [vmem:[%s3295_s1 + $0x3b8] sm:$0xf0] }
  0x79   :  { %1248 = vmatpush.bf16.msrb.mxu1 %v1725_v22  ;;  %v1917_v22 = vor.u32 %v2156_v16, %v1914_v19 }
  0x7a   :  { %1267 = vmatpush.bf16.msrb.mxu2 %v1789_v10  ;;  %v1933_v10 = vor.u32 %v2160_v2, %v1930_v3 }
  0x7b   :  { %1286 = vmatpush.bf16.msrb.mxu3 %v1853_v23  ;;  %v1981_v23 = vor.u32 %v2172_v20, %v1978_v21 }
  0x7c   :  { %1230 = vmatpush.bf16.msrb.mxu0 %v1653_v27  ;;  %v1970_v27 = vld [vmem:[%s3295_s1 + $0x418] sm:$0xf0] }
  0x7d   :  { %1249 = vmatpush.bf16.msrb.mxu1 %v1717_v34 }
  0x7e   :  { %1268 = vmatpush.bf16.msrb.mxu2 %v1781_v26  ;;  %v2170_v26 = vld [vmem:[%s3295_s1 + $0x414] sm:$0xf] }
  0x7f   :  { %1287 = vmatpush.bf16.msrb.mxu3 %v1845_v35  ;;  %v1973_v29 = vor.u32 %v2170_v26, %v1970_v27 }
  0x80   :  { %1231 = vmatpush.bf16.msrb.mxu0 %v1645_v51 }
  0x81   :  { %1250 = vmatpush.bf16.msrb.mxu1 %v1709_v43 }
  0x82   :  { %1269 = vmatpush.bf16.msrb.mxu2 %v1773_v50 }
  0x83   :  { %1288 = vmatpush.bf16.msrb.mxu3 %v1837_v45  ;;  %1232 = vmatmul.bf16.vlgmr.msrb.gmra.mxu0 %v2478_v57  ;;  %v1997_v57 = vor.u32 %v2176_v4, %v1994_v7 }
  0x84   :  { %1300 = vmatpush.bf16.msra.mxu0 %v1957_v38  ;;  %1251 = vmatmul.bf16.vlgmr.msrb.gmra.mxu1 %v2745_v0  ;;  %v2158_v0 = vld [vmem:[%s3295_s1 + $0x3b4] sm:$0xf] }
  0x85   :  { %1319 = vmatpush.bf16.msra.mxu1 %v2021_v46  ;;  %1270 = vmatmul.bf16.vlgmr.msrb.gmra.mxu2 %v2747_v1  ;;  %v2174_v1 = vld [vmem:[%s3295_s1 + $0x434] sm:$0xf]  ;;  %v1925_v12 = vor.u32 %v2158_v0, %v1922_v11 }
  0x86   :  { %2184 = vmatpush.bf16.msra.mxu2 %v1957_v38  ;;  %1289 = vmatmul.bf16.vlgmr.msrb.gmra.mxu3 %v2758_v5  ;;  %v1986_v5 = vld [vmem:[%s3295_s1 + $0x438] sm:$0xf0] }
  0x87   :  { %2192 = vmatpush.bf16.msra.mxu3 %v2021_v46  ;;  %v1989_v15 = vor.u32 %v2174_v1, %v1986_v5 }
  0x88   :  { %1301 = vmatpush.bf16.msra.mxu0 %v1949_v47 }
  0x89   :  { %1320 = vmatpush.bf16.msra.mxu1 %v2013_v55 }
  0x8a   :  { %2185 = vmatpush.bf16.msra.mxu2 %v1949_v47 }
  0x8b   :  { %2193 = vmatpush.bf16.msra.mxu3 %v2013_v55 }
  0x8c   :  { %1302 = vmatpush.bf16.msra.mxu0 %v1941_v62 }
  0x8d   :  { %1321 = vmatpush.bf16.msra.mxu1 %v2005_v63 }
  0x8e   :  { %2186 = vmatpush.bf16.msra.mxu2 %v1941_v62 }
  0x8f   :  { %2194 = vmatpush.bf16.msra.mxu3 %v2005_v63 }
  0x90   :  { %1303 = vmatpush.bf16.msra.mxu0 %v1933_v10 }
  0x91   :  { %1322 = vmatpush.bf16.msra.mxu1 %v1997_v57 }
  0x92   :  { %2187 = vmatpush.bf16.msra.mxu2 %v1933_v10 }
  0x93   :  { %2195 = vmatpush.bf16.msra.mxu3 %v1997_v57  ;;  %1237 = vmatmul.bf16.gmra.mxu0 %v2610_v56  ;;  %v1965_v56 = vor.u32 %v2168_v32, %v1962_v33 }
  0x94   :  { %1304 = vmatpush.bf16.msra.mxu0 %v1925_v12  ;;  %1256 = vmatmul.bf16.gmra.mxu1 %v2877_v8 }
  0x95   :  { %1323 = vmatpush.bf16.msra.mxu1 %v1989_v15  ;;  %1275 = vmatmul.bf16.gmra.mxu2 %v2879_v9 }
  0x96   :  { %2188 = vmatpush.bf16.msra.mxu2 %v1925_v12  ;;  %1294 = vmatmul.bf16.gmra.mxu3 %v2890_v13 }
  0x97   :  { %2196 = vmatpush.bf16.msra.mxu3 %v1989_v15 }
  0x98   :  { %1305 = vmatpush.bf16.msra.mxu0 %v1917_v22 }
  0x99   :  { %1324 = vmatpush.bf16.msra.mxu1 %v1981_v23 }
  0x9a   :  { %2189 = vmatpush.bf16.msra.mxu2 %v1917_v22 }
  0x9b   :  { %2197 = vmatpush.bf16.msra.mxu3 %v1981_v23 }
  0x9c   :  { %1306 = vmatpush.bf16.msra.mxu0 %v1909_v28 }
  0x9d   :  { %1325 = vmatpush.bf16.msra.mxu1 %v1973_v29 }
  0x9e   :  { %2190 = vmatpush.bf16.msra.mxu2 %v1909_v28 }
  0x9f   :  { %2198 = vmatpush.bf16.msra.mxu3 %v1973_v29 }
  0xa0   :  { %1307 = vmatpush.bf16.msra.mxu0 %v1901_v44  ;;  %v1005_v8 = vpop.f32.mrf.mxu0 }
  0xa1   :  { %1326 = vmatpush.bf16.msra.mxu1 %v1965_v56  ;;  %v1024_v48 = vpop.f32.mrf.mxu1 }
  0xa2   :  { %2191 = vmatpush.bf16.msra.mxu2 %v1901_v44 }
  0xa3   :  { %2199 = vmatpush.bf16.msra.mxu3 %v1965_v56  ;;  %1308 = vmatmul.bf16.vlgmr.msra.gmra.mxu0 %v2760_v6 }
  0xa4   :  { %1327 = vmatmul.bf16.vlgmr.msra.gmra.mxu1 %v2997_v17 }
  0xa5   :  { %1313 = vmatmul.bf16.vlgmr.msra.gmra.mxu2 %v2892_v14  ;;  %v3267_v14 = vld [vmem:[%s3297_s2] sm:$0x3] }
  0xa6   :  { %1332 = vmatmul.bf16.vlgmr.msra.gmra.mxu3 %v3105_v18  ;;  %v180_v41 = vperm.slane %v3267_v14, 0 }
  0xa8   :  { %v1043_v9 = vpop.f32.mrf.mxu2  ;;  %v1007_v34 = vpop.f32.mrf.mxu0  ;;  %v1006_v42 = vadd.f32 %v1005_v8, %v180_v41 }
  0xa9   :  { %v1062_v13 = vpop.f32.mrf.mxu3  ;;  %v1026_v35 = vpop.f32.mrf.mxu1  ;;  %v1008_v61 = vadd.f32 %v1007_v34, %v180_v41 }
  0xaa   :  { %v1025_v49 = vadd.f32 %v1024_v48, %v1006_v42 }
  0xab   :  { %v1027_v63 = vadd.f32 %v1026_v35, %v1008_v61 }
  0xac   :  { %v1044_v52 = vadd.f32 %v1043_v9, %v1025_v49 }
  0xae   :  { %v1063_v62 = vadd.f32 %v1062_v13, %v1044_v52 }
  0xb0   :  { %v1045_v36 = vpop.f32.mrf.mxu2  ;;  %v1010_v51 = vpop.f32.mrf.mxu0 }
  0xb1   :  { %v1064_v50 = vpop.f32.mrf.mxu3  ;;  %v1029_v37 = vpop.f32.mrf.mxu1  ;;  %v1046_v3 = vadd.f32 %v1045_v36, %v1027_v63  ;;  %v1011_v4 = vadd.f32 %v1010_v51, %v180_v41  ;;  %v181_v63 = vperm.slane %v3267_v14, 1 }
  0xb3   :  { %v1065_v1 = vadd.f32 %v1064_v50, %v1046_v3  ;;  %v1030_v5 = vadd.f32 %v1029_v37, %v1011_v4 }
  0xb8   :  { %v1048_v53 = vpop.f32.mrf.mxu2  ;;  %v1012_v38 = vpop.f32.mrf.mxu0 }
  0xb9   :  { %v1067_v54 = vpop.f32.mrf.mxu3  ;;  %v1031_v39 = vpop.f32.mrf.mxu1  ;;  %v1049_v16 = vadd.f32 %v1048_v53, %v1030_v5  ;;  %v1013_v24 = vadd.f32 %v1012_v38, %v180_v41 }
  0xbb   :  { %v1068_v27 = vadd.f32 %v1067_v54, %v1049_v16  ;;  %v1032_v30 = vadd.f32 %v1031_v39, %v1013_v24 }
  0xc0   :  { %v1050_v40 = vpop.f32.mrf.mxu2  ;;  %v1081_v17 = vpop.f32.mrf.mxu0 }
  0xc1   :  { %v1069_v6 = vpop.f32.mrf.mxu3  ;;  %v1100_v18 = vpop.f32.mrf.mxu1  ;;  %v1082_v2 = vadd.f32 %v1081_v17, %v1063_v62  ;;  %v1051_v33 = vadd.f32 %v1050_v40, %v1032_v30 }
  0xc3   :  { %v1101_v11 = vadd.f32 %v1100_v18, %v1082_v2  ;;  %v1070_v35 = vadd.f32 %v1069_v6, %v1051_v33 }
  0xc8   :  { %v1119_v43 = vpop.f32.mrf.mxu2  ;;  %v1083_v46 = vpop.f32.mrf.mxu0 }
  0xc9   :  { %v1138_v45 = vpop.f32.mrf.mxu3  ;;  %v1102_v47 = vpop.f32.mrf.mxu1  ;;  %v1120_v12 = vadd.f32 %v1119_v43, %v1101_v11  ;;  %v1084_v15 = vadd.f32 %v1083_v46, %v1065_v1 }
  0xcb   :  { %v1139_v19 = vadd.f32 %v1138_v45, %v1120_v12  ;;  %v1103_v25 = vadd.f32 %v1102_v47, %v1084_v15 }
  0xd0   :  { %v1121_v55 = vpop.f32.mrf.mxu2  ;;  %v1086_v59 = vpop.f32.mrf.mxu0 }
  0xd1   :  { %v1140_v58 = vpop.f32.mrf.mxu3  ;;  %v1105_v60 = vpop.f32.mrf.mxu1  ;;  %v1122_v28 = vadd.f32 %v1121_v55, %v1103_v25  ;;  %v1087_v31 = vadd.f32 %v1086_v59, %v1068_v27 }
  0xd3   :  { %v1141_v44 = vadd.f32 %v1140_v58, %v1122_v28  ;;  %v1106_v13 = vadd.f32 %v1105_v60, %v1087_v31 }
  0xd8   :  { %v1124_v7 = vpop.f32.mrf.mxu2  ;;  %v1088_v57 = vpop.f32.mrf.mxu0 }
  0xd9   :  { %v1143_v10 = vpop.f32.mrf.mxu3  ;;  %v1107_v0 = vpop.f32.mrf.mxu1  ;;  %v1125_v36 = vadd.f32 %v1124_v7, %v1106_v13  ;;  %v1089_v51 = vadd.f32 %v1088_v57, %v1070_v35 }
  0xdb   :  { %v1144_v53 = vadd.f32 %v1143_v10, %v1125_v36  ;;  %v1108_v17 = vadd.f32 %v1107_v0, %v1089_v51 }
  0xe0   :  { %v1126_v20 = vpop.f32.mrf.mxu2  ;;  %v1157_v22 = vpop.f32.mrf.mxu0 }
  0xe1   :  { %v1145_v21 = vpop.f32.mrf.mxu3  ;;  %v1176_v23 = vpop.f32.mrf.mxu1  ;;  %v1158_v26 = vadd.f32 %v1157_v22, %v1139_v19  ;;  %v1127_v41 = vadd.f32 %v1126_v20, %v1108_v17 }
  0xe2   :  { %v1177_v10 = vadd.f32 %v1176_v23, %v181_v63 }
  0xe3   :  { %vm1338_vm0 = vcmp.ge.f32.partialorder %v1158_v26, 0.0  ;;  %v1346_v29 = vmul.f32 0.1, %v1158_v26  ;;  %v1146_v43 = vadd.f32 %v1145_v21, %v1127_v41 }
  0xe5   :  { %v1354_v32 = vsel %vm1338_vm0, %v1158_v26, %v1346_v29 }
  0xe6   :  { %1362 = vst [vmem:[%s3298_s3] sm:$0xff] %v1354_v32 }
  0xe8   :  { %v1195_v56 = vpop.f32.mrf.mxu2  ;;  %v1159_v48 = vpop.f32.mrf.mxu0 }
  0xe9   :  { %v1214_v8 = vpop.f32.mrf.mxu3  ;;  %v1178_v9 = vpop.f32.mrf.mxu1  ;;  %v1160_v34 = vadd.f32 %v1159_v48, %v1141_v44  ;;  %v1196_v57 = vadd.f32 %v1195_v56, %v1177_v10 }
  0xea   :  { %v1179_v16 = vadd.f32 %v1178_v9, %v181_v63 }
  0xeb   :  { %vm1340_vm1 = vcmp.ge.f32.partialorder %v1160_v34, 0.0  ;;  %v1348_v50 = vmul.f32 0.1, %v1160_v34  ;;  %v1215_v15 = vadd.f32 %v1214_v8, %v1196_v57 }
  0xed   :  { %v1356_v37 = vsel %vm1340_vm1, %v1160_v34, %v1348_v50 }
  0xee   :  { %1364 = vst [vmem:[%s3298_s3 + $0x10] sm:$0xff] %v1356_v37 }
  0xf0   :  { %v1197_v54 = vpop.f32.mrf.mxu2  ;;  %v1162_v39 = vpop.f32.mrf.mxu0 }
  0xf1   :  { %v1216_v38 = vpop.f32.mrf.mxu3  ;;  %v1181_v40 = vpop.f32.mrf.mxu1  ;;  %v1163_v18 = vadd.f32 %v1162_v39, %v1144_v53  ;;  %v1198_v21 = vadd.f32 %v1197_v54, %v1179_v16 }
  0xf2   :  { %v1182_v12 = vadd.f32 %v1181_v40, %v181_v63 }
  0xf3   :  { %vm1342_vm2 = vcmp.ge.f32.partialorder %v1163_v18, 0.0  ;;  %v1350_v42 = vmul.f32 0.1, %v1163_v18  ;;  %v1217_v28 = vadd.f32 %v1216_v38, %v1198_v21 }
  0xf5   :  { %v1358_v6 = vsel %vm1342_vm2, %v1163_v18, %v1350_v42 }
  0xf6   :  { %1366 = vst [vmem:[%s3298_s3 + $0x20] sm:$0xff] %v1358_v6 }
  0xf8   :  { %v1200_v45 = vpop.f32.mrf.mxu2  ;;  %v1164_v47 = vpop.f32.mrf.mxu0 }
  0xf9   :  { %v1219_v46 = vpop.f32.mrf.mxu3  ;;  %v1183_v49 = vpop.f32.mrf.mxu1  ;;  %v1165_v52 = vadd.f32 %v1164_v47, %v1146_v43  ;;  %v1201_v20 = vadd.f32 %v1200_v45, %v1182_v12 }
  0xfa   :  { %v1184_v23 = vadd.f32 %v1183_v49, %v181_v63 }
  0xfb   :  { %vm1344_vm3 = vcmp.ge.f32.partialorder %v1165_v52, 0.0  ;;  %v1352_v55 = vmul.f32 0.1, %v1165_v52  ;;  %v1220_v27 = vadd.f32 %v1219_v46, %v1201_v20 }
  0xfd   :  { %v1360_v58 = vsel %vm1344_vm3, %v1165_v52, %v1352_v55 }
  0xfe   :  { %1368 = vst [vmem:[%s3298_s3 + $0x30] sm:$0xff] %v1360_v58 }
 0x100   :  { %v1202_v59 = vpop.f32.mrf.mxu2  ;;  %v1233_v61 = vpop.f32.mrf.mxu0 }
 0x101   :  { %v1221_v60 = vpop.f32.mrf.mxu3  ;;  %v1252_v62 = vpop.f32.mrf.mxu1  ;;  %v1234_v19 = vadd.f32 %v1233_v61, %v1215_v15  ;;  %v1203_v32 = vadd.f32 %v1202_v59, %v1184_v23 }
 0x103   :  { %v1253_v26 = vadd.f32 %v1252_v62, %v1234_v19  ;;  %v1222_v35 = vadd.f32 %v1221_v60, %v1203_v32 }
 0x108   :  { %v1271_v2 = vpop.f32.mrf.mxu2  ;;  %v1235_v4 = vpop.f32.mrf.mxu0 }
 0x109   :  { %v1290_v3 = vpop.f32.mrf.mxu3  ;;  %v1254_v7 = vpop.f32.mrf.mxu1  ;;  %v1272_v29 = vadd.f32 %v1271_v2, %v1253_v26  ;;  %v1236_v31 = vadd.f32 %v1235_v4, %v1217_v28 }
 0x10b   :  { %v1291_v33 = vadd.f32 %v1290_v3, %v1272_v29  ;;  %v1255_v13 = vadd.f32 %v1254_v7, %v1236_v31 }
 0x110   :  { %v1273_v0 = vpop.f32.mrf.mxu2  ;;  %v1238_v1 = vpop.f32.mrf.mxu0 }
 0x111   :  { %v1292_v11 = vpop.f32.mrf.mxu3  ;;  %v1257_v5 = vpop.f32.mrf.mxu1  ;;  %v1239_v30 = vadd.f32 %v1238_v1, %v1220_v27  ;;  %v1274_v50 = vadd.f32 %v1273_v0, %v1255_v13 }
 0x113   :  { %v1258_v8 = vadd.f32 %v1257_v5, %v1239_v30  ;;  %v1293_v38 = vadd.f32 %v1292_v11, %v1274_v50 }
 0x118   :  { %v1276_v22 = vpop.f32.mrf.mxu2  ;;  %v1240_v25 = vpop.f32.mrf.mxu0 }
 0x119   :  { %v1295_v24 = vpop.f32.mrf.mxu3  ;;  %v1259_v14 = vpop.f32.mrf.mxu1  ;;  %v1277_v36 = vadd.f32 %v1276_v22, %v1258_v8  ;;  %v1241_v37 = vadd.f32 %v1240_v25, %v1222_v35 }
 0x11b   :  { %v1296_v54 = vadd.f32 %v1295_v24, %v1277_v36  ;;  %v1260_v18 = vadd.f32 %v1259_v14, %v1241_v37 }
 0x120   :  { %v1278_v44 = vpop.f32.mrf.mxu2  ;;  %v1309_v48 = vpop.f32.mrf.mxu0 }
 0x121   :  { %v1297_v56 = vpop.f32.mrf.mxu3  ;;  %v1328_v9 = vpop.f32.mrf.mxu1  ;;  %v1310_v34 = vadd.f32 %v1309_v48, %v1291_v33  ;;  %v1279_v43 = vadd.f32 %v1278_v44, %v1260_v18 }
 0x123   :  { %v1329_v51 = vadd.f32 %v1328_v9, %v1310_v34  ;;  %v1298_v55 = vadd.f32 %v1297_v56, %v1279_v43 }
 0x125   :  { %vm1339_vm4 = vcmp.ge.f32.partialorder %v1329_v51, 0.0  ;;  %v1347_v53 = vmul.f32 0.1, %v1329_v51 }
 0x127   :  { %v1355_v39 = vsel %vm1339_vm4, %v1329_v51, %v1347_v53 }
 0x128   :  { %v1314_v40 = vpop.f32.mrf.mxu2  ;;  %1363 = vst [vmem:[%s3298_s3 + $0x8] sm:$0xff] %v1355_v39  ;;  %v1311_v42 = vpop.f32.mrf.mxu0 }
 0x129   :  { %v1333_v17 = vpop.f32.mrf.mxu3  ;;  %v1315_v41 = vadd.f32 %v1314_v40, %v1296_v54  ;;  %v1312_v6 = vadd.f32 %v1311_v42, %v1293_v38  ;;  %v1330_v46 = vpop.f32.mrf.mxu1 }
 0x12b   :  { %v1334_v45 = vadd.f32 %v1333_v17, %v1315_v41  ;;  %v1331_v47 = vadd.f32 %v1330_v46, %v1312_v6 }
 0x12d   :  { %vm1343_vm5 = vcmp.ge.f32.partialorder %v1334_v45, 0.0  ;;  %v1351_v49 = vmul.f32 0.1, %v1334_v45  ;;  %vm1341_vm6 = vcmp.ge.f32.partialorder %v1331_v47, 0.0  ;;  %v1349_v52 = vmul.f32 0.1, %v1331_v47 }
 0x12f   :  { %v1359_v58 = vsel %vm1343_vm5, %v1334_v45, %v1351_v49  ;;  %v1357_v59 = vsel %vm1341_vm6, %v1331_v47, %v1349_v52 }
 0x130   :  { %1367 = vst [vmem:[%s3298_s3 + $0x28] sm:$0xff] %v1359_v58  ;;  %v1316_v60 = vpop.f32.mrf.mxu2 }
 0x131   :  { %1365 = vst [vmem:[%s3298_s3 + $0x18] sm:$0xff] %v1357_v59  ;;  %v1317_v61 = vadd.f32 %v1316_v60, %v1298_v55  ;;  %v1335_v62 = vpop.f32.mrf.mxu3 }
 0x133   :  { %v1336_v63 = vadd.f32 %v1335_v62, %v1317_v61 }
 0x135   :  { %vm1345_vm7 = vcmp.ge.f32.partialorder %v1336_v63, 0.0  ;;  %v1353_v2 = vmul.f32 0.1, %v1336_v63 }
 0x137   :  { %v1361_v3 = vsel %vm1345_vm7, %v1336_v63, %v1353_v2 }
 0x138   :  { %1369 = vst [vmem:[%s3298_s3 + $0x38] sm:$0xff] %v1361_v3 }

// kernel: hour_glass_prop_forward.8
= control target key start
LH: loop header
LB: loop body
LE: loop exit
PB: predicated region body
PF: predicated region fallthrough
CT: control target
= control target key end

     0   :  { %vm555_vm0 = vcmask 523264   ;;  %s1787_s1 = inlined_call_operand.vmem [shape: bf16[576,128], index: 1, kind: input, shape index: {}]   ;;  %s1788_s2 = inlined_call_operand.vmem [shape: f32[1,128], index: 2, kind: input, shape index: {}]   ;;  %s1789_s0 = inlined_call_operand.vmem [shape: bf16[128,576], index: 0, kind: input, shape index: {}]   ;;  %s1790_s3 = inlined_call_operand.vmem [shape: f32[128,128], index: 3, kind: output, shape index: {}]  }
   0x1   :  { %v1252_v0 = vld [vmem:[%s1787_s1 + $0x38] sm:$0xff]  ;;  %v1251_v1 = vld [vmem:[%s1787_s1 + $0x30] sm:$0xff]  ;;  %v1250_v2 = vld [vmem:[%s1787_s1 + $0x28] sm:$0xff] }
   0x2   :  { %1281 = vmatpush.bf16.msra.mxu1 %v1252_v0  ;;  %1282 = vmatpush.bf16.msra.mxu2 %v1252_v0  ;;  %v1249_v3 = vld [vmem:[%s1787_s1 + $0x20] sm:$0xff]  ;;  %v1248_v4 = vld [vmem:[%s1787_s1 + $0x18] sm:$0xff]  ;;  %v1247_v5 = vld [vmem:[%s1787_s1 + $0x10] sm:$0xff] }
   0x3   :  { %1283 = vmatpush.bf16.msra.mxu3 %v1252_v0  ;;  %580 = vmatpush.bf16.msra.mxu0 %v1252_v0  ;;  %v1246_v6 = vld [vmem:[%s1787_s1 + $0x8] sm:$0xff]  ;;  %v1245_v7 = vld [vmem:[%s1787_s1] sm:$0xff]  ;;  %v935_v8 = vld [vmem:[%s1789_s0 + $0x50] sm:$0xf] }
   0x4   :  { %v1217_v9 = vld [vmem:[%s1789_s0 + $0x60] sm:$0xf0]  ;;  %v975_v10 = vld [vmem:[%s1789_s0 + $0xa0] sm:$0xf]  ;;  %v1227_v11 = vld [vmem:[%s1789_s0 + $0xb0] sm:$0xf0] }
   0x5   :  { %v1015_v12 = vld [vmem:[%s1789_s0 + $0xf0] sm:$0xf]  ;;  %v1237_v13 = vld [vmem:[%s1789_s0 + $0x100] sm:$0xf0]  ;;  %v895_v14 = vld [vmem:[%s1789_s0] sm:$0xf]  ;;  %v936_v18 = vor.u32 %v1217_v9, %v935_v8  ;;  %v976_v19 = vor.u32 %v1227_v11, %v975_v10 }
   0x6   :  { %1284 = vmatpush.bf16.msra.mxu1 %v1251_v1  ;;  %1285 = vmatpush.bf16.msra.mxu2 %v1251_v1  ;;  %v1207_v15 = vld [vmem:[%s1789_s0 + $0x10] sm:$0xf0]  ;;  %v1268_v16 = vld [vmem:[%s1787_s1 + $0xb8] sm:$0xff]  ;;  %v1016_v20 = vor.u32 %v1237_v13, %v1015_v12  ;;  %v1266_v28 = vld [vmem:[%s1787_s1 + $0xa8] sm:$0xff] }
   0x7   :  { %1286 = vmatpush.bf16.msra.mxu3 %v1251_v1  ;;  %581 = vmatpush.bf16.msra.mxu0 %v1251_v1  ;;  %v1260_v17 = vld [vmem:[%s1787_s1 + $0x78] sm:$0xff]  ;;  %v896_v21 = vor.u32 %v1207_v15, %v895_v14  ;;  %v1267_v24 = vld [vmem:[%s1787_s1 + $0xb0] sm:$0xff]  ;;  %v1258_v29 = vld [vmem:[%s1787_s1 + $0x68] sm:$0xff] }
   0x8   :  { %v1276_v22 = vld [vmem:[%s1787_s1 + $0xf8] sm:$0xff]  ;;  %v1259_v25 = vld [vmem:[%s1787_s1 + $0x70] sm:$0xff]  ;;  %v1274_v30 = vld [vmem:[%s1787_s1 + $0xe8] sm:$0xff] }
   0x9   :  { %v1280_v23 = vld [vmem:[%s1787_s1 + $0x118] sm:$0xff]  ;;  %v1275_v26 = vld [vmem:[%s1787_s1 + $0xf0] sm:$0xff]  ;;  %v1278_v31 = vld [vmem:[%s1787_s1 + $0x108] sm:$0xff] }
   0xa   :  { %1287 = vmatpush.bf16.msra.mxu1 %v1250_v2  ;;  %1288 = vmatpush.bf16.msra.mxu2 %v1250_v2  ;;  %v1279_v27 = vld [vmem:[%s1787_s1 + $0x110] sm:$0xff]  ;;  %v1265_v32 = vld [vmem:[%s1787_s1 + $0xa0] sm:$0xff]  ;;  %v955_v35 = vld [vmem:[%s1789_s0 + $0x78] sm:$0xf] }
   0xb   :  { %1289 = vmatpush.bf16.msra.mxu3 %v1250_v2  ;;  %582 = vmatpush.bf16.msra.mxu0 %v1250_v2  ;;  %v1257_v33 = vld [vmem:[%s1787_s1 + $0x60] sm:$0xff]  ;;  %v1222_v36 = vld [vmem:[%s1789_s0 + $0x88] sm:$0xf0]  ;;  %v995_v37 = vld [vmem:[%s1789_s0 + $0xc8] sm:$0xf] }
   0xc   :  { %v1273_v34 = vld [vmem:[%s1787_s1 + $0xe0] sm:$0xff]  ;;  %v1232_v38 = vld [vmem:[%s1789_s0 + $0xd8] sm:$0xf0]  ;;  %v1035_v39 = vld [vmem:[%s1789_s0 + $0x118] sm:$0xf]  ;;  %v956_v46 = vor.u32 %v1222_v36, %v955_v35 }
   0xd   :  { %v1242_v40 = vld [vmem:[%s1789_s0 + $0x128] sm:$0xf0]  ;;  %v915_v41 = vld [vmem:[%s1789_s0 + $0x28] sm:$0xf]  ;;  %v1212_v42 = vld [vmem:[%s1789_s0 + $0x38] sm:$0xf0]  ;;  %v996_v47 = vor.u32 %v1232_v38, %v995_v37 }
   0xe   :  { %1290 = vmatpush.bf16.msra.mxu1 %v1249_v3  ;;  %1291 = vmatpush.bf16.msra.mxu2 %v1249_v3  ;;  %v1277_v43 = vld [vmem:[%s1787_s1 + $0x100] sm:$0xff]  ;;  %v1264_v44 = vld [vmem:[%s1787_s1 + $0x98] sm:$0xff]  ;;  %v1036_v48 = vor.u32 %v1242_v40, %v1035_v39  ;;  %v916_v49 = vor.u32 %v1212_v42, %v915_v41  ;;  %v1263_v51 = vld [vmem:[%s1787_s1 + $0x90] sm:$0xff] }
   0xf   :  { %1292 = vmatpush.bf16.msra.mxu3 %v1249_v3  ;;  %583 = vmatpush.bf16.msra.mxu0 %v1249_v3  ;;  %v1256_v45 = vld [vmem:[%s1787_s1 + $0x58] sm:$0xff]  ;;  %v1255_v52 = vld [vmem:[%s1787_s1 + $0x50] sm:$0xff]  ;;  %v1262_v54 = vld [vmem:[%s1787_s1 + $0x88] sm:$0xff] }
  0x10   :  { %v1272_v50 = vld [vmem:[%s1787_s1 + $0xd8] sm:$0xff]  ;;  %v1271_v53 = vld [vmem:[%s1787_s1 + $0xd0] sm:$0xff]  ;;  %v1254_v55 = vld [vmem:[%s1787_s1 + $0x48] sm:$0xff] }
  0x11   :  { %v1270_v56 = vld [vmem:[%s1787_s1 + $0xc8] sm:$0xff]  ;;  %v1261_v57 = vld [vmem:[%s1787_s1 + $0x80] sm:$0xff]  ;;  %v897_v61 = vld [vmem:[%s1789_s0 + $0x14] sm:$0xf0] }
  0x12   :  { %1293 = vmatpush.bf16.msra.mxu1 %v1248_v4  ;;  %1294 = vmatpush.bf16.msra.mxu2 %v1248_v4  ;;  %v1253_v58 = vld [vmem:[%s1787_s1 + $0x40] sm:$0xff]  ;;  %v903_v62 = vld [vmem:[%s1789_s0 + $0x8] sm:$0xf]  ;;  %v1208_v63 = vld [vmem:[%s1789_s0 + $0x18] sm:$0xf0] }
  0x13   :  { %1295 = vmatpush.bf16.msra.mxu3 %v1248_v4  ;;  %584 = vmatpush.bf16.msra.mxu0 %v1248_v4  ;;  %v1269_v59 = vld [vmem:[%s1787_s1 + $0xc0] sm:$0xff]  ;;  %v1206_v0 = vld [vmem:[%s1789_s0 + $0xc] sm:$0xf]  ;;  %v911_v2 = vld [vmem:[%s1789_s0 + $0x10] sm:$0xf] }
  0x14   :  { %v1205_v60 = vld [vmem:[%s1789_s0 + $0x4] sm:$0xf]  ;;  %v905_v1 = vld [vmem:[%s1789_s0 + $0x1c] sm:$0xf0]  ;;  %v1210_v8 = vld [vmem:[%s1789_s0 + $0x2c] sm:$0xf] }
  0x15   :  { %v1209_v3 = vld [vmem:[%s1789_s0 + $0x20] sm:$0xf0]  ;;  %v900_v4 = vor.u32 %v1205_v60, %v897_v61  ;;  %v917_v9 = vld [vmem:[%s1789_s0 + $0x3c] sm:$0xf0]  ;;  %v923_v10 = vld [vmem:[%s1789_s0 + $0x30] sm:$0xf] }
  0x16   :  { %1296 = vmatpush.bf16.msra.mxu1 %v1247_v5  ;;  %1297 = vmatpush.bf16.msra.mxu2 %v1247_v5  ;;  %v1213_v11 = vld [vmem:[%s1789_s0 + $0x40] sm:$0xf0]  ;;  %v1211_v12 = vld [vmem:[%s1789_s0 + $0x34] sm:$0xf]  ;;  %v925_v13 = vld [vmem:[%s1789_s0 + $0x44] sm:$0xf0] }
  0x17   :  { %1298 = vmatpush.bf16.msra.mxu3 %v1247_v5  ;;  %585 = vmatpush.bf16.msra.mxu0 %v1247_v5  ;;  %v904_v5 = vor.u32 %v1208_v63, %v903_v62  ;;  %v931_v14 = vld [vmem:[%s1789_s0 + $0x38] sm:$0xf]  ;;  %v1214_v15 = vld [vmem:[%s1789_s0 + $0x48] sm:$0xf0]  ;;  %v1223_v35 = vld [vmem:[%s1789_s0 + $0x90] sm:$0xf0] }
  0x18   :  { %v1221_v36 = vld [vmem:[%s1789_s0 + $0x84] sm:$0xf]  ;;  %v965_v37 = vld [vmem:[%s1789_s0 + $0x94] sm:$0xf0]  ;;  %v971_v38 = vld [vmem:[%s1789_s0 + $0x88] sm:$0xf] }
  0x19   :  { %v1224_v39 = vld [vmem:[%s1789_s0 + $0x98] sm:$0xf0]  ;;  %v968_v42 = vor.u32 %v1221_v36, %v965_v37  ;;  %v1231_v60 = vld [vmem:[%s1789_s0 + $0xd4] sm:$0xf]  ;;  %v1005_v61 = vld [vmem:[%s1789_s0 + $0xe4] sm:$0xf0] }
  0x1a   :  { %1299 = vmatpush.bf16.msra.mxu1 %v1246_v6  ;;  %1300 = vmatpush.bf16.msra.mxu2 %v1246_v6  ;;  %v1011_v62 = vld [vmem:[%s1789_s0 + $0xd8] sm:$0xf]  ;;  %v1234_v63 = vld [vmem:[%s1789_s0 + $0xe8] sm:$0xf0] }
  0x1b   :  { %1301 = vmatpush.bf16.msra.mxu3 %v1246_v6  ;;  %586 = vmatpush.bf16.msra.mxu0 %v1246_v6  ;;  %v908_v6 = vor.u32 %v1206_v0, %v905_v1 }
  0x1e   :  { %1302 = vmatpush.bf16.msra.mxu1 %v1245_v7  ;;  %1303 = vmatpush.bf16.msra.mxu2 %v1245_v7 }
  0x1f   :  { %1304 = vmatpush.bf16.msra.mxu3 %v1245_v7  ;;  %587 = vmatpush.bf16.msra.mxu0 %v1245_v7  ;;  %v912_v7 = vor.u32 %v1209_v3, %v911_v2  ;;  %v1008_v2 = vor.u32 %v1231_v60, %v1005_v61  ;;  %v1012_v3 = vor.u32 %v1234_v63, %v1011_v62 }
  0x21   :  { %598 = vmatmul.bf16.vlgmr.msra.gmra.mxu1 %v936_v18  ;;  %608 = vmatmul.bf16.vlgmr.msra.gmra.mxu2 %v976_v19  ;;  %v928_v18 = vor.u32 %v1211_v12, %v925_v13  ;;  %v932_v19 = vor.u32 %v1214_v15, %v931_v14 }
  0x22   :  { %678 = vmatpush.bf16.msrb.mxu2 %v1268_v16  ;;  %629 = vmatpush.bf16.msrb.mxu1 %v1260_v17  ;;  %v920_v16 = vor.u32 %v1210_v8, %v917_v9  ;;  %v924_v17 = vor.u32 %v1213_v11, %v923_v10  ;;  %v1236_v8 = vld [vmem:[%s1789_s0 + $0xfc] sm:$0xf]  ;;  %v1025_v9 = vld [vmem:[%s1789_s0 + $0x10c] sm:$0xf0]  ;;  %v1031_v10 = vld [vmem:[%s1789_s0 + $0x100] sm:$0xf] }
  0x23   :  { %618 = vmatmul.bf16.vlgmr.msra.gmra.mxu3 %v1016_v20  ;;  %588 = vmatmul.bf16.vlgmr.msra.gmra.mxu0 %v896_v21  ;;  %v1215_v20 = vld [vmem:[%s1789_s0 + $0x54] sm:$0xf]  ;;  %v937_v21 = vld [vmem:[%s1789_s0 + $0x64] sm:$0xf0]  ;;  %v1028_v15 = vor.u32 %v1236_v8, %v1025_v9 }
  0x24   :  { %727 = vmatpush.bf16.msrb.mxu3 %v1276_v22  ;;  %780 = vmatpush.bf16.msrb.mxu0 %v1280_v23  ;;  %v943_v22 = vld [vmem:[%s1789_s0 + $0x58] sm:$0xf]  ;;  %v1218_v23 = vld [vmem:[%s1789_s0 + $0x68] sm:$0xf0]  ;;  %v1239_v11 = vld [vmem:[%s1789_s0 + $0x110] sm:$0xf0] }
  0x26   :  { %679 = vmatpush.bf16.msrb.mxu2 %v1267_v24  ;;  %630 = vmatpush.bf16.msrb.mxu1 %v1259_v25  ;;  %v1216_v24 = vld [vmem:[%s1789_s0 + $0x5c] sm:$0xf]  ;;  %v945_v25 = vld [vmem:[%s1789_s0 + $0x6c] sm:$0xf0] }
  0x28   :  { %728 = vmatpush.bf16.msrb.mxu3 %v1275_v26  ;;  %781 = vmatpush.bf16.msrb.mxu0 %v1279_v27  ;;  %v951_v26 = vld [vmem:[%s1789_s0 + $0x60] sm:$0xf]  ;;  %v1219_v27 = vld [vmem:[%s1789_s0 + $0x70] sm:$0xf0] }
  0x2a   :  { %680 = vmatpush.bf16.msrb.mxu2 %v1266_v28  ;;  %631 = vmatpush.bf16.msrb.mxu1 %v1258_v29  ;;  %v940_v28 = vor.u32 %v1215_v20, %v937_v21  ;;  %v944_v29 = vor.u32 %v1218_v23, %v943_v22 }
  0x2c   :  { %729 = vmatpush.bf16.msrb.mxu3 %v1274_v30  ;;  %782 = vmatpush.bf16.msrb.mxu0 %v1278_v31  ;;  %v948_v30 = vor.u32 %v1216_v24, %v945_v25  ;;  %v952_v31 = vor.u32 %v1219_v27, %v951_v26  ;;  %v1240_v25 = vld [vmem:[%s1789_s0 + $0x11c] sm:$0xf]  ;;  %v1037_v26 = vld [vmem:[%s1789_s0 + $0x12c] sm:$0xf0]  ;;  %v1043_v27 = vld [vmem:[%s1789_s0 + $0x120] sm:$0xf] }
  0x2d   :  { %v1040_v36 = vor.u32 %v1240_v25, %v1037_v26 }
  0x2e   :  { %681 = vmatpush.bf16.msrb.mxu2 %v1265_v32  ;;  %632 = vmatpush.bf16.msrb.mxu1 %v1257_v33  ;;  %v1220_v32 = vld [vmem:[%s1789_s0 + $0x7c] sm:$0xf]  ;;  %v957_v33 = vld [vmem:[%s1789_s0 + $0x8c] sm:$0xf0] }
  0x2f   :  { %v960_v40 = vor.u32 %v1220_v32, %v957_v33  ;;  %v1244_v32 = vld [vmem:[%s1789_s0 + $0x138] sm:$0xf0] }
  0x30   :  { %730 = vmatpush.bf16.msrb.mxu3 %v1273_v34  ;;  %783 = vmatpush.bf16.msrb.mxu0 %v1277_v43  ;;  %v963_v34 = vld [vmem:[%s1789_s0 + $0x80] sm:$0xf]  ;;  %v972_v43 = vor.u32 %v1224_v39, %v971_v38 }
  0x31   :  { %603 = vmatmul.bf16.gmra.mxu1 %v956_v46  ;;  %613 = vmatmul.bf16.gmra.mxu2 %v996_v47  ;;  %v964_v41 = vor.u32 %v1223_v35, %v963_v34  ;;  %v983_v46 = vld [vmem:[%s1789_s0 + $0xa8] sm:$0xf]  ;;  %v1228_v47 = vld [vmem:[%s1789_s0 + $0xb8] sm:$0xf0] }
  0x32   :  { %682 = vmatpush.bf16.msrb.mxu2 %v1264_v44  ;;  %633 = vmatpush.bf16.msrb.mxu1 %v1256_v45  ;;  %v1225_v44 = vld [vmem:[%s1789_s0 + $0xa4] sm:$0xf]  ;;  %v977_v45 = vld [vmem:[%s1789_s0 + $0xb4] sm:$0xf0] }
  0x33   :  { %623 = vmatmul.bf16.gmra.mxu3 %v1036_v48  ;;  %593 = vmatmul.bf16.gmra.mxu0 %v916_v49  ;;  %v1226_v48 = vld [vmem:[%s1789_s0 + $0xac] sm:$0xf]  ;;  %v985_v49 = vld [vmem:[%s1789_s0 + $0xbc] sm:$0xf0] }
  0x34   :  { %731 = vmatpush.bf16.msrb.mxu3 %v1272_v50  ;;  %v991_v50 = vld [vmem:[%s1789_s0 + $0xb0] sm:$0xf] }
  0x36   :  { %683 = vmatpush.bf16.msrb.mxu2 %v1263_v51  ;;  %634 = vmatpush.bf16.msrb.mxu1 %v1255_v52  ;;  %v1229_v51 = vld [vmem:[%s1789_s0 + $0xc0] sm:$0xf0]  ;;  %v980_v52 = vor.u32 %v1225_v44, %v977_v45 }
  0x38   :  { %732 = vmatpush.bf16.msrb.mxu3 %v1271_v53  ;;  %v984_v53 = vor.u32 %v1228_v47, %v983_v46 }
  0x3a   :  { %684 = vmatpush.bf16.msrb.mxu2 %v1262_v54  ;;  %635 = vmatpush.bf16.msrb.mxu1 %v1254_v55  ;;  %v988_v54 = vor.u32 %v1226_v48, %v985_v49  ;;  %v992_v55 = vor.u32 %v1229_v51, %v991_v50 }
  0x3c   :  { %733 = vmatpush.bf16.msrb.mxu3 %v1270_v56  ;;  %v1230_v56 = vld [vmem:[%s1789_s0 + $0xcc] sm:$0xf] }
  0x3e   :  { %685 = vmatpush.bf16.msrb.mxu2 %v1261_v57  ;;  %636 = vmatpush.bf16.msrb.mxu1 %v1253_v58  ;;  %v997_v57 = vld [vmem:[%s1789_s0 + $0xdc] sm:$0xf0]  ;;  %v1003_v58 = vld [vmem:[%s1789_s0 + $0xd0] sm:$0xf] }
  0x3f   :  { %v1000_v0 = vor.u32 %v1230_v56, %v997_v57 }
  0x40   :  { %734 = vmatpush.bf16.msrb.mxu3 %v1269_v59  ;;  %v1233_v59 = vld [vmem:[%s1789_s0 + $0xe0] sm:$0xf0] }
  0x41   :  { %637 = vmatmul.bf16.vlgmr.msrb.gmra.mxu1 %v900_v4  ;;  %686 = vmatmul.bf16.vlgmr.msrb.gmra.mxu2 %v904_v5  ;;  %v1004_v1 = vor.u32 %v1233_v59, %v1003_v58  ;;  %v1235_v4 = vld [vmem:[%s1789_s0 + $0xf4] sm:$0xf]  ;;  %v1017_v5 = vld [vmem:[%s1789_s0 + $0x104] sm:$0xf0] }
  0x42   :  { %v1020_v12 = vor.u32 %v1235_v4, %v1017_v5 }
  0x43   :  { %735 = vmatmul.bf16.vlgmr.msrb.gmra.mxu3 %v908_v6  ;;  %1197 = vmatmul.msk.bf16.vlgmr.msrb.gmra.mxu0 %vm555_vm0, %v912_v7  ;;  %v1023_v6 = vld [vmem:[%s1789_s0 + $0xf8] sm:$0xf]  ;;  %v1238_v7 = vld [vmem:[%s1789_s0 + $0x108] sm:$0xf0] }
  0x44   :  { %v1024_v13 = vor.u32 %v1238_v7, %v1023_v6 }
  0x51   :  { %642 = vmatmul.bf16.gmra.mxu1 %v920_v16  ;;  %691 = vmatmul.bf16.gmra.mxu2 %v924_v17  ;;  %v1032_v16 = vor.u32 %v1239_v11, %v1031_v10 }
  0x53   :  { %740 = vmatmul.bf16.gmra.mxu3 %v928_v18  ;;  %1198 = vmatmul.msk.bf16.gmra.mxu0 %vm555_vm0, %v932_v19  ;;  %v1662_v18 = vld [vmem:[%s1788_s2] ss:$0 sm:$0xff] }
  0x61   :  { %647 = vmatmul.bf16.gmra.mxu1 %v940_v28  ;;  %696 = vmatmul.bf16.gmra.mxu2 %v944_v29  ;;  %v1243_v28 = vld [vmem:[%s1789_s0 + $0x130] sm:$0xf0]  ;;  %v1241_v29 = vld [vmem:[%s1789_s0 + $0x124] sm:$0xf] }
  0x62   :  { %v1044_v37 = vor.u32 %v1243_v28, %v1043_v27 }
  0x63   :  { %745 = vmatmul.bf16.gmra.mxu3 %v948_v30  ;;  %1199 = vmatmul.msk.bf16.gmra.mxu0 %vm555_vm0, %v952_v31  ;;  %v1045_v30 = vld [vmem:[%s1789_s0 + $0x134] sm:$0xf0]  ;;  %v1051_v31 = vld [vmem:[%s1789_s0 + $0x128] sm:$0xf] }
  0x71   :  { %652 = vmatmul.bf16.gmra.mxu1 %v960_v40  ;;  %701 = vmatmul.bf16.gmra.mxu2 %v964_v41  ;;  %v1048_v40 = vor.u32 %v1241_v29, %v1045_v30  ;;  %v1052_v41 = vor.u32 %v1244_v32, %v1051_v31 }
  0x73   :  { %750 = vmatmul.bf16.gmra.mxu3 %v968_v42  ;;  %1200 = vmatmul.msk.bf16.gmra.mxu0 %vm555_vm0, %v972_v43 }
  0x81   :  { %657 = vmatmul.bf16.gmra.mxu1 %v980_v52  ;;  %706 = vmatmul.bf16.gmra.mxu2 %v984_v53 }
  0x83   :  { %755 = vmatmul.bf16.gmra.mxu3 %v988_v54  ;;  %1201 = vmatmul.msk.bf16.gmra.mxu0 %vm555_vm0, %v992_v55 }
  0x91   :  { %662 = vmatmul.bf16.gmra.mxu1 %v1000_v0  ;;  %711 = vmatmul.bf16.gmra.mxu2 %v1004_v1 }
  0x93   :  { %760 = vmatmul.bf16.gmra.mxu3 %v1008_v2  ;;  %1202 = vmatmul.msk.bf16.gmra.mxu0 %vm555_vm0, %v1012_v3 }
  0x9e   :  { %v1656_v14 = vpop.f32.mrf.mxu1 }
  0xa0   :  { %v589_v17 = vpop.f32.mrf.mxu0 }
  0xa1   :  { %667 = vmatmul.bf16.gmra.mxu1 %v1020_v12  ;;  %716 = vmatmul.bf16.gmra.mxu2 %v1024_v13  ;;  %v590_v55 = vadd.f32 %v1662_v18, %v589_v17 }
  0xa3   :  { %765 = vmatmul.bf16.gmra.mxu3 %v1028_v15  ;;  %1203 = vmatmul.msk.bf16.gmra.mxu0 %vm555_vm0, %v1032_v16 }
  0xa4   :  { %v609_v19 = vpop.f32.mrf.mxu2 }
  0xa5   :  { %v1665_v20 = vadd.f32 %v1662_v18, %v609_v19 }
  0xa6   :  { %v619_v21 = vpop.f32.mrf.mxu3  ;;  %v1670_v23 = vpop.f32.mrf.mxu1 }
  0xa7   :  { %v1668_v22 = vadd.f32 %v1662_v18, %v619_v21 }
  0xa8   :  { %v591_v24 = vpop.f32.mrf.mxu0 }
  0xa9   :  { %v592_v63 = vadd.f32 %v1662_v18, %v591_v24 }
  0xac   :  { %v611_v33 = vpop.f32.mrf.mxu2 }
  0xad   :  { %v1697_v34 = vadd.f32 %v1662_v18, %v611_v33 }
  0xae   :  { %v621_v35 = vpop.f32.mrf.mxu3  ;;  %v1702_v39 = vpop.f32.mrf.mxu1 }
  0xaf   :  { %v1700_v38 = vadd.f32 %v1662_v18, %v621_v35 }
  0xb0   :  { %v594_v42 = vpop.f32.mrf.mxu0 }
  0xb1   :  { %672 = vmatmul.bf16.gmra.mxu1 %v1040_v36  ;;  %721 = vmatmul.bf16.gmra.mxu2 %v1044_v37  ;;  %v595_v10 = vadd.f32 %v1662_v18, %v594_v42 }
  0xb3   :  { %770 = vmatmul.bf16.gmra.mxu3 %v1048_v40  ;;  %1204 = vmatmul.msk.bf16.gmra.mxu0 %vm555_vm0, %v1052_v41  ;;  %v600_v40 = vadd.f32 %v1662_v18, %v1656_v14 }
  0xb4   :  { %v614_v43 = vpop.f32.mrf.mxu2 }
  0xb5   :  { %v1706_v44 = vadd.f32 %v1662_v18, %v614_v43 }
  0xb6   :  { %v624_v45 = vpop.f32.mrf.mxu3  ;;  %v1711_v47 = vpop.f32.mrf.mxu1 }
  0xb7   :  { %v1709_v46 = vadd.f32 %v1662_v18, %v624_v45 }
  0xb8   :  { %v596_v48 = vpop.f32.mrf.mxu0 }
  0xb9   :  { %v597_v26 = vadd.f32 %v1662_v18, %v596_v48 }
  0xbc   :  { %v616_v49 = vpop.f32.mrf.mxu2 }
  0xbd   :  { %v1714_v50 = vadd.f32 %v1662_v18, %v616_v49 }
  0xbe   :  { %v626_v51 = vpop.f32.mrf.mxu3  ;;  %v638_v53 = vpop.f32.mrf.mxu1 }
  0xbf   :  { %v1717_v52 = vadd.f32 %v1662_v18, %v626_v51  ;;  %v639_v56 = vadd.f32 %v638_v53, %v590_v55 }
  0xc0   :  { %v785_v54 = vpop.f32.mrf.mxu0 }
  0xc4   :  { %v687_v57 = vpop.f32.mrf.mxu2 }
  0xc5   :  { %v688_v58 = vadd.f32 %v687_v57, %v639_v56  ;;  %v602_v56 = vadd.f32 %v1662_v18, %v1670_v23 }
  0xc6   :  { %v736_v59 = vpop.f32.mrf.mxu3  ;;  %v640_v60 = vpop.f32.mrf.mxu1 }
  0xc7   :  { %v737_v61 = vadd.f32 %v736_v59, %v688_v58  ;;  %v641_v2 = vadd.f32 %v640_v60, %v592_v63 }
  0xc8   :  { %v787_v62 = vpop.f32.mrf.mxu0 }
  0xc9   :  { %v786_v0 = vadd.f32 %v785_v54, %v737_v61 }
  0xcb   :  { %vm825_vm1 = vcmp.ge.f32.partialorder %v786_v0, 0.0  ;;  %v841_v1 = vmul.f32 0.1, %v786_v0 }
  0xcc   :  { %v689_v3 = vpop.f32.mrf.mxu2 }
  0xcd   :  { %v857_v4 = vsel %vm825_vm1, %v786_v0, %v841_v1  ;;  %v690_v5 = vadd.f32 %v689_v3, %v641_v2  ;;  %v605_v2 = vadd.f32 %v1662_v18, %v1702_v39 }
  0xce   :  { %v738_v6 = vpop.f32.mrf.mxu3  ;;  %873 = vst [vmem:[%s1790_s3] sm:$0xff] %v857_v4  ;;  %v643_v7 = vpop.f32.mrf.mxu1 }
  0xcf   :  { %v739_v8 = vadd.f32 %v738_v6, %v690_v5  ;;  %v644_v13 = vadd.f32 %v643_v7, %v595_v10 }
  0xd0   :  { %v790_v9 = vpop.f32.mrf.mxu0 }
  0xd1   :  { %v788_v11 = vadd.f32 %v787_v62, %v739_v8 }
  0xd3   :  { %vm826_vm2 = vcmp.ge.f32.partialorder %v788_v11, 0.0  ;;  %v842_v12 = vmul.f32 0.1, %v788_v11 }
  0xd4   :  { %v692_v15 = vpop.f32.mrf.mxu2 }
  0xd5   :  { %v858_v16 = vsel %vm826_vm2, %v788_v11, %v842_v12  ;;  %v693_v17 = vadd.f32 %v692_v15, %v644_v13  ;;  %v607_v12 = vadd.f32 %v1662_v18, %v1711_v47 }
  0xd6   :  { %v741_v19 = vpop.f32.mrf.mxu3  ;;  %874 = vst [vmem:[%s1790_s3 + $0x8] sm:$0xff] %v858_v16  ;;  %v645_v21 = vpop.f32.mrf.mxu1 }
  0xd7   :  { %v742_v24 = vadd.f32 %v741_v19, %v693_v17  ;;  %v646_v29 = vadd.f32 %v645_v21, %v597_v26 }
  0xd8   :  { %v792_v25 = vpop.f32.mrf.mxu0 }
  0xd9   :  { %v791_v27 = vadd.f32 %v790_v9, %v742_v24 }
  0xdb   :  { %vm827_vm3 = vcmp.ge.f32.partialorder %v791_v27, 0.0  ;;  %v843_v28 = vmul.f32 0.1, %v791_v27 }
  0xdc   :  { %v694_v30 = vpop.f32.mrf.mxu2 }
  0xdd   :  { %v859_v31 = vsel %vm827_vm3, %v791_v27, %v843_v28  ;;  %v695_v32 = vadd.f32 %v694_v30, %v646_v29 }
  0xde   :  { %v743_v33 = vpop.f32.mrf.mxu3  ;;  %875 = vst [vmem:[%s1790_s3 + $0x10] sm:$0xff] %v859_v31  ;;  %v648_v35 = vpop.f32.mrf.mxu1 }
  0xdf   :  { %v744_v36 = vadd.f32 %v743_v33, %v695_v32  ;;  %v649_v43 = vadd.f32 %v648_v35, %v600_v40 }
  0xe0   :  { %v795_v37 = vpop.f32.mrf.mxu0 }
  0xe1   :  { %v793_v41 = vadd.f32 %v792_v25, %v744_v36 }
  0xe3   :  { %vm828_vm4 = vcmp.ge.f32.partialorder %v793_v41, 0.0  ;;  %v844_v42 = vmul.f32 0.1, %v793_v41 }
  0xe4   :  { %v697_v45 = vpop.f32.mrf.mxu2 }
  0xe5   :  { %v860_v48 = vsel %vm828_vm4, %v793_v41, %v844_v42  ;;  %v698_v49 = vadd.f32 %v697_v45, %v649_v43 }
  0xe6   :  { %v746_v51 = vpop.f32.mrf.mxu3  ;;  %876 = vst [vmem:[%s1790_s3 + $0x18] sm:$0xff] %v860_v48  ;;  %v650_v53 = vpop.f32.mrf.mxu1 }
  0xe7   :  { %v747_v54 = vadd.f32 %v746_v51, %v698_v49  ;;  %v651_v58 = vadd.f32 %v650_v53, %v602_v56 }
  0xe8   :  { %v797_v55 = vpop.f32.mrf.mxu0 }
  0xe9   :  { %v796_v57 = vadd.f32 %v795_v37, %v747_v54 }
  0xeb   :  { %vm829_vm5 = vcmp.ge.f32.partialorder %v796_v57, 0.0  ;;  %v845_v14 = vmul.f32 0.1, %v796_v57 }
  0xec   :  { %v699_v59 = vpop.f32.mrf.mxu2 }
  0xed   :  { %v861_v60 = vsel %vm829_vm5, %v796_v57, %v845_v14  ;;  %v700_v61 = vadd.f32 %v699_v59, %v651_v58 }
  0xee   :  { %v748_v62 = vpop.f32.mrf.mxu3  ;;  %877 = vst [vmem:[%s1790_s3 + $0x20] sm:$0xff] %v861_v60  ;;  %v653_v63 = vpop.f32.mrf.mxu1 }
  0xef   :  { %v749_v0 = vadd.f32 %v748_v62, %v700_v61  ;;  %v654_v4 = vadd.f32 %v653_v63, %v605_v2 }
  0xf0   :  { %v800_v1 = vpop.f32.mrf.mxu0 }
  0xf1   :  { %v798_v3 = vadd.f32 %v797_v55, %v749_v0 }
  0xf3   :  { %vm830_vm6 = vcmp.ge.f32.partialorder %v798_v3, 0.0  ;;  %v846_v23 = vmul.f32 0.1, %v798_v3 }
  0xf4   :  { %v702_v5 = vpop.f32.mrf.mxu2 }
  0xf5   :  { %v862_v6 = vsel %vm830_vm6, %v798_v3, %v846_v23  ;;  %v703_v7 = vadd.f32 %v702_v5, %v654_v4 }
  0xf6   :  { %v751_v8 = vpop.f32.mrf.mxu3  ;;  %878 = vst [vmem:[%s1790_s3 + $0x28] sm:$0xff] %v862_v6  ;;  %v655_v9 = vpop.f32.mrf.mxu1 }
  0xf7   :  { %v752_v10 = vadd.f32 %v751_v8, %v703_v7  ;;  %v656_v15 = vadd.f32 %v655_v9, %v607_v12 }
  0xf8   :  { %v802_v11 = vpop.f32.mrf.mxu0 }
  0xf9   :  { %v801_v13 = vadd.f32 %v800_v1, %v752_v10 }
  0xfb   :  { %vm831_vm7 = vcmp.ge.f32.partialorder %v801_v13, 0.0  ;;  %v847_v39 = vmul.f32 0.1, %v801_v13 }
  0xfc   :  { %v704_v16 = vpop.f32.mrf.mxu2 }
  0xfd   :  { %v863_v17 = vsel %vm831_vm7, %v801_v13, %v847_v39  ;;  %v705_v19 = vadd.f32 %v704_v16, %v656_v15 }
  0xfe   :  { %v753_v21 = vpop.f32.mrf.mxu3  ;;  %879 = vst [vmem:[%s1790_s3 + $0x30] sm:$0xff] %v863_v17  ;;  %v658_v24 = vpop.f32.mrf.mxu1 }
  0xff   :  { %v754_v25 = vadd.f32 %v753_v21, %v705_v19  ;;  %v659_v18 = vadd.f32 %v658_v24, %v1665_v20 }
 0x100   :  { %v805_v26 = vpop.f32.mrf.mxu0 }
 0x101   :  { %v803_v27 = vadd.f32 %v802_v11, %v754_v25 }
 0x103   :  { %vm832_vm8 = vcmp.ge.f32.partialorder %v803_v27, 0.0  ;;  %v848_v28 = vmul.f32 0.1, %v803_v27 }
 0x104   :  { %v707_v47 = vpop.f32.mrf.mxu2 }
 0x105   :  { %v864_v29 = vsel %vm832_vm8, %v803_v27, %v848_v28  ;;  %v708_v30 = vadd.f32 %v707_v47, %v659_v18 }
 0x106   :  { %v756_v31 = vpop.f32.mrf.mxu3  ;;  %880 = vst [vmem:[%s1790_s3 + $0x38] sm:$0xff] %v864_v29  ;;  %v660_v32 = vpop.f32.mrf.mxu1 }
 0x107   :  { %v757_v33 = vadd.f32 %v756_v31, %v708_v30  ;;  %v661_v40 = vadd.f32 %v660_v32, %v1697_v34 }
 0x108   :  { %v807_v35 = vpop.f32.mrf.mxu0 }
 0x109   :  { %v806_v36 = vadd.f32 %v805_v26, %v757_v33 }
 0x10b   :  { %vm833_vm9 = vcmp.ge.f32.partialorder %v806_v36, 0.0  ;;  %v849_v37 = vmul.f32 0.1, %v806_v36 }
 0x10c   :  { %v709_v41 = vpop.f32.mrf.mxu2 }
 0x10d   :  { %v865_v42 = vsel %vm833_vm9, %v806_v36, %v849_v37  ;;  %v710_v43 = vadd.f32 %v709_v41, %v661_v40 }
 0x10e   :  { %v758_v20 = vpop.f32.mrf.mxu3  ;;  %881 = vst [vmem:[%s1790_s3 + $0x40] sm:$0xff] %v865_v42  ;;  %v663_v45 = vpop.f32.mrf.mxu1 }
 0x10f   :  { %v759_v48 = vadd.f32 %v758_v20, %v710_v43  ;;  %v664_v54 = vadd.f32 %v663_v45, %v1706_v44 }
 0x110   :  { %v810_v49 = vpop.f32.mrf.mxu0 }
 0x111   :  { %v808_v51 = vadd.f32 %v807_v35, %v759_v48 }
 0x113   :  { %vm834_vm10 = vcmp.ge.f32.partialorder %v808_v51, 0.0  ;;  %v850_v53 = vmul.f32 0.1, %v808_v51 }
 0x114   :  { %v712_v55 = vpop.f32.mrf.mxu2 }
 0x115   :  { %v866_v56 = vsel %vm834_vm10, %v808_v51, %v850_v53  ;;  %v713_v57 = vadd.f32 %v712_v55, %v664_v54 }
 0x116   :  { %v761_v34 = vpop.f32.mrf.mxu3  ;;  %882 = vst [vmem:[%s1790_s3 + $0x48] sm:$0xff] %v866_v56  ;;  %v665_v14 = vpop.f32.mrf.mxu1 }
 0x117   :  { %v762_v58 = vadd.f32 %v761_v34, %v713_v57  ;;  %v666_v62 = vadd.f32 %v665_v14, %v1714_v50 }
 0x118   :  { %v812_v59 = vpop.f32.mrf.mxu0 }
 0x119   :  { %v811_v60 = vadd.f32 %v810_v49, %v762_v58 }
 0x11b   :  { %vm835_vm11 = vcmp.ge.f32.partialorder %v811_v60, 0.0  ;;  %v851_v61 = vmul.f32 0.1, %v811_v60 }
 0x11c   :  { %v714_v63 = vpop.f32.mrf.mxu2 }
 0x11d   :  { %v867_v0 = vsel %vm835_vm11, %v811_v60, %v851_v61  ;;  %v715_v1 = vadd.f32 %v714_v63, %v666_v62 }
 0x11e   :  { %v763_v44 = vpop.f32.mrf.mxu3  ;;  %883 = vst [vmem:[%s1790_s3 + $0x50] sm:$0xff] %v867_v0  ;;  %v668_v2 = vpop.f32.mrf.mxu1 }
 0x11f   :  { %v764_v3 = vadd.f32 %v763_v44, %v715_v1  ;;  %v669_v6 = vadd.f32 %v668_v2, %v1668_v22 }
 0x120   :  { %v815_v4 = vpop.f32.mrf.mxu0 }
 0x121   :  { %v813_v23 = vadd.f32 %v812_v59, %v764_v3 }
 0x123   :  { %vm836_vm12 = vcmp.ge.f32.partialorder %v813_v23, 0.0  ;;  %v852_v5 = vmul.f32 0.1, %v813_v23 }
 0x124   :  { %v717_v7 = vpop.f32.mrf.mxu2 }
 0x125   :  { %v868_v8 = vsel %vm836_vm12, %v813_v23, %v852_v5  ;;  %v718_v9 = vadd.f32 %v717_v7, %v669_v6 }
 0x126   :  { %v766_v50 = vpop.f32.mrf.mxu3  ;;  %884 = vst [vmem:[%s1790_s3 + $0x58] sm:$0xff] %v868_v8  ;;  %v670_v10 = vpop.f32.mrf.mxu1 }
 0x127   :  { %v767_v11 = vadd.f32 %v766_v50, %v718_v9  ;;  %v671_v39 = vadd.f32 %v670_v10, %v1700_v38 }
 0x128   :  { %v817_v15 = vpop.f32.mrf.mxu0 }
 0x129   :  { %v816_v12 = vadd.f32 %v815_v4, %v767_v11 }
 0x12b   :  { %vm837_vm13 = vcmp.ge.f32.partialorder %v816_v12, 0.0  ;;  %v853_v13 = vmul.f32 0.1, %v816_v12 }
 0x12c   :  { %v719_v16 = vpop.f32.mrf.mxu2 }
 0x12d   :  { %v869_v17 = vsel %vm837_vm13, %v816_v12, %v853_v13  ;;  %v720_v19 = vadd.f32 %v719_v16, %v671_v39 }
 0x12e   :  { %v768_v22 = vpop.f32.mrf.mxu3  ;;  %885 = vst [vmem:[%s1790_s3 + $0x60] sm:$0xff] %v869_v17  ;;  %v673_v21 = vpop.f32.mrf.mxu1 }
 0x12f   :  { %v769_v24 = vadd.f32 %v768_v22, %v720_v19  ;;  %v674_v27 = vadd.f32 %v673_v21, %v1709_v46 }
 0x130   :  { %v820_v29 = vpop.f32.mrf.mxu0 }
 0x131   :  { %v818_v25 = vadd.f32 %v817_v15, %v769_v24 }
 0x133   :  { %vm838_vm14 = vcmp.ge.f32.partialorder %v818_v25, 0.0  ;;  %v854_v26 = vmul.f32 0.1, %v818_v25 }
 0x134   :  { %v722_v28 = vpop.f32.mrf.mxu2 }
 0x135   :  { %v870_v18 = vsel %vm838_vm14, %v818_v25, %v854_v26  ;;  %v723_v47 = vadd.f32 %v722_v28, %v674_v27 }
 0x136   :  { %v771_v38 = vpop.f32.mrf.mxu3  ;;  %886 = vst [vmem:[%s1790_s3 + $0x68] sm:$0xff] %v870_v18  ;;  %v675_v31 = vpop.f32.mrf.mxu1 }
 0x137   :  { %v772_v30 = vadd.f32 %v771_v38, %v723_v47  ;;  %v676_v35 = vadd.f32 %v675_v31, %v1717_v52 }
 0x138   :  { %v822_v42 = vpop.f32.mrf.mxu0 }
 0x139   :  { %v821_v32 = vadd.f32 %v820_v29, %v772_v30 }
 0x13b   :  { %vm839_vm15 = vcmp.ge.f32.partialorder %v821_v32, 0.0  ;;  %v855_v33 = vmul.f32 0.1, %v821_v32 }
 0x13c   :  { %v724_v36 = vpop.f32.mrf.mxu2 }
 0x13d   :  { %v871_v37 = vsel %vm839_vm15, %v821_v32, %v855_v33  ;;  %v725_v40 = vadd.f32 %v724_v36, %v676_v35 }
 0x13e   :  { %887 = vst [vmem:[%s1790_s3 + $0x70] sm:$0xff] %v871_v37  ;;  %v773_v46 = vpop.f32.mrf.mxu3 }
 0x13f   :  { %v774_v41 = vadd.f32 %v773_v46, %v725_v40 }
 0x141   :  { %v823_v43 = vadd.f32 %v822_v42, %v774_v41 }
 0x143   :  { %vm840_vm0 = vcmp.ge.f32.partialorder %v823_v43, 0.0  ;;  %v856_v20 = vmul.f32 0.1, %v823_v43 }
 0x145   :  { %v872_v45 = vsel %vm840_vm0, %v823_v43, %v856_v20 }
 0x146   :  { %888 = vst [vmem:[%s1790_s3 + $0x78] sm:$0xff] %v872_v45 }

// kernel: hour_glass_prop_forward.9
= control target key start
LH: loop header
LB: loop body
LE: loop exit
PB: predicated region body
PF: predicated region fallthrough
CT: control target
= control target key end

     0   :  { %s768_s12 = smov 0   ;;  %s915_s0 = inlined_call_operand.vmem [shape: bf16[512,100], index: 0, kind: input, shape index: {}]   ;;  %s916_s1 = inlined_call_operand.vmem [shape: bf16[100,128], index: 1, kind: input, shape index: {}]   ;;  %s917_s2 = inlined_call_operand.vmem [shape: f32[1,128], index: 2, kind: input, shape index: {}]   ;;  %s918_s3 = inlined_call_operand.vmem [shape: f32[512,128], index: 3, kind: output, shape index: {}]  }
   0x1 LB: > { %s573_s13 = sadd.s32 4294967295, %s746_s12   ;;  %p577_p0 = scmp.ge.s32.totalorder %s746_s12, 1  ;;  %s746_s12 = sphi %s768_s12, %s13_s12  }
   0x2   : > { %p138_p1 = scmp.lt.s32.totalorder %s746_s12, 3 }
   0x4   : > { %p139_p2 = pnand %p577_p0, %p138_p1 }
   0x5   : > { %s578_s20 = sshll.u32 (!%p139_p2), %s573_s13, 5 }
   0x6   : > { %142 = sbr.rel (%p139_p2) target bundleno = 237 (0xed), region = 32  ;;  %p163_p3 = scmp.lt.s32.totalorder (!%p139_p2), %s578_s20, 63 }
   0xb   : > { %v219_v0 = vld [vmem:[%s916_s1 + $0x30] sm:$0x3]  ;;  %vm392_vm0 = vcmask 1041408   ;;  %v709_v4 = vld [vmem:[%s916_s1 + $0x28] sm:$0xff]  ;;  %v708_v5 = vld [vmem:[%s916_s1 + $0x20] sm:$0xff]  ;;  %s920_s20 = smov (!%p163_p3, %s578_s20), 63 }
   0xc   : > { %v329_v1 = vunpack.c.l.b16 %v219_v0  ;;  %v707_v6 = vld [vmem:[%s916_s1 + $0x18] sm:$0xff]  ;;  %v706_v7 = vld [vmem:[%s916_s1 + $0x10] sm:$0xff]  ;;  %v705_v8 = vld [vmem:[%s916_s1 + $0x8] sm:$0xff]  ;;  %s579_s27 = sshll.u32 %s920_s20, 2  ;;  %vm343_vm1 = vcmask 818176   ;;  %s581_s6 = sshll.u32 %s920_s20, 3 }
   0xd   : > { %v704_v9 = vld [vmem:[%s916_s1] sm:$0xff]  ;;  %s803_s5 = scalar_lea.vmem %s915_s0, %s579_s27  ;;  %s846_s11 = scalar_lea.vmem %s918_s3, %s581_s6 }
   0xe   : > { %v336_v2 = vpack.c.b16 %v329_v1, %v329_v1  ;;  %v688_v10 = vld [vmem:[%s803_s5] sm:$0xff]  ;;  %v689_v14 = vld [vmem:[%s803_s5 + $0x8] sm:$0xff]  ;;  %v690_v18 = vld [vmem:[%s803_s5 + $0x10] sm:$0xff] }
   0xf   : > { %v692_v11 = vld [vmem:[%s803_s5 + $0x20] sm:$0xff]  ;;  %v693_v15 = vld [vmem:[%s803_s5 + $0x28] sm:$0xff]  ;;  %v694_v19 = vld [vmem:[%s803_s5 + $0x30] sm:$0xff] }
  0x10   : > { %v394_v3 = vsel %vm392_vm0, %v336_v2, 0  ;;  %v696_v12 = vld [vmem:[%s803_s5 + $0x40] sm:$0xff]  ;;  %v697_v16 = vld [vmem:[%s803_s5 + $0x48] sm:$0xff]  ;;  %v698_v20 = vld [vmem:[%s803_s5 + $0x50] sm:$0xff] }
  0x11   : > { %397 = vmatpush.bf16.msra.mxu0 %v394_v3  ;;  %710 = vmatpush.bf16.msra.mxu1 %v394_v3  ;;  %v700_v13 = vld [vmem:[%s803_s5 + $0x60] sm:$0xff]  ;;  %v701_v17 = vld [vmem:[%s803_s5 + $0x68] sm:$0xff]  ;;  %v702_v21 = vld [vmem:[%s803_s5 + $0x70] sm:$0xff] }
  0x12   : > { %711 = vmatpush.bf16.msra.mxu2 %v394_v3  ;;  %712 = vmatpush.bf16.msra.mxu3 %v394_v3  ;;  %v691_v22 = vld [vmem:[%s803_s5 + $0x18] sm:$0xff]  ;;  %v841_v26 = vld [vmem:[%s917_s2] ss:$0 sm:$0xff] }
  0x13   : > { %v695_v23 = vld [vmem:[%s803_s5 + $0x38] sm:$0xff] }
  0x14   : > { %v699_v24 = vld [vmem:[%s803_s5 + $0x58] sm:$0xff] }
  0x15   : > { %398 = vmatpush.bf16.msra.mxu0 %v709_v4  ;;  %713 = vmatpush.bf16.msra.mxu1 %v709_v4  ;;  %v703_v25 = vld [vmem:[%s803_s5 + $0x78] sm:$0xff] }
  0x16   : > { %714 = vmatpush.bf16.msra.mxu2 %v709_v4  ;;  %715 = vmatpush.bf16.msra.mxu3 %v709_v4 }
  0x19   : > { %399 = vmatpush.bf16.msra.mxu0 %v708_v5  ;;  %716 = vmatpush.bf16.msra.mxu1 %v708_v5 }
  0x1a   : > { %717 = vmatpush.bf16.msra.mxu2 %v708_v5  ;;  %718 = vmatpush.bf16.msra.mxu3 %v708_v5 }
  0x1d   : > { %400 = vmatpush.bf16.msra.mxu0 %v707_v6  ;;  %719 = vmatpush.bf16.msra.mxu1 %v707_v6 }
  0x1e   : > { %720 = vmatpush.bf16.msra.mxu2 %v707_v6  ;;  %721 = vmatpush.bf16.msra.mxu3 %v707_v6 }
  0x21   : > { %401 = vmatpush.bf16.msra.mxu0 %v706_v7  ;;  %722 = vmatpush.bf16.msra.mxu1 %v706_v7 }
  0x22   : > { %723 = vmatpush.bf16.msra.mxu2 %v706_v7  ;;  %724 = vmatpush.bf16.msra.mxu3 %v706_v7 }
  0x25   : > { %402 = vmatpush.bf16.msra.mxu0 %v705_v8  ;;  %725 = vmatpush.bf16.msra.mxu1 %v705_v8 }
  0x26   : > { %726 = vmatpush.bf16.msra.mxu2 %v705_v8  ;;  %727 = vmatpush.bf16.msra.mxu3 %v705_v8 }
  0x29   : > { %403 = vmatpush.bf16.msra.mxu0 %v704_v9  ;;  %728 = vmatpush.bf16.msra.mxu1 %v704_v9 }
  0x2a   : > { %729 = vmatpush.bf16.msra.mxu2 %v704_v9  ;;  %730 = vmatpush.bf16.msra.mxu3 %v704_v9 }
  0x2c   : > { %670 = vmatmul.msk.bf16.vlgmr.msra.gmra.mxu0 %vm343_vm1, %v688_v10  ;;  %674 = vmatmul.msk.bf16.vlgmr.msra.gmra.mxu1 %vm343_vm1, %v692_v11 }
  0x2d   : > { %678 = vmatmul.msk.bf16.vlgmr.msra.gmra.mxu2 %vm343_vm1, %v696_v12  ;;  %682 = vmatmul.msk.bf16.vlgmr.msra.gmra.mxu3 %vm343_vm1, %v700_v13 }
  0x3c   : > { %671 = vmatmul.msk.bf16.gmra.mxu0 %vm343_vm1, %v689_v14  ;;  %675 = vmatmul.msk.bf16.gmra.mxu1 %vm343_vm1, %v693_v15 }
  0x3d   : > { %679 = vmatmul.msk.bf16.gmra.mxu2 %vm343_vm1, %v697_v16  ;;  %683 = vmatmul.msk.bf16.gmra.mxu3 %vm343_vm1, %v701_v17 }
  0x4c   : > { %672 = vmatmul.msk.bf16.gmra.mxu0 %vm343_vm1, %v690_v18  ;;  %676 = vmatmul.msk.bf16.gmra.mxu1 %vm343_vm1, %v694_v19 }
  0x4d   : > { %680 = vmatmul.msk.bf16.gmra.mxu2 %vm343_vm1, %v698_v20  ;;  %684 = vmatmul.msk.bf16.gmra.mxu3 %vm343_vm1, %v702_v21 }
  0x5c   : > { %673 = vmatmul.msk.bf16.gmra.mxu0 %vm343_vm1, %v691_v22  ;;  %677 = vmatmul.msk.bf16.gmra.mxu1 %vm343_vm1, %v695_v23 }
  0x5d   : > { %681 = vmatmul.msk.bf16.gmra.mxu2 %vm343_vm1, %v699_v24  ;;  %685 = vmatmul.msk.bf16.gmra.mxu3 %vm343_vm1, %v703_v25 }
  0xa9   : > { %v405_v27 = vpop.f32.mrf.mxu0  ;;  %v425_v28 = vpop.f32.mrf.mxu1 }
  0xaa   : > { %v406_v29 = vadd.f32 %v841_v26, %v405_v27  ;;  %v426_v30 = vadd.f32 %v841_v26, %v425_v28 }
  0xac   : > { %485 = vst [vmem:[%s846_s11] sm:$0xff] %v406_v29 }
  0xad   : > { %493 = vst [vmem:[%s846_s11 + $0x40] sm:$0xff] %v426_v30 }
  0xb0   : > { %v445_v31 = vpop.f32.mrf.mxu2  ;;  %v465_v32 = vpop.f32.mrf.mxu3 }
  0xb1   : > { %v446_v33 = vadd.f32 %v841_v26, %v445_v31  ;;  %v466_v34 = vadd.f32 %v841_v26, %v465_v32  ;;  %v407_v35 = vpop.f32.mrf.mxu0  ;;  %v427_v36 = vpop.f32.mrf.mxu1 }
  0xb2   : > { %v408_v37 = vadd.f32 %v841_v26, %v407_v35  ;;  %v428_v38 = vadd.f32 %v841_v26, %v427_v36 }
  0xb3   : > { %501 = vst [vmem:[%s846_s11 + $0x80] sm:$0xff] %v446_v33 }
  0xb4   : > { %509 = vst [vmem:[%s846_s11 + $0xc0] sm:$0xff] %v466_v34 }
  0xb5   : > { %486 = vst [vmem:[%s846_s11 + $0x8] sm:$0xff] %v408_v37 }
  0xb6   : > { %494 = vst [vmem:[%s846_s11 + $0x48] sm:$0xff] %v428_v38 }
  0xb8   : > { %v447_v39 = vpop.f32.mrf.mxu2  ;;  %v467_v40 = vpop.f32.mrf.mxu3 }
  0xb9   : > { %v448_v41 = vadd.f32 %v841_v26, %v447_v39  ;;  %v468_v42 = vadd.f32 %v841_v26, %v467_v40  ;;  %v410_v43 = vpop.f32.mrf.mxu0  ;;  %v430_v44 = vpop.f32.mrf.mxu1 }
  0xba   : > { %v411_v45 = vadd.f32 %v841_v26, %v410_v43  ;;  %v431_v46 = vadd.f32 %v841_v26, %v430_v44 }
  0xbb   : > { %502 = vst [vmem:[%s846_s11 + $0x88] sm:$0xff] %v448_v41 }
  0xbc   : > { %510 = vst [vmem:[%s846_s11 + $0xc8] sm:$0xff] %v468_v42 }
  0xbd   : > { %487 = vst [vmem:[%s846_s11 + $0x10] sm:$0xff] %v411_v45 }
  0xbe   : > { %495 = vst [vmem:[%s846_s11 + $0x50] sm:$0xff] %v431_v46 }
  0xc0   : > { %v450_v47 = vpop.f32.mrf.mxu2  ;;  %v470_v48 = vpop.f32.mrf.mxu3 }
  0xc1   : > { %v451_v49 = vadd.f32 %v841_v26, %v450_v47  ;;  %v471_v50 = vadd.f32 %v841_v26, %v470_v48  ;;  %v412_v51 = vpop.f32.mrf.mxu0  ;;  %v432_v52 = vpop.f32.mrf.mxu1 }
  0xc2   : > { %v413_v53 = vadd.f32 %v841_v26, %v412_v51  ;;  %v433_v54 = vadd.f32 %v841_v26, %v432_v52 }
  0xc3   : > { %503 = vst [vmem:[%s846_s11 + $0x90] sm:$0xff] %v451_v49 }
  0xc4   : > { %511 = vst [vmem:[%s846_s11 + $0xd0] sm:$0xff] %v471_v50 }
  0xc5   : > { %488 = vst [vmem:[%s846_s11 + $0x18] sm:$0xff] %v413_v53 }
  0xc6   : > { %496 = vst [vmem:[%s846_s11 + $0x58] sm:$0xff] %v433_v54 }
  0xc8   : > { %v452_v55 = vpop.f32.mrf.mxu2  ;;  %v472_v56 = vpop.f32.mrf.mxu3 }
  0xc9   : > { %v453_v57 = vadd.f32 %v841_v26, %v452_v55  ;;  %v473_v58 = vadd.f32 %v841_v26, %v472_v56  ;;  %v415_v59 = vpop.f32.mrf.mxu0  ;;  %v435_v60 = vpop.f32.mrf.mxu1 }
  0xca   : > { %v416_v61 = vadd.f32 %v841_v26, %v415_v59  ;;  %v436_v62 = vadd.f32 %v841_v26, %v435_v60 }
  0xcb   : > { %504 = vst [vmem:[%s846_s11 + $0x98] sm:$0xff] %v453_v57 }
  0xcc   : > { %512 = vst [vmem:[%s846_s11 + $0xd8] sm:$0xff] %v473_v58 }
  0xcd   : > { %489 = vst [vmem:[%s846_s11 + $0x20] sm:$0xff] %v416_v61 }
  0xce   : > { %497 = vst [vmem:[%s846_s11 + $0x60] sm:$0xff] %v436_v62 }
  0xd0   : > { %v455_v63 = vpop.f32.mrf.mxu2  ;;  %v475_v0 = vpop.f32.mrf.mxu3 }
  0xd1   : > { %v456_v1 = vadd.f32 %v841_v26, %v455_v63  ;;  %v476_v2 = vadd.f32 %v841_v26, %v475_v0  ;;  %v417_v3 = vpop.f32.mrf.mxu0  ;;  %v437_v4 = vpop.f32.mrf.mxu1 }
  0xd2   : > { %v418_v5 = vadd.f32 %v841_v26, %v417_v3  ;;  %v438_v6 = vadd.f32 %v841_v26, %v437_v4 }
  0xd3   : > { %505 = vst [vmem:[%s846_s11 + $0xa0] sm:$0xff] %v456_v1 }
  0xd4   : > { %513 = vst [vmem:[%s846_s11 + $0xe0] sm:$0xff] %v476_v2 }
  0xd5   : > { %490 = vst [vmem:[%s846_s11 + $0x28] sm:$0xff] %v418_v5 }
  0xd6   : > { %498 = vst [vmem:[%s846_s11 + $0x68] sm:$0xff] %v438_v6 }
  0xd8   : > { %v457_v7 = vpop.f32.mrf.mxu2  ;;  %v477_v8 = vpop.f32.mrf.mxu3 }
  0xd9   : > { %v458_v9 = vadd.f32 %v841_v26, %v457_v7  ;;  %v478_v10 = vadd.f32 %v841_v26, %v477_v8  ;;  %v420_v11 = vpop.f32.mrf.mxu0  ;;  %v440_v12 = vpop.f32.mrf.mxu1 }
  0xda   : > { %v421_v13 = vadd.f32 %v841_v26, %v420_v11  ;;  %v441_v14 = vadd.f32 %v841_v26, %v440_v12 }
  0xdb   : > { %506 = vst [vmem:[%s846_s11 + $0xa8] sm:$0xff] %v458_v9 }
  0xdc   : > { %514 = vst [vmem:[%s846_s11 + $0xe8] sm:$0xff] %v478_v10 }
  0xdd   : > { %491 = vst [vmem:[%s846_s11 + $0x30] sm:$0xff] %v421_v13 }
  0xde   : > { %499 = vst [vmem:[%s846_s11 + $0x70] sm:$0xff] %v441_v14 }
  0xe0   : > { %v460_v15 = vpop.f32.mrf.mxu2  ;;  %v480_v16 = vpop.f32.mrf.mxu3 }
  0xe1   : > { %v461_v17 = vadd.f32 %v841_v26, %v460_v15  ;;  %v481_v18 = vadd.f32 %v841_v26, %v480_v16  ;;  %v422_v19 = vpop.f32.mrf.mxu0  ;;  %v442_v20 = vpop.f32.mrf.mxu1 }
  0xe2   : > { %v423_v21 = vadd.f32 %v841_v26, %v422_v19  ;;  %v443_v22 = vadd.f32 %v841_v26, %v442_v20 }
  0xe3   : > { %507 = vst [vmem:[%s846_s11 + $0xb0] sm:$0xff] %v461_v17 }
  0xe4   : > { %515 = vst [vmem:[%s846_s11 + $0xf0] sm:$0xff] %v481_v18 }
  0xe5   : > { %492 = vst [vmem:[%s846_s11 + $0x38] sm:$0xff] %v423_v21 }
  0xe6   : > { %500 = vst [vmem:[%s846_s11 + $0x78] sm:$0xff] %v443_v22 }
  0xe8   : > { %v462_v23 = vpop.f32.mrf.mxu2  ;;  %v482_v24 = vpop.f32.mrf.mxu3 }
  0xe9   : > { %v463_v25 = vadd.f32 %v841_v26, %v462_v23  ;;  %v483_v27 = vadd.f32 %v841_v26, %v482_v24 }
  0xeb   : > { %508 = vst [vmem:[%s846_s11 + $0xb8] sm:$0xff] %v463_v25 }
  0xec   : > { %516 = vst [vmem:[%s846_s11 + $0xf8] sm:$0xff] %v483_v27 }
  0xed PF: > { %s13_s12 = sadd.s32 1, %s746_s12  }
  0xee   : > { %p10_p4 = scmp.ge.s32.totalorder %s13_s12, 4  }
  0xf0   :  { %12 = sbr.rel (!%p10_p4) target bundleno = 1 (0x1), region = 62 }

</bundles_post_ra>
